<compile_context>
chip_gen: v5e
topology: v5e:2x2
jax: 0.10.0
libtpu: 0.0.40
codegen_flags: <defaults>
</compile_context>

<pallas_src>
import jax
import jax.numpy as jnp
import numpy as np
from jax.experimental import pallas as pl
from jax.experimental.pallas import tpu as pltpu

# ---- hyperparameters from bigram.py ----
N_EMBED = 64
BLOCK_SIZE = 32
N_HEADS = 4
HEAD_SIZE = N_EMBED // N_HEADS
LN_EPS = 1e-5  # PyTorch nn.LayerNorm default


# ----------------------------------------------------------------------------
# In-kernel helpers
# ----------------------------------------------------------------------------
def _layer_norm(x, w, b):
    mu = jnp.mean(x, axis=-1, keepdims=True)
    var = jnp.mean((x - mu) ** 2, axis=-1, keepdims=True)
    return (x - mu) * jax.lax.rsqrt(var + LN_EPS) * w + b


# ----------------------------------------------------------------------------
# Pallas kernel: one full transformer block for a stacked batch tile
# ----------------------------------------------------------------------------
def block_kernel(x_ref, ln1_w, ln1_b, wqkv, pw, proj_b,
                 ln2_w, ln2_b, ff1_w, ff1_b, ff2_w, ff2_b, out_ref):
    Bt, T, C = x_ref.shape
    H, D = N_HEADS, HEAD_SIZE
    HB = H * Bt

    # Stack batch elements into rows: (Bt*T, C)  (leading-dim merge, layout-trivial)
    x = x_ref[...].reshape(Bt * T, C)

    # ---- LN1 + fused QKV projection (one (C, 3C) matmul) ----
    xn = _layer_norm(x, ln1_w[0], ln1_b[0])
    qkv = jnp.dot(xn, wqkv[...], preferred_element_type=jnp.float32)   # (Bt*T, 3C)

    # ---- gather heads onto a single leading batch dim (head-major: idx = h*Bt + b) ----
    def heads(base):
        parts = [qkv[:, base + h * D: base + (h + 1) * D].reshape(Bt, T, D)
                 for h in range(H)]
        return jnp.concatenate(parts, axis=0)                          # (HB, T, D)

    # NOTE: bigram.py scales by C**-0.5 where C = n_embed (not head_size).
    # Scale folded into Q once (T*D elems per head instead of a (T,T) scale).
    scale = jnp.float32(C ** -0.5)
    q = heads(0) * scale
    k = heads(C)
    v = heads(2 * C)

    # ---- batched causal attention over all (head, batch) pairs at once ----
    s = jax.lax.dot_general(q, k, (((2,), (2,)), ((0,), (0,))),
                            preferred_element_type=jnp.float32)        # (HB, T, T)
    row = jax.lax.broadcasted_iota(jnp.int32, (HB, T, T), 1)
    col = jax.lax.broadcasted_iota(jnp.int32, (HB, T, T), 2)
    s = jnp.where(col <= row, s, jnp.float32(-1e30))   # finite mask, no inf paths
    s = s - jnp.max(s, axis=-1, keepdims=True)
    p = jnp.exp(s)
    denom = jnp.sum(p, axis=-1, keepdims=True)                          # (HB, T, 1)
    o = jax.lax.dot_general(p, v, (((2,), (1,)), ((0,), (0,))),
                            preferred_element_type=jnp.float32)        # (HB, T, D)
    # Normalize AFTER P@V (scales (T,D) not (T,T)); reciprocal lands on the EUP.
    o = o * pl.reciprocal(denom, approx=False)

    # ---- output projection folded per head (pw is (HB, D, C)), summed over heads ----
    op = jax.lax.dot_general(o, pw[...], (((2,), (1,)), ((0,), (0,))),
                             preferred_element_type=jnp.float32)       # (HB, T, C)
    sa = op[0:Bt]
    for h in range(1, H):
        sa = sa + op[h * Bt:(h + 1) * Bt]                              # (Bt, T, C)
    sa = sa.reshape(Bt * T, C) + proj_b[0]

    x1 = x + sa                                   # residual 1 (dropout = identity)

    # ---- LN2 + feed-forward (4x, ReLU) ----
    xn2 = _layer_norm(x1, ln2_w[0], ln2_b[0])
    h1 = jnp.dot(xn2, ff1_w[...], preferred_element_type=jnp.float32) + ff1_b[0]
    h1 = jnp.maximum(h1, 0.0)
    ff = jnp.dot(h1, ff2_w[...], preferred_element_type=jnp.float32) + ff2_b[0]

    out_ref[...] = (x1 + ff).reshape(Bt, T, C)    # residual 2 (dropout = identity)


# ----------------------------------------------------------------------------
# Pallas wrapper
# ----------------------------------------------------------------------------
def _bcast_spec(shape):
    """Full-array block, broadcast (constant index) across the batch grid."""
    n = len(shape)
    return pl.BlockSpec(shape, lambda i, n=n: (0,) * n)


def _default_grid_steps(B):
    """One fat step per TensorCore: 2 on v7x (dual-TC), 1 on v5e/v6e."""
    try:
        kind = jax.devices()[0].device_kind.lower()
    except Exception:
        kind = ""
    n_tc = 2 if ("v7" in kind or "tpu7" in kind) else 1
    steps = max(1, min(n_tc, B))
    while B % steps:
        steps -= 1
    return steps


def transformer_block(x, p, *, grid_steps=None):
    B, T, C = x.shape
    H, D = N_HEADS, HEAD_SIZE
    steps = _default_grid_steps(B) if grid_steps is None else grid_steps
    assert B % steps == 0, "batch must divide the number of grid steps"
    bt = B // steps

    # Pre-tile the output projection per (head, batch-in-tile): index h*bt + b
    # maps to proj_w[h*D:(h+1)*D, :].  Tiny (H*bt*D*C floats), done once in XLA.
    pw_tiled = jnp.repeat(p["proj_w"].reshape(H, D, C), bt, axis=0)     # (H*bt, D, C)

    weights = [p["ln1_w"], p["ln1_b"], p["wqkv"], pw_tiled, p["proj_b"],
               p["ln2_w"], p["ln2_b"], p["ff1_w"], p["ff1_b"],
               p["ff2_w"], p["ff2_b"]]

    in_specs = [pl.BlockSpec((bt, T, C), lambda i: (i, 0, 0))]
    in_specs += [_bcast_spec(tuple(w.shape)) for w in weights]

    # Advisory cost estimate so XLA can overlap surrounding ops (launch-latency bound).
    flops = int(2 * B * T * (C * 3 * C + C * C + 2 * C * 4 * C)
                + 4 * B * H * T * T * D)
    transcendentals = int(B * H * T * T + 3 * B * T)
    bytes_accessed = int(4 * (2 * B * T * C
                              + sum(int(np.prod(w.shape)) for w in weights)))

    return pl.pallas_call(
        block_kernel,
        out_shape=jax.ShapeDtypeStruct((B, T, C), jnp.float32),
        grid=(steps,),
        in_specs=in_specs,
        out_specs=pl.BlockSpec((bt, T, C), lambda i: (i, 0, 0)),
        compiler_params=pltpu.CompilerParams(dimension_semantics=("parallel",)),
        cost_estimate=pl.CostEstimate(flops=flops,
                                      transcendentals=transcendentals,
                                      bytes_accessed=bytes_accessed),
    )(x, *weights)


# ----------------------------------------------------------------------------
# Parameter init (deterministic, synthetic)
# ----------------------------------------------------------------------------
def init_params(key):
    keys = iter(jax.random.split(key, 8))

    def dense(shape, scale=0.02):
        return (scale * jax.random.normal(next(keys), shape)).astype(jnp.float32)

    C = N_EMBED
    return {
        "ln1_w": jnp.ones((1, C), jnp.float32),
        "ln1_b": jnp.zeros((1, C), jnp.float32),
        # fused QKV weight, columns = [Q(all heads) | K(all heads) | V(all heads)],
        # each head occupying a contiguous HEAD_SIZE-wide slice.
        "wqkv": dense((C, 3 * C)),
        "proj_w": dense((C, C)),
        "proj_b": dense((1, C)),
        "ln2_w": jnp.ones((1, C), jnp.float32),
        "ln2_b": jnp.zeros((1, C), jnp.float32),
        "ff1_w": dense((C, 4 * C)),
        "ff1_b": dense((1, 4 * C)),
        "ff2_w": dense((4 * C, C)),
        "ff2_b": dense((1, C)),
    }


# ----------------------------------------------------------------------------
# Pure-JAX reference for correctness check
# ----------------------------------------------------------------------------
def _ref_block(x, p):
    def ln(y, w, b):
        mu = y.mean(-1, keepdims=True)
        var = ((y - mu) ** 2).mean(-1, keepdims=True)
        return (y - mu) / jnp.sqrt(var + LN_EPS) * w[0] + b[0]

    B, T, C = x.shape
    xn = ln(x, p["ln1_w"], p["ln1_b"])
    qkv = xn @ p["wqkv"]
    q, k, v = qkv[..., :C], qkv[..., C:2 * C], qkv[..., 2 * C:]
    qh = q.reshape(B, T, N_HEADS, HEAD_SIZE).transpose(0, 2, 1, 3)
    kh = k.reshape(B, T, N_HEADS, HEAD_SIZE).transpose(0, 2, 1, 3)
    vh = v.reshape(B, T, N_HEADS, HEAD_SIZE).transpose(0, 2, 1, 3)
    s = jnp.einsum("bhqd,bhkd->bhqk", qh, kh) * (C ** -0.5)
    mask = jnp.tril(jnp.ones((T, T), bool))
    s = jnp.where(mask, s, -jnp.inf)
    att = jax.nn.softmax(s, axis=-1)
    o = jnp.einsum("bhqk,bhkd->bhqd", att, vh).transpose(0, 2, 1, 3).reshape(B, T, C)
    x = x + (o @ p["proj_w"] + p["proj_b"][0])
    xn2 = ln(x, p["ln2_w"], p["ln2_b"])
    h1 = jnp.maximum(xn2 @ p["ff1_w"] + p["ff1_b"][0], 0.0)
    return x + (h1 @ p["ff2_w"] + p["ff2_b"][0])


# ----------------------------------------------------------------------------
if __name__ == "__main__":
    key = jax.random.PRNGKey(0)
    k_param, k_x = jax.random.split(key)
    params = init_params(k_param)

    B, T, C = 2, BLOCK_SIZE, N_EMBED
    x = jax.random.normal(k_x, (B, T, C), dtype=jnp.float32)

    out = transformer_block(x, params)
    out = jax.block_until_ready(out)

    assert out.shape == (B, T, C)

    ref = jax.block_until_ready(_ref_block(x, params))
    if not np.allclose(np.asarray(out), np.asarray(ref), atol=1e-4, rtol=1e-4):
        raise AssertionError("Pallas output does not match pure-JAX reference")

    print("KERNEL_OK")
</pallas_src>

<mosaic_0001>
module attributes {stable_mosaic.version = 11 : i64} {
  func.func @block_kernel(%arg0: i32, %arg1: memref<2x32x64xf32, #tpu.memory_space<vmem>>, %arg2: memref<1x64xf32, #tpu.memory_space<vmem>>, %arg3: memref<1x64xf32, #tpu.memory_space<vmem>>, %arg4: memref<64x192xf32, #tpu.memory_space<vmem>>, %arg5: memref<8x16x64xf32, #tpu.memory_space<vmem>>, %arg6: memref<1x64xf32, #tpu.memory_space<vmem>>, %arg7: memref<1x64xf32, #tpu.memory_space<vmem>>, %arg8: memref<1x64xf32, #tpu.memory_space<vmem>>, %arg9: memref<64x256xf32, #tpu.memory_space<vmem>>, %arg10: memref<1x256xf32, #tpu.memory_space<vmem>>, %arg11: memref<256x64xf32, #tpu.memory_space<vmem>>, %arg12: memref<1x64xf32, #tpu.memory_space<vmem>>, %arg13: memref<2x32x64xf32, #tpu.memory_space<vmem>>) attributes {dimension_semantics = [#tpu.dimension_semantics<parallel>], iteration_bounds = array<i64: 1>, scalar_prefetch = 0 : i64, scratch_operands = 0 : i64, tpu.core_type = #tpu.core_type<tc>, window_params = [{transform_indices = @transform_0, window_bounds = array<i64: 2, 32, 64>}, {pipeline_mode = #tpu.pipeline_mode<synchronous>, transform_indices = @transform_1, window_bounds = array<i64: 1, 64>}, {pipeline_mode = #tpu.pipeline_mode<synchronous>, transform_indices = @transform_2, window_bounds = array<i64: 1, 64>}, {pipeline_mode = #tpu.pipeline_mode<synchronous>, transform_indices = @transform_3, window_bounds = array<i64: 64, 192>}, {pipeline_mode = #tpu.pipeline_mode<synchronous>, transform_indices = @transform_4, window_bounds = array<i64: 8, 16, 64>}, {pipeline_mode = #tpu.pipeline_mode<synchronous>, transform_indices = @transform_5, window_bounds = array<i64: 1, 64>}, {pipeline_mode = #tpu.pipeline_mode<synchronous>, transform_indices = @transform_6, window_bounds = array<i64: 1, 64>}, {pipeline_mode = #tpu.pipeline_mode<synchronous>, transform_indices = @transform_7, window_bounds = array<i64: 1, 64>}, {pipeline_mode = #tpu.pipeline_mode<synchronous>, transform_indices = @transform_8, window_bounds = array<i64: 64, 256>}, {pipeline_mode = #tpu.pipeline_mode<synchronous>, transform_indices = @transform_9, window_bounds = array<i64: 1, 256>}, {pipeline_mode = #tpu.pipeline_mode<synchronous>, transform_indices = @transform_10, window_bounds = array<i64: 256, 64>}, {pipeline_mode = #tpu.pipeline_mode<synchronous>, transform_indices = @transform_11, window_bounds = array<i64: 1, 64>}, {transform_indices = @transform_12, window_bounds = array<i64: 2, 32, 64>}]} {
    %c0 = arith.constant 0 : index
    %c0_0 = arith.constant 0 : index
    %c0_1 = arith.constant 0 : index
    %0 = vector.load %arg1[%c0, %c0_0, %c0_1] : memref<2x32x64xf32, #tpu.memory_space<vmem>>, vector<2x32x64xf32>
    %1 = vector.shape_cast %0 : vector<2x32x64xf32> to vector<64x64xf32>
    %c0_2 = arith.constant 0 : index
    %c0_3 = arith.constant 0 : index
    %2 = vector.load %arg2[%c0_2, %c0_3] : memref<1x64xf32, #tpu.memory_space<vmem>>, vector<1x64xf32>
    %3 = vector.shape_cast %2 : vector<1x64xf32> to vector<64xf32>
    %c0_4 = arith.constant 0 : index
    %c0_5 = arith.constant 0 : index
    %4 = vector.load %arg3[%c0_4, %c0_5] : memref<1x64xf32, #tpu.memory_space<vmem>>, vector<1x64xf32>
    %5 = vector.shape_cast %4 : vector<1x64xf32> to vector<64xf32>
    %cst = arith.constant dense<0.000000e+00> : vector<64xf32>
    %6 = vector.multi_reduction <add>, %1, %cst [1] : vector<64x64xf32> to vector<64xf32>
    %7 = vector.shape_cast %6 : vector<64xf32> to vector<64x1xf32>
    %cst_6 = arith.constant 6.400000e+01 : f32
    %8 = vector.broadcast %cst_6 : f32 to vector<64x1xf32>
    %9 = arith.divf %7, %8 : vector<64x1xf32>
    %10 = vector.broadcast %9 : vector<64x1xf32> to vector<64x64xf32>
    %11 = arith.subf %1, %10 : vector<64x64xf32>
    %12 = arith.mulf %11, %11 : vector<64x64xf32>
    %cst_7 = arith.constant dense<0.000000e+00> : vector<64xf32>
    %13 = vector.multi_reduction <add>, %12, %cst_7 [1] : vector<64x64xf32> to vector<64xf32>
    %14 = vector.shape_cast %13 : vector<64xf32> to vector<64x1xf32>
    %cst_8 = arith.constant 6.400000e+01 : f32
    %15 = vector.broadcast %cst_8 : f32 to vector<64x1xf32>
    %16 = arith.divf %14, %15 : vector<64x1xf32>
    %17 = vector.broadcast %9 : vector<64x1xf32> to vector<64x64xf32>
    %18 = arith.subf %1, %17 : vector<64x64xf32>
    %cst_9 = arith.constant 9.99999974E-6 : f32
    %19 = vector.broadcast %cst_9 : f32 to vector<64x1xf32>
    %20 = arith.addf %16, %19 : vector<64x1xf32>
    %21 = math.rsqrt %20 : vector<64x1xf32>
    %22 = vector.broadcast %21 : vector<64x1xf32> to vector<64x64xf32>
    %23 = arith.mulf %18, %22 : vector<64x64xf32>
    %24 = vector.shape_cast %3 : vector<64xf32> to vector<1x64xf32>
    %25 = vector.broadcast %24 : vector<1x64xf32> to vector<64x64xf32>
    %26 = arith.mulf %23, %25 : vector<64x64xf32>
    %27 = vector.shape_cast %5 : vector<64xf32> to vector<1x64xf32>
    %28 = vector.broadcast %27 : vector<1x64xf32> to vector<64x64xf32>
    %29 = arith.addf %26, %28 : vector<64x64xf32>
    %c0_10 = arith.constant 0 : index
    %c0_11 = arith.constant 0 : index
    %30 = vector.load %arg4[%c0_10, %c0_11] : memref<64x192xf32, #tpu.memory_space<vmem>>, vector<64x192xf32>
    %cst_12 = arith.constant dense<0.000000e+00> : vector<64x192xf32>
    %31 = tpu.matmul %29, %30, %cst_12 {dimension_numbers = #tpu.dot_dimension_numbers<[1], [0], [0], [1], [0, 0, 1, 1], [], []>} : vector<64x64xf32>, vector<64x192xf32>, vector<64x192xf32> -> vector<64x192xf32>
    %32 = vector.extract_strided_slice %31 {offsets = [0, 0], sizes = [64, 16], strides = [1, 1]} : vector<64x192xf32> to vector<64x16xf32>
    %33 = vector.shape_cast %32 : vector<64x16xf32> to vector<2x32x16xf32>
    %34 = vector.extract_strided_slice %31 {offsets = [0, 16], sizes = [64, 16], strides = [1, 1]} : vector<64x192xf32> to vector<64x16xf32>
    %35 = vector.shape_cast %34 : vector<64x16xf32> to vector<2x32x16xf32>
    %36 = vector.extract_strided_slice %31 {offsets = [0, 32], sizes = [64, 16], strides = [1, 1]} : vector<64x192xf32> to vector<64x16xf32>
    %37 = vector.shape_cast %36 : vector<64x16xf32> to vector<2x32x16xf32>
    %38 = vector.extract_strided_slice %31 {offsets = [0, 48], sizes = [64, 16], strides = [1, 1]} : vector<64x192xf32> to vector<64x16xf32>
    %39 = vector.shape_cast %38 : vector<64x16xf32> to vector<2x32x16xf32>
    %40 = tpu.concatenate %33, %35, %37, %39 in 0 : vector<2x32x16xf32>, vector<2x32x16xf32>, vector<2x32x16xf32>, vector<2x32x16xf32> -> vector<8x32x16xf32>
    %cst_13 = arith.constant 1.250000e-01 : f32
    %41 = vector.broadcast %cst_13 : f32 to vector<8x32x16xf32>
    %42 = arith.mulf %40, %41 : vector<8x32x16xf32>
    %43 = vector.extract_strided_slice %31 {offsets = [0, 64], sizes = [64, 16], strides = [1, 1]} : vector<64x192xf32> to vector<64x16xf32>
    %44 = vector.shape_cast %43 : vector<64x16xf32> to vector<2x32x16xf32>
    %45 = vector.extract_strided_slice %31 {offsets = [0, 80], sizes = [64, 16], strides = [1, 1]} : vector<64x192xf32> to vector<64x16xf32>
    %46 = vector.shape_cast %45 : vector<64x16xf32> to vector<2x32x16xf32>
    %47 = vector.extract_strided_slice %31 {offsets = [0, 96], sizes = [64, 16], strides = [1, 1]} : vector<64x192xf32> to vector<64x16xf32>
    %48 = vector.shape_cast %47 : vector<64x16xf32> to vector<2x32x16xf32>
    %49 = vector.extract_strided_slice %31 {offsets = [0, 112], sizes = [64, 16], strides = [1, 1]} : vector<64x192xf32> to vector<64x16xf32>
    %50 = vector.shape_cast %49 : vector<64x16xf32> to vector<2x32x16xf32>
    %51 = tpu.concatenate %44, %46, %48, %50 in 0 : vector<2x32x16xf32>, vector<2x32x16xf32>, vector<2x32x16xf32>, vector<2x32x16xf32> -> vector<8x32x16xf32>
    %52 = vector.extract_strided_slice %31 {offsets = [0, 128], sizes = [64, 16], strides = [1, 1]} : vector<64x192xf32> to vector<64x16xf32>
    %53 = vector.shape_cast %52 : vector<64x16xf32> to vector<2x32x16xf32>
    %54 = vector.extract_strided_slice %31 {offsets = [0, 144], sizes = [64, 16], strides = [1, 1]} : vector<64x192xf32> to vector<64x16xf32>
    %55 = vector.shape_cast %54 : vector<64x16xf32> to vector<2x32x16xf32>
    %56 = vector.extract_strided_slice %31 {offsets = [0, 160], sizes = [64, 16], strides = [1, 1]} : vector<64x192xf32> to vector<64x16xf32>
    %57 = vector.shape_cast %56 : vector<64x16xf32> to vector<2x32x16xf32>
    %58 = vector.extract_strided_slice %31 {offsets = [0, 176], sizes = [64, 16], strides = [1, 1]} : vector<64x192xf32> to vector<64x16xf32>
    %59 = vector.shape_cast %58 : vector<64x16xf32> to vector<2x32x16xf32>
    %60 = tpu.concatenate %53, %55, %57, %59 in 0 : vector<2x32x16xf32>, vector<2x32x16xf32>, vector<2x32x16xf32>, vector<2x32x16xf32> -> vector<8x32x16xf32>
    %cst_14 = arith.constant dense<0.000000e+00> : vector<8x32x32xf32>
    %61 = tpu.matmul %42, %51, %cst_14 {dimension_numbers = #tpu.dot_dimension_numbers<[2], [2], [1], [1], [0, 0, 0, 1, 1, 1], [0], [0]>} : vector<8x32x16xf32>, vector<8x32x16xf32>, vector<8x32x32xf32> -> vector<8x32x32xf32>
    %62 = tpu.iota {dimensions = array<i32: 1>} : vector<8x32x32xi32>
    %63 = tpu.iota {dimensions = array<i32: 2>} : vector<8x32x32xi32>
    %64 = arith.cmpi sle, %63, %62 : vector<8x32x32xi32>
    %cst_15 = arith.constant -1.000000e+30 : f32
    %65 = vector.broadcast %cst_15 : f32 to vector<8x32x32xf32>
    %66 = arith.select %64, %61, %65 : vector<8x32x32xi1>, vector<8x32x32xf32>
    %cst_16 = arith.constant dense<0xFF800000> : vector<8x32xf32>
    %67 = vector.multi_reduction <maximumf>, %66, %cst_16 [2] : vector<8x32x32xf32> to vector<8x32xf32>
    %68 = vector.shape_cast %67 : vector<8x32xf32> to vector<8x32x1xf32>
    %69 = vector.broadcast %68 : vector<8x32x1xf32> to vector<8x32x32xf32>
    %70 = arith.subf %66, %69 : vector<8x32x32xf32>
    %71 = math.exp %70 : vector<8x32x32xf32>
    %cst_17 = arith.constant dense<0.000000e+00> : vector<8x32xf32>
    %72 = vector.multi_reduction <add>, %71, %cst_17 [2] : vector<8x32x32xf32> to vector<8x32xf32>
    %73 = vector.shape_cast %72 : vector<8x32xf32> to vector<8x32x1xf32>
    %cst_18 = arith.constant dense<0.000000e+00> : vector<8x32x16xf32>
    %74 = tpu.matmul %71, %60, %cst_18 {dimension_numbers = #tpu.dot_dimension_numbers<[2], [1], [1], [2], [0, 0, 0, 1, 1, 2], [0], [0]>} : vector<8x32x32xf32>, vector<8x32x16xf32>, vector<8x32x16xf32> -> vector<8x32x16xf32>
    %75 = tpu.reciprocal %73 : vector<8x32x1xf32> -> vector<8x32x1xf32>
    %76 = vector.broadcast %75 : vector<8x32x1xf32> to vector<8x32x16xf32>
    %77 = arith.mulf %74, %76 : vector<8x32x16xf32>
    %c0_19 = arith.constant 0 : index
    %c0_20 = arith.constant 0 : index
    %c0_21 = arith.constant 0 : index
    %78 = vector.load %arg5[%c0_19, %c0_20, %c0_21] : memref<8x16x64xf32, #tpu.memory_space<vmem>>, vector<8x16x64xf32>
    %cst_22 = arith.constant dense<0.000000e+00> : vector<8x32x64xf32>
    %79 = tpu.matmul %77, %78, %cst_22 {dimension_numbers = #tpu.dot_dimension_numbers<[2], [1], [1], [2], [0, 0, 0, 1, 1, 2], [0], [0]>} : vector<8x32x16xf32>, vector<8x16x64xf32>, vector<8x32x64xf32> -> vector<8x32x64xf32>
    %80 = vector.extract_strided_slice %79 {offsets = [0, 0, 0], sizes = [2, 32, 64], strides = [1, 1, 1]} : vector<8x32x64xf32> to vector<2x32x64xf32>
    %81 = vector.extract_strided_slice %79 {offsets = [2, 0, 0], sizes = [2, 32, 64], strides = [1, 1, 1]} : vector<8x32x64xf32> to vector<2x32x64xf32>
    %82 = arith.addf %80, %81 : vector<2x32x64xf32>
    %83 = vector.extract_strided_slice %79 {offsets = [4, 0, 0], sizes = [2, 32, 64], strides = [1, 1, 1]} : vector<8x32x64xf32> to vector<2x32x64xf32>
    %84 = arith.addf %82, %83 : vector<2x32x64xf32>
    %85 = vector.extract_strided_slice %79 {offsets = [6, 0, 0], sizes = [2, 32, 64], strides = [1, 1, 1]} : vector<8x32x64xf32> to vector<2x32x64xf32>
    %86 = arith.addf %84, %85 : vector<2x32x64xf32>
    %87 = vector.shape_cast %86 : vector<2x32x64xf32> to vector<64x64xf32>
    %c0_23 = arith.constant 0 : index
    %c0_24 = arith.constant 0 : index
    %88 = vector.load %arg6[%c0_23, %c0_24] : memref<1x64xf32, #tpu.memory_space<vmem>>, vector<1x64xf32>
    %89 = vector.shape_cast %88 : vector<1x64xf32> to vector<64xf32>
    %90 = vector.shape_cast %89 : vector<64xf32> to vector<1x64xf32>
    %91 = vector.broadcast %90 : vector<1x64xf32> to vector<64x64xf32>
    %92 = arith.addf %87, %91 : vector<64x64xf32>
    %93 = arith.addf %1, %92 : vector<64x64xf32>
    %c0_25 = arith.constant 0 : index
    %c0_26 = arith.constant 0 : index
    %94 = vector.load %arg7[%c0_25, %c0_26] : memref<1x64xf32, #tpu.memory_space<vmem>>, vector<1x64xf32>
    %95 = vector.shape_cast %94 : vector<1x64xf32> to vector<64xf32>
    %c0_27 = arith.constant 0 : index
    %c0_28 = arith.constant 0 : index
    %96 = vector.load %arg8[%c0_27, %c0_28] : memref<1x64xf32, #tpu.memory_space<vmem>>, vector<1x64xf32>
    %97 = vector.shape_cast %96 : vector<1x64xf32> to vector<64xf32>
    %cst_29 = arith.constant dense<0.000000e+00> : vector<64xf32>
    %98 = vector.multi_reduction <add>, %93, %cst_29 [1] : vector<64x64xf32> to vector<64xf32>
    %99 = vector.shape_cast %98 : vector<64xf32> to vector<64x1xf32>
    %cst_30 = arith.constant 6.400000e+01 : f32
    %100 = vector.broadcast %cst_30 : f32 to vector<64x1xf32>
    %101 = arith.divf %99, %100 : vector<64x1xf32>
    %102 = vector.broadcast %101 : vector<64x1xf32> to vector<64x64xf32>
    %103 = arith.subf %93, %102 : vector<64x64xf32>
    %104 = arith.mulf %103, %103 : vector<64x64xf32>
    %cst_31 = arith.constant dense<0.000000e+00> : vector<64xf32>
    %105 = vector.multi_reduction <add>, %104, %cst_31 [1] : vector<64x64xf32> to vector<64xf32>
    %106 = vector.shape_cast %105 : vector<64xf32> to vector<64x1xf32>
    %cst_32 = arith.constant 6.400000e+01 : f32
    %107 = vector.broadcast %cst_32 : f32 to vector<64x1xf32>
    %108 = arith.divf %106, %107 : vector<64x1xf32>
    %109 = vector.broadcast %101 : vector<64x1xf32> to vector<64x64xf32>
    %110 = arith.subf %93, %109 : vector<64x64xf32>
    %cst_33 = arith.constant 9.99999974E-6 : f32
    %111 = vector.broadcast %cst_33 : f32 to vector<64x1xf32>
    %112 = arith.addf %108, %111 : vector<64x1xf32>
    %113 = math.rsqrt %112 : vector<64x1xf32>
    %114 = vector.broadcast %113 : vector<64x1xf32> to vector<64x64xf32>
    %115 = arith.mulf %110, %114 : vector<64x64xf32>
    %116 = vector.shape_cast %95 : vector<64xf32> to vector<1x64xf32>
    %117 = vector.broadcast %116 : vector<1x64xf32> to vector<64x64xf32>
    %118 = arith.mulf %115, %117 : vector<64x64xf32>
    %119 = vector.shape_cast %97 : vector<64xf32> to vector<1x64xf32>
    %120 = vector.broadcast %119 : vector<1x64xf32> to vector<64x64xf32>
    %121 = arith.addf %118, %120 : vector<64x64xf32>
    %c0_34 = arith.constant 0 : index
    %c0_35 = arith.constant 0 : index
    %122 = vector.load %arg9[%c0_34, %c0_35] : memref<64x256xf32, #tpu.memory_space<vmem>>, vector<64x256xf32>
    %cst_36 = arith.constant dense<0.000000e+00> : vector<64x256xf32>
    %123 = tpu.matmul %121, %122, %cst_36 {dimension_numbers = #tpu.dot_dimension_numbers<[1], [0], [0], [1], [0, 0, 1, 1], [], []>} : vector<64x64xf32>, vector<64x256xf32>, vector<64x256xf32> -> vector<64x256xf32>
    %c0_37 = arith.constant 0 : index
    %c0_38 = arith.constant 0 : index
    %124 = vector.load %arg10[%c0_37, %c0_38] : memref<1x256xf32, #tpu.memory_space<vmem>>, vector<1x256xf32>
    %125 = vector.shape_cast %124 : vector<1x256xf32> to vector<256xf32>
    %126 = vector.shape_cast %125 : vector<256xf32> to vector<1x256xf32>
    %127 = vector.broadcast %126 : vector<1x256xf32> to vector<64x256xf32>
    %128 = arith.addf %123, %127 : vector<64x256xf32>
    %cst_39 = arith.constant 0.000000e+00 : f32
    %129 = vector.broadcast %cst_39 : f32 to vector<64x256xf32>
    %130 = arith.maximumf %128, %129 : vector<64x256xf32>
    %c0_40 = arith.constant 0 : index
    %c0_41 = arith.constant 0 : index
    %131 = vector.load %arg11[%c0_40, %c0_41] : memref<256x64xf32, #tpu.memory_space<vmem>>, vector<256x64xf32>
    %cst_42 = arith.constant dense<0.000000e+00> : vector<64x64xf32>
    %132 = tpu.matmul %130, %131, %cst_42 {dimension_numbers = #tpu.dot_dimension_numbers<[1], [0], [0], [1], [0, 0, 1, 1], [], []>} : vector<64x256xf32>, vector<256x64xf32>, vector<64x64xf32> -> vector<64x64xf32>
    %c0_43 = arith.constant 0 : index
    %c0_44 = arith.constant 0 : index
    %133 = vector.load %arg12[%c0_43, %c0_44] : memref<1x64xf32, #tpu.memory_space<vmem>>, vector<1x64xf32>
    %134 = vector.shape_cast %133 : vector<1x64xf32> to vector<64xf32>
    %135 = vector.shape_cast %134 : vector<64xf32> to vector<1x64xf32>
    %136 = vector.broadcast %135 : vector<1x64xf32> to vector<64x64xf32>
    %137 = arith.addf %132, %136 : vector<64x64xf32>
    %138 = arith.addf %93, %137 : vector<64x64xf32>
    %139 = vector.shape_cast %138 : vector<64x64xf32> to vector<2x32x64xf32>
    %c0_45 = arith.constant 0 : index
    %c0_46 = arith.constant 0 : index
    %c0_47 = arith.constant 0 : index
    %140 = vector.load %arg13[%c0_45, %c0_46, %c0_47] : memref<2x32x64xf32, #tpu.memory_space<vmem>>, vector<2x32x64xf32>
    tpu.vector_store %arg13[%c0_45, %c0_46, %c0_47], %139 {strides = array<i32>} : memref<2x32x64xf32, #tpu.memory_space<vmem>>, vector<2x32x64xf32>,
    return
  }
  func.func @transform_0(%arg0: i32) -> (i32, i32, i32) {
    %c0_i32 = arith.constant 0 : i32
    %c0_i32_0 = arith.constant 0 : i32
    %c0_i32_1 = arith.constant 0 : i32
    return %arg0, %c0_i32, %c0_i32_0 : i32, i32, i32
  }
  func.func @transform_1(%arg0: i32) -> (i32, i32) {
    %c0_i32 = arith.constant 0 : i32
    %c0_i32_0 = arith.constant 0 : i32
    %c0_i32_1 = arith.constant 0 : i32
    return %c0_i32, %c0_i32_0 : i32, i32
  }
  func.func @transform_2(%arg0: i32) -> (i32, i32) {
    %c0_i32 = arith.constant 0 : i32
    %c0_i32_0 = arith.constant 0 : i32
    %c0_i32_1 = arith.constant 0 : i32
    return %c0_i32, %c0_i32_0 : i32, i32
  }
  func.func @transform_3(%arg0: i32) -> (i32, i32) {
    %c0_i32 = arith.constant 0 : i32
    %c0_i32_0 = arith.constant 0 : i32
    %c0_i32_1 = arith.constant 0 : i32
    return %c0_i32, %c0_i32_0 : i32, i32
  }
  func.func @transform_4(%arg0: i32) -> (i32, i32, i32) {
    %c0_i32 = arith.constant 0 : i32
    %c0_i32_0 = arith.constant 0 : i32
    %c0_i32_1 = arith.constant 0 : i32
    %c0_i32_2 = arith.constant 0 : i32
    return %c0_i32, %c0_i32_0, %c0_i32_1 : i32, i32, i32
  }
  func.func @transform_5(%arg0: i32) -> (i32, i32) {
    %c0_i32 = arith.constant 0 : i32
    %c0_i32_0 = arith.constant 0 : i32
    %c0_i32_1 = arith.constant 0 : i32
    return %c0_i32, %c0_i32_0 : i32, i32
  }
  func.func @transform_6(%arg0: i32) -> (i32, i32) {
    %c0_i32 = arith.constant 0 : i32
    %c0_i32_0 = arith.constant 0 : i32
    %c0_i32_1 = arith.constant 0 : i32
    return %c0_i32, %c0_i32_0 : i32, i32
  }
  func.func @transform_7(%arg0: i32) -> (i32, i32) {
    %c0_i32 = arith.constant 0 : i32
    %c0_i32_0 = arith.constant 0 : i32
    %c0_i32_1 = arith.constant 0 : i32
    return %c0_i32, %c0_i32_0 : i32, i32
  }
  func.func @transform_8(%arg0: i32) -> (i32, i32) {
    %c0_i32 = arith.constant 0 : i32
    %c0_i32_0 = arith.constant 0 : i32
    %c0_i32_1 = arith.constant 0 : i32
    return %c0_i32, %c0_i32_0 : i32, i32
  }
  func.func @transform_9(%arg0: i32) -> (i32, i32) {
    %c0_i32 = arith.constant 0 : i32
    %c0_i32_0 = arith.constant 0 : i32
    %c0_i32_1 = arith.constant 0 : i32
    return %c0_i32, %c0_i32_0 : i32, i32
  }
  func.func @transform_10(%arg0: i32) -> (i32, i32) {
    %c0_i32 = arith.constant 0 : i32
    %c0_i32_0 = arith.constant 0 : i32
    %c0_i32_1 = arith.constant 0 : i32
    return %c0_i32, %c0_i32_0 : i32, i32
  }
  func.func @transform_11(%arg0: i32) -> (i32, i32) {
    %c0_i32 = arith.constant 0 : i32
    %c0_i32_0 = arith.constant 0 : i32
    %c0_i32_1 = arith.constant 0 : i32
    return %c0_i32, %c0_i32_0 : i32, i32
  }
  func.func @transform_12(%arg0: i32) -> (i32, i32, i32) {
    %c0_i32 = arith.constant 0 : i32
    %c0_i32_0 = arith.constant 0 : i32
    %c0_i32_1 = arith.constant 0 : i32
    return %arg0, %c0_i32, %c0_i32_0 : i32, i32, i32
  }
}

</mosaic_0001>

<bundles_post_ra>
// kernel: tpu_custom_call.1
= control target key start
LH: loop header
LB: loop body
LE: loop exit
PB: predicated region body
PF: predicated region fallthrough
CT: control target
= control target key end

     0   :  { %17 = vsyncpa [#allocation3], 0  ;;  %s5562_s0 = inlined_call_operand.hbm [shape: f32[2,32,64], index: 0, kind: input, shape index: {}]   ;;  %s5563_s1 = inlined_call_operand.hbm [shape: f32[1,64], index: 1, kind: input, shape index: {}]   ;;  %s5564_s2 = inlined_call_operand.hbm [shape: f32[1,64], index: 2, kind: input, shape index: {}]   ;;  %s5565_s3 = inlined_call_operand.vmem [shape: f32[64,192], index: 3, kind: input, shape index: {}]   ;;  %s5566_s4 = inlined_call_operand.vmem [shape: f32[8,16,64], index: 4, kind: input, shape index: {}]   ;;  %s5567_s5 = inlined_call_operand.vmem [shape: f32[1,64], index: 5, kind: input, shape index: {}]   ;;  %s5568_s6 = inlined_call_operand.vmem [shape: f32[1,64], index: 6, kind: input, shape index: {}]   ;;  %s5569_s7 = inlined_call_operand.hbm [shape: f32[1,64], index: 7, kind: input, shape index: {}]   ;;  %s5570_s8 = inlined_call_operand.vmem [shape: f32[64,256], index: 8, kind: input, shape index: {}]   ;;  %s5571_s9 = inlined_call_operand.vmem [shape: f32[1,256], index: 9, kind: input, shape index: {}]   ;;  %s5572_s10 = inlined_call_operand.vmem [shape: f32[256,64], index: 10, kind: input, shape index: {}]   ;;  %s5573_s11 = inlined_call_operand.vmem [shape: f32[1,64], index: 11, kind: input, shape index: {}]   ;;  %s5574_s12 = inlined_call_operand.hbm [shape: f32[2,32,64], index: 12, kind: output, shape index: {}]  }
   0x1   :  { %18 = vsyncpa [#allocation6], 0 }
   0x2   :  { %19 = vsyncpa [#allocation9], 0  ;;  %s39_s23 = sshll.u32 %s5563_s1, 4  ;;  %s40_s23 = int_to_ptr.hbm [resolvable:$true] %s39_s23 }
   0x3   :  { %20 = vsyncpa [#allocation4], 0  ;;  %s3649_s24 = smov [#allocation5]   ;;  %s25_s28 = sshll.u32 %s5562_s0, 4  ;;  %s26_s28 = int_to_ptr.hbm [resolvable:$true] %s25_s28 }
   0x4   :  { %s41_s25 = sshll.u32 %s3649_s24, 4  ;;  %s3650_s29 = smov [#allocation2]   ;;  %s42_s25 = int_to_ptr.vmem [resolvable:$true] %s41_s25 }
   0x5   :  { %44 = dma.hbm_to_vmem [thread:$0]  %s40_s23, 16, %s42_s25, [#allocation6]  }
   0x6   :  { %s27_s30 = sshll.u32 %s3650_s29, 4  ;;  %s3651_s13 = smov 128   ;;  %s28_s30 = int_to_ptr.vmem [resolvable:$true] %s27_s30 }
   0x7   :  { %s3652_s14 = smov 8   ;;  %s50_s16 = sshll.u32 %s5564_s2, 4  ;;  %s51_s16 = int_to_ptr.hbm [resolvable:$true] %s50_s16 }
   0x8   :  { %33 = dma.hbm_to_vmem [thread:$0]  %s26_s28, 1024, %s28_s30, [#allocation3], %s3651_s13, %s3651_s13, %s3652_s14  }
   0x9   :  { %s3653_s17 = smov [#allocation7]   ;;  %s69_s20 = sshll.u32 %s5569_s7, 4  ;;  %s70_s20 = int_to_ptr.hbm [resolvable:$true] %s69_s20 }
   0xa   :  { %s52_s18 = sshll.u32 %s3653_s17, 4  ;;  %s3654_s21 = smov [#allocation8]   ;;  %s53_s18 = int_to_ptr.vmem [resolvable:$true] %s52_s18 }
   0xb   :  { %55 = dma.hbm_to_vmem [thread:$0]  %s51_s16, 16, %s53_s18, [#allocation6]  }
   0xc   :  { %s71_s22 = sshll.u32 %s3654_s21, 4  ;;  %s72_s22 = int_to_ptr.vmem [resolvable:$true] %s71_s22 }
   0xd   :  { %74 = dma.hbm_to_vmem [thread:$0]  %s70_s20, 16, %s72_s22, [#allocation9]  }
   0xe   :  { %3641 = dma.done.wait [#allocation3], 1024  }
   0xf   :  { %3642 = vsyncadd [#allocation3], 4294966272 }
  0x10   :  { %3643 = dma.done.wait [#allocation6], 32  }
  0x11   :  { %3644 = vsyncadd [#allocation6], 4294967264 }
  0x12   :  { %3645 = dma.done.wait [#allocation9], 16  }
  0x13   :  { %3646 = vsyncadd [#allocation9], 4294967280  ;;  %vm109_vm0 = vcmask 523264   ;;  %v103_v0 = vld [vmem:[#allocation2 + $0x20] sm:$0xff]  ;;  %v101_v1 = vld [vmem:[#allocation2 + $0x10] sm:$0xff]  ;;  %v3655_v14 = vmov 64.0  }
  0x14   :  { %v99_v2 = vld [vmem:[#allocation2] sm:$0xff]  ;;  %v122_v3 = vsel %vm109_vm0, %v103_v0, 0.0  ;;  %v116_v4 = vsel %vm109_vm0, %v101_v1, 0.0  ;;  %v104_v6 = vld [vmem:[#allocation2 + $0x28] sm:$0xff]  ;;  %v102_v7 = vld [vmem:[#allocation2 + $0x18] sm:$0xff]  ;;  %3351 = vrcp.f32 %v3655_v14  ;;  %s3657_s16 = smov 112  }
  0x15   :  { %v110_v5 = vsel %vm109_vm0, %v99_v2, 0.0  ;;  %123 = vadd.xlane.f32.xlu2 %v122_v3  ;;  %117 = vadd.xlane.f32.xlu1 %v116_v4  ;;  %v100_v8 = vld [vmem:[#allocation2 + $0x8] sm:$0xff]  ;;  %v125_v9 = vsel %vm109_vm0, %v104_v6, 0.0  ;;  %v119_v10 = vsel %vm109_vm0, %v102_v7, 0.0  ;;  %v105_v12 = vld [vmem:[#allocation2 + $0x30] sm:$0xff]  ;;  %v3768_v40 = vld [vmem:[#allocation2 + $0x38] sm:$0xff] }
  0x16   :  { %111 = vadd.xlane.f32.xlu0 %v110_v5  ;;  %v113_v11 = vsel %vm109_vm0, %v100_v8, 0.0  ;;  %v128_v13 = vsel %vm109_vm0, %v105_v12, 0.0  ;;  %v131_v45 = vsel %vm109_vm0, %v3768_v40, 0.0  ;;  %v329_v58 = vld [vmem:[%s5565_s3 + $0x70] sm:$0xff]  ;;  %v330_v59 = vld [vmem:[%s5565_s3 + $0x78] sm:$0xff]  ;;  %v327_v60 = vld [vmem:[%s5565_s3 + $0x60] sm:$0xff] }
  0x17   :  { %363 = vmatpush.msra.mxu0 %v329_v58  ;;  %404 = vmatpush.msra.mxu1 %v330_v59  ;;  %v328_v61 = vld [vmem:[%s5565_s3 + $0x68] sm:$0xff]  ;;  %v325_v62 = vld [vmem:[%s5565_s3 + $0x50] sm:$0xff]  ;;  %v326_v63 = vld [vmem:[%s5565_s3 + $0x58] sm:$0xff]  ;;  %s3658_s17 = smov 80   ;;  %s3659_s18 = smov 96  }
  0x18   :  { %v322_v3 = vld [vmem:[%s5565_s3 + $0x38] sm:$0xff]  ;;  %v319_v4 = vld [vmem:[%s5565_s3 + $0x20] sm:$0xff]  ;;  %v320_v5 = vld [vmem:[%s5565_s3 + $0x28] sm:$0xff]  ;;  %s3098_s15 = sshll.u32 %s5574_s12, 4  ;;  %s3099_s15 = int_to_ptr.hbm [resolvable:$true] %s3098_s15 }
  0x19   :  { %364 = vmatpush.msra.mxu0 %v327_v60  ;;  %405 = vmatpush.msra.mxu1 %v328_v61 }
  0x1a   :  { %v3352_v15 = vpop.eup %3351 }
  0x1b   :  { %v135_v16 = vmul.f32 64.0, %v3352_v15  ;;  %vm139_vm1 = vweird.f32 %v3352_v15  ;;  %365 = vmatpush.msra.mxu0 %v325_v62  ;;  %406 = vmatpush.msra.mxu1 %v326_v63 }
  0x1d   :  { %126 = vadd.xlane.f32.xlu2 %v125_v9  ;;  %120 = vadd.xlane.f32.xlu1 %v119_v10  ;;  %v136_v17 = vsub.f32 1.0, %v135_v16  ;;  %v316_v9 = vld [vmem:[%s5565_s3 + $0x8] sm:$0xff] }
  0x1e   :  { %114 = vadd.xlane.f32.xlu0 %v113_v11 }
  0x1f   :  { %v137_v18 = vmul.f32 %v3352_v15, %v136_v17 }
  0x21   :  { %v138_v19 = vadd.f32 %v3352_v15, %v137_v18 }
  0x23   :  { %v3748_v20 = vsel %vm139_vm1, %v3352_v15, %v138_v19 }
  0x25   :  { %129 = vadd.xlane.f32.xlu1 %v128_v13 }
  0x88   :  { %v124_v21 = vpop.xlane.xlu2 %123  ;;  %v118_v22 = vpop.xlane.xlu1 %117 }
  0x89   :  { %v143_v23 = vmul.f32 %v3748_v20, %v118_v22  ;;  %v112_v24 = vpop.xlane.xlu0 %111  ;;  %v145_v36 = vmul.f32 %v3748_v20, %v124_v21 }
  0x8a   :  { %v141_v25 = vmul.f32 %v3748_v20, %v112_v24 }
  0x8b   :  { %v3752_v26 = vsub.f32 %v101_v1, %v143_v23  ;;  %v3774_v43 = vsub.f32 %v103_v0, %v145_v36  ;;  %v323_v0 = vld [vmem:[%s5565_s3 + $0x40] sm:$0xff]  ;;  %v324_v1 = vld [vmem:[%s5565_s3 + $0x48] sm:$0xff] }
  0x8c   :  { %v3754_v27 = vsub.f32 %v99_v2, %v141_v25  ;;  %366 = vmatpush.msra.mxu0 %v323_v0  ;;  %407 = vmatpush.msra.mxu1 %v324_v1  ;;  %v321_v2 = vld [vmem:[%s5565_s3 + $0x30] sm:$0xff] }
  0x8d   :  { %v159_v28 = vmul.f32 %v3752_v26, %v3752_v26  ;;  %v161_v51 = vmul.f32 %v3774_v43, %v3774_v43 }
  0x8e   :  { %v157_v29 = vmul.f32 %v3754_v27, %v3754_v27  ;;  %367 = vmatpush.msra.mxu0 %v321_v2  ;;  %408 = vmatpush.msra.mxu1 %v322_v3 }
  0x8f   :  { %v171_v30 = vsel %vm109_vm0, %v159_v28, 0.0  ;;  %v177_v54 = vsel %vm109_vm0, %v161_v51, 0.0  ;;  %v3867_v51 = vld [vmem:[#allocation5] ss:$0 sm:$0xff] }
  0x90   :  { %v127_v31 = vpop.xlane.xlu2 %126  ;;  %172 = vadd.xlane.f32.xlu1 %v171_v30  ;;  %v165_v32 = vsel %vm109_vm0, %v157_v29, 0.0  ;;  %v121_v33 = vpop.xlane.xlu1 %120  ;;  %368 = vmatpush.msra.mxu0 %v319_v4 }
  0x91   :  { %v146_v34 = vmul.f32 %v3748_v20, %v127_v31  ;;  %166 = vadd.xlane.f32.xlu0 %v165_v32  ;;  %v115_v35 = vpop.xlane.xlu0 %114  ;;  %v144_v38 = vmul.f32 %v3748_v20, %v121_v33  ;;  %409 = vmatpush.msra.mxu1 %v320_v5 }
  0x92   :  { %v142_v37 = vmul.f32 %v3748_v20, %v115_v35 }
  0x93   :  { %v3766_v39 = vsub.f32 %v104_v6, %v146_v34  ;;  %v3776_v44 = vsub.f32 %v102_v7, %v144_v38  ;;  %v317_v6 = vld [vmem:[%s5565_s3 + $0x10] sm:$0xff]  ;;  %v318_v7 = vld [vmem:[%s5565_s3 + $0x18] sm:$0xff] }
  0x94   :  { %v3770_v41 = vsub.f32 %v100_v8, %v142_v37  ;;  %369 = vmatpush.msra.mxu0 %v317_v6  ;;  %410 = vmatpush.msra.mxu1 %v318_v7  ;;  %v315_v8 = vld [vmem:[%s5565_s3] sm:$0xff]  ;;  %s3656_s3 = smov 64  }
  0x95   :  { %v162_v42 = vmul.f32 %v3766_v39, %v3766_v39  ;;  %v160_v52 = vmul.f32 %v3776_v44, %v3776_v44 }
  0x96   :  { %v158_v46 = vmul.f32 %v3770_v41, %v3770_v41  ;;  %370 = vmatpush.msra.mxu0 %v315_v8  ;;  %411 = vmatpush.msra.mxu1 %v316_v9 }
  0x97   :  { %v180_v47 = vsel %vm109_vm0, %v162_v42, 0.0  ;;  %v174_v55 = vsel %vm109_vm0, %v160_v52, 0.0 }
  0x98   :  { %181 = vadd.xlane.f32.xlu1 %v180_v47  ;;  %v168_v48 = vsel %vm109_vm0, %v158_v46, 0.0  ;;  %v130_v49 = vpop.xlane.xlu1 %129 }
  0x99   :  { %132 = vadd.xlane.f32.xlu0 %v131_v45  ;;  %169 = vadd.xlane.f32.xlu2 %v168_v48  ;;  %v147_v50 = vmul.f32 %v3748_v20, %v130_v49 }
  0x9b   :  { %v3789_v53 = vsub.f32 %v105_v12, %v147_v50 }
  0x9d   :  { %v163_v56 = vmul.f32 %v3789_v53, %v3789_v53 }
  0x9f   :  { %v183_v57 = vsel %vm109_vm0, %v163_v56, 0.0 }
  0xa1   :  { %178 = vadd.xlane.f32.xlu0 %v177_v54  ;;  %175 = vadd.xlane.f32.xlu2 %v174_v55 }
  0xa9   :  { %184 = vadd.xlane.f32.xlu2 %v183_v57  ;;  %v3873_v57 = vld [vmem:[#allocation7] ss:$0 sm:$0xff] }
 0x103   :  { %v173_v10 = vpop.xlane.xlu1 %172 }
 0x104   :  { %v191_v11 = vmul.f32 %v173_v10, %v3748_v20  ;;  %v167_v12 = vpop.xlane.xlu0 %166 }
 0x105   :  { %v189_v13 = vmul.f32 %v167_v12, %v3748_v20 }
 0x106   :  { %v3846_v14 = vadd.f32 1e-05, %v191_v11 }
 0x107   :  { %v197_v15 = vadd.f32 1e-05, %v189_v13 }
 0x108   :  { %3353 = vrsqrt.f32 %v3846_v14  ;;  %vm231_vm7 = vweird.f32 %v3846_v14 }
 0x109   :  { %3355 = vrsqrt.f32 %v197_v15  ;;  %vm211_vm3 = vweird.f32 %v197_v15 }
 0x10b   :  { %v182_v31 = vpop.xlane.xlu1 %181 }
 0x10c   :  { %v170_v16 = vpop.xlane.xlu2 %169  ;;  %v133_v17 = vpop.xlane.xlu0 %132  ;;  %v194_v45 = vmul.f32 %v182_v31, %v3748_v20 }
 0x10d   :  { %v190_v18 = vmul.f32 %v170_v16, %v3748_v20  ;;  %v148_v19 = vmul.f32 %v3748_v20, %v133_v17 }
 0x10e   :  { %v3851_v21 = vpop.eup %3353  ;;  %v3870_v55 = vadd.f32 1e-05, %v194_v45 }
 0x10f   :  { %v3356_v22 = vpop.eup %3355  ;;  %v198_v23 = vadd.f32 1e-05, %v190_v18  ;;  %v3854_v24 = vsub.f32 %v3768_v40, %v148_v19  ;;  %v226_v25 = vmul.f32 %v3851_v21, %v3846_v14  ;;  %vm232_vm8 = vweird.f32 %v3851_v21 }
 0x110   :  { %v206_v28 = vmul.f32 %v3356_v22, %v197_v15  ;;  %vm212_vm2 = vweird.f32 %v3356_v22  ;;  %vm3882_vm10 = vmor %vm231_vm7, %vm232_vm8 }
 0x111   :  { %3357 = vrsqrt.f32 %v198_v23  ;;  %v164_v29 = vmul.f32 %v3854_v24, %v3854_v24  ;;  %v227_v33 = vmul.f32 %v3851_v21, %v226_v25  ;;  %vm213_vm4 = vmor %vm211_vm3, %vm212_vm2  ;;  %vm221_vm5 = vweird.f32 %v198_v23 }
 0x112   :  { %v207_v30 = vmul.f32 %v3356_v22, %v206_v28  ;;  %vm261_vm2 = vweird.f32 %v3870_v55 }
 0x113   :  { %v186_v32 = vsel %vm109_vm0, %v164_v29, 0.0  ;;  %v228_v47 = vmul.f32 0.5, %v227_v33 }
 0x114   :  { %v208_v34 = vmul.f32 0.5, %v207_v30  ;;  %v176_v35 = vpop.xlane.xlu2 %175  ;;  %187 = vadd.xlane.f32.xlu0 %v186_v32  ;;  %v179_v36 = vpop.xlane.xlu0 %178 }
 0x115   :  { %v192_v37 = vmul.f32 %v176_v35, %v3748_v20  ;;  %v193_v38 = vmul.f32 %v179_v36, %v3748_v20  ;;  %v229_v58 = vsub.f32 1.5, %v228_v47 }
 0x116   :  { %v209_v40 = vsub.f32 1.5, %v208_v34 }
 0x117   :  { %v3358_v42 = vpop.eup %3357  ;;  %v200_v46 = vadd.f32 1e-05, %v192_v37  ;;  %v3865_v50 = vadd.f32 1e-05, %v193_v38  ;;  %v230_v2 = vmul.f32 %v3851_v21, %v229_v58 }
 0x118   :  { %v210_v48 = vmul.f32 %v3356_v22, %v209_v40  ;;  %v216_v49 = vmul.f32 %v3358_v42, %v198_v23  ;;  %vm222_vm6 = vweird.f32 %v3358_v42 }
 0x119   :  { %3359 = vrsqrt.f32 %v200_v46  ;;  %vm223_vm9 = vmor %vm221_vm5, %vm222_vm6  ;;  %v234_v11 = vsel %vm3882_vm10, %v3851_v21, %v230_v2  ;;  %vm241_vm11 = vweird.f32 %v200_v46  ;;  %vm251_vm14 = vweird.f32 %v3865_v50 }
 0x11a   :  { %v217_v52 = vmul.f32 %v3358_v42, %v216_v49  ;;  %3361 = vrsqrt.f32 %v3865_v50  ;;  %v214_v54 = vsel %vm213_vm4, %v3356_v22, %v210_v48  ;;  %v287_v18 = vmul.f32 %v234_v11, %v3752_v26 }
 0x11b   :  { %v285_v56 = vmul.f32 %v214_v54, %v3754_v27  ;;  %3363 = vrsqrt.f32 %v3870_v55 }
 0x11c   :  { %v218_v59 = vmul.f32 0.5, %v217_v52  ;;  %v185_v60 = vpop.xlane.xlu2 %184  ;;  %v298_v21 = vmul.f32 %v3867_v51, %v287_v18 }
 0x11d   :  { %v296_v61 = vmul.f32 %v3867_v51, %v285_v56  ;;  %v195_v27 = vmul.f32 %v185_v60, %v3748_v20 }
 0x11e   :  { %v219_v62 = vsub.f32 1.5, %v218_v59  ;;  %v309_v26 = vadd.f32 %v3873_v57, %v298_v21 }
 0x11f   :  { %v3360_v63 = vpop.eup %3359  ;;  %v307_v0 = vadd.f32 %v3873_v57, %v296_v61  ;;  %v203_v9 = vadd.f32 1e-05, %v195_v27 }
 0x120   :  { %v3362_v1 = vpop.eup %3361  ;;  %v220_v3 = vmul.f32 %v3358_v42, %v219_v62  ;;  %v236_v4 = vmul.f32 %v3360_v63, %v200_v46  ;;  %vm242_vm12 = vweird.f32 %v3360_v63 }
 0x121   :  { %v246_v6 = vmul.f32 %v3362_v1, %v3865_v50  ;;  %3113 = vmatmul.msk.f32.vlgmr.msra.gmra.mxu0 %vm109_vm0, %v307_v0  ;;  %3121 = vmatmul.msk.f32.vlgmr.msra.gmra.mxu1 %vm109_vm0, %v307_v0  ;;  %v3364_v14 = vpop.eup %3363  ;;  %3365 = vrsqrt.f32 %v203_v9  ;;  %vm243_vm13 = vmor %vm241_vm11, %vm242_vm12  ;;  %vm252_vm15 = vweird.f32 %v3362_v1  ;;  %vm271_vm5 = vweird.f32 %v203_v9 }
 0x122   :  { %v237_v7 = vmul.f32 %v3360_v63, %v236_v4  ;;  %v224_v8 = vsel %vm223_vm9, %v3358_v42, %v220_v3  ;;  %v256_v19 = vmul.f32 %v3364_v14, %v3870_v55  ;;  %vm253_vm1 = vmor %vm251_vm14, %vm252_vm15  ;;  %vm262_vm3 = vweird.f32 %v3364_v14 }
 0x123   :  { %v286_v10 = vmul.f32 %v224_v8, %v3770_v41  ;;  %v247_v13 = vmul.f32 %v3362_v1, %v246_v6  ;;  %vm263_vm4 = vmor %vm261_vm2, %vm262_vm3  ;;  %vm637_vm11 = vcmask 130048   ;;  %vm1129_vm15 = vcmask 261120  }
 0x124   :  { %v238_v12 = vmul.f32 0.5, %v237_v7  ;;  %v257_v23 = vmul.f32 %v3364_v14, %v256_v19 }
 0x125   :  { %v297_v15 = vmul.f32 %v3867_v51, %v286_v10  ;;  %v248_v22 = vmul.f32 0.5, %v247_v13 }
 0x126   :  { %v239_v16 = vsub.f32 1.5, %v238_v12  ;;  %v258_v31 = vmul.f32 0.5, %v257_v23 }
 0x127   :  { %v308_v17 = vadd.f32 %v3873_v57, %v297_v15  ;;  %v249_v25 = vsub.f32 1.5, %v248_v22  ;;  %v3366_v29 = vpop.eup %3365 }
 0x128   :  { %v240_v41 = vmul.f32 %v3360_v63, %v239_v16  ;;  %v266_v33 = vmul.f32 %v3366_v29, %v203_v9  ;;  %v259_v35 = vsub.f32 1.5, %v258_v31  ;;  %vm272_vm6 = vweird.f32 %v3366_v29 }
 0x129   :  { %3114 = vmatmul.msk.f32.gmra.mxu0 %vm109_vm0, %v308_v17  ;;  %3122 = vmatmul.msk.f32.gmra.mxu1 %vm109_vm0, %v308_v17  ;;  %v250_v32 = vmul.f32 %v3362_v1, %v249_v25  ;;  %vm273_vm7 = vmor %vm271_vm5, %vm272_vm6 }
 0x12a   :  { %v244_v28 = vsel %vm243_vm13, %v3360_v63, %v240_v41  ;;  %v267_v36 = vmul.f32 %v3366_v29, %v266_v33  ;;  %v260_v40 = vmul.f32 %v3364_v14, %v259_v35 }
 0x12b   :  { %v288_v30 = vmul.f32 %v244_v28, %v3776_v44  ;;  %v254_v37 = vsel %vm253_vm1, %v3362_v1, %v250_v32 }
 0x12c   :  { %v289_v44 = vmul.f32 %v254_v37, %v3774_v43  ;;  %v268_v42 = vmul.f32 0.5, %v267_v36  ;;  %v264_v46 = vsel %vm263_vm4, %v3364_v14, %v260_v40 }
 0x12d   :  { %v299_v34 = vmul.f32 %v3867_v51, %v288_v30  ;;  %v290_v49 = vmul.f32 %v264_v46, %v3766_v39 }
 0x12e   :  { %v300_v45 = vmul.f32 %v3867_v51, %v289_v44  ;;  %v269_v47 = vsub.f32 1.5, %v268_v42 }
 0x12f   :  { %v310_v38 = vadd.f32 %v3873_v57, %v299_v34  ;;  %v301_v43 = vmul.f32 %v3867_v51, %v290_v49 }
 0x130   :  { %v311_v48 = vadd.f32 %v3873_v57, %v300_v45  ;;  %v270_v50 = vmul.f32 %v3366_v29, %v269_v47 }
 0x131   :  { %3115 = vmatmul.msk.f32.gmra.mxu0 %vm109_vm0, %v309_v26  ;;  %3123 = vmatmul.msk.f32.gmra.mxu1 %vm109_vm0, %v309_v26  ;;  %v312_v54 = vadd.f32 %v3873_v57, %v301_v43 }
 0x132   :  { %v274_v52 = vsel %vm273_vm7, %v3366_v29, %v270_v50 }
 0x133   :  { %v291_v55 = vmul.f32 %v274_v52, %v3789_v53 }
 0x135   :  { %v302_v56 = vmul.f32 %v3867_v51, %v291_v55 }
 0x137   :  { %v313_v39 = vadd.f32 %v3873_v57, %v302_v56  ;;  %v1086_v56 = vlaneseq }
 0x139   :  { %3116 = vmatmul.msk.f32.gmra.mxu0 %vm109_vm0, %v310_v38  ;;  %3124 = vmatmul.msk.f32.gmra.mxu1 %vm109_vm0, %v310_v38 }
 0x141   :  { %3117 = vmatmul.msk.f32.gmra.mxu0 %vm109_vm0, %v311_v48  ;;  %3125 = vmatmul.msk.f32.gmra.mxu1 %vm109_vm0, %v311_v48 }
 0x149   :  { %3118 = vmatmul.msk.f32.gmra.mxu0 %vm109_vm0, %v312_v54  ;;  %3126 = vmatmul.msk.f32.gmra.mxu1 %vm109_vm0, %v312_v54 }
 0x151   :  { %3119 = vmatmul.msk.f32.gmra.mxu0 %vm109_vm0, %v313_v39  ;;  %3127 = vmatmul.msk.f32.gmra.mxu1 %vm109_vm0, %v313_v39 }
 0x187   :  { %v188_v58 = vpop.xlane.xlu0 %187 }
 0x188   :  { %v196_v59 = vmul.f32 %v188_v58, %v3748_v20  ;;  %v4102_v58 = vshrl.u32 %v1086_v56, 7 }
 0x18a   :  { %v204_v60 = vadd.f32 1e-05, %v196_v59 }
 0x18c   :  { %3367 = vrsqrt.f32 %v204_v60  ;;  %vm281_vm9 = vweird.f32 %v204_v60 }
 0x192   :  { %v3368_v61 = vpop.eup %3367 }
 0x193   :  { %v276_v62 = vmul.f32 %v3368_v61, %v204_v60  ;;  %vm282_vm8 = vweird.f32 %v3368_v61 }
 0x194   :  { %vm283_vm10 = vmor %vm281_vm9, %vm282_vm8 }
 0x195   :  { %v277_v53 = vmul.f32 %v3368_v61, %v276_v62  ;;  %v4107_v62 = vand.u32 127, %v1086_v56 }
 0x197   :  { %v278_v63 = vmul.f32 0.5, %v277_v53  ;;  %v1089_v53 = vadd.s32 16, %v4102_v58  ;;  %vm4206_vm14 = vcmp.le.s32.totalorder %v4107_v62, %v4102_v58 }
 0x199   :  { %v279_v27 = vsub.f32 1.5, %v278_v63  ;;  %vm4115_vm12 = vcmp.le.s32.totalorder %v4107_v62, %v1089_v53 }
 0x19b   :  { %v280_v0 = vmul.f32 %v3368_v61, %v279_v27 }
 0x19d   :  { %v284_v1 = vsel %vm283_vm10, %v3368_v61, %v280_v0 }
 0x19e   :  { %v3926_v2 = vpop.f32.mrf.mxu0  ;;  %v292_v3 = vmul.f32 %v284_v1, %v3854_v24  ;;  %v4072_v44 = vpop.f32.mrf.mxu1 }
 0x19f   :  { %629 = vrot.lane.b32.xlu1 %v3926_v2, %s3656_s3  ;;  %445 = vrot.lane.b32.xlu0 %v3926_v2, %s3657_s16  ;;  %v517_v25 = vmul.f32 0.125, %v3926_v2 }
 0x1a0   :  { %v303_v4 = vmul.f32 %v3867_v51, %v292_v3  ;;  %v1090_v3 = vadd.s32 24, %v4102_v58 }
 0x1a2   :  { %v314_v5 = vadd.f32 %v3873_v57, %v303_v4  ;;  %vm4133_vm13 = vcmp.le.s32.totalorder %v4107_v62, %v1090_v3 }
 0x1a4   :  { %3120 = vmatmul.msk.f32.gmra.mxu0 %vm109_vm0, %v314_v5  ;;  %3128 = vmatmul.msk.f32.gmra.mxu1 %vm109_vm0, %v314_v5 }
 0x1a6   :  { %v375_v6 = vpop.f32.mrf.mxu0  ;;  %v4082_v46 = vpop.f32.mrf.mxu1 }
 0x1a7   :  { %493 = vrot.lane.b32.xlu1 %v3926_v2, %s3658_s17  ;;  %447 = vrot.lane.b32.xlu2 %v375_v6, %s3657_s16  ;;  %v518_v26 = vmul.f32 0.125, %v375_v6 }
 0x1ae   :  { %v3940_v24 = vpop.f32.mrf.mxu0  ;;  %v4092_v50 = vpop.f32.mrf.mxu1 }
 0x1af   :  { %631 = vrot.lane.b32.xlu2 %v375_v6, %s3656_s3  ;;  %633 = vrot.lane.b32.xlu1 %v3940_v24, %s3656_s3  ;;  %v519_v31 = vmul.f32 0.125, %v3940_v24 }
 0x1b0   :  { %497 = vrot.lane.b32.xlu0 %v3940_v24, %s3658_s17 }
 0x1b6   :  { %v3947_v51 = vpop.f32.mrf.mxu0  ;;  %v4100_v39 = vpop.f32.mrf.mxu1 }
 0x1b7   :  { %495 = vrot.lane.b32.xlu2 %v375_v6, %s3658_s17  ;;  %473 = vrot.lane.b32.xlu1 %v3940_v24, %s3659_s18  ;;  %v520_v32 = vmul.f32 0.125, %v3947_v51 }
 0x1b8   :  { %635 = vrot.lane.b32.xlu0 %v3947_v51, %s3656_s3 }
 0x1be   :  { %v3954_v57 = vpop.f32.mrf.mxu0  ;;  %v4122_v1 = vpop.f32.mrf.mxu1 }
 0x1bf   :  { %449 = vrot.lane.b32.xlu2 %v3940_v24, %s3657_s16  ;;  %451 = vrot.lane.b32.xlu1 %v3947_v51, %s3657_s16  ;;  %v521_v38 = vmul.f32 0.125, %v3954_v57 }
 0x1c0   :  { %687 = vrot.lane.b32.xlu0 %v3954_v57, %s3656_s3 }
 0x1c6   :  { %v3962_v7 = vpop.f32.mrf.mxu0 }
 0x1c7   :  { %499 = vrot.lane.b32.xlu2 %v3947_v51, %s3658_s17  ;;  %475 = vrot.lane.b32.xlu1 %v3947_v51, %s3659_s18  ;;  %v522_v40 = vmul.f32 0.125, %v3962_v7  ;;  %v4145_v51 = vpop.f32.mrf.mxu1 }
 0x1c8   :  { %455 = vrot.lane.b32.xlu0 %v3962_v7, %s3657_s16 }
 0x1ce   :  { %v3970_v8 = vpop.f32.mrf.mxu0 }
 0x1cf   :  { %453 = vrot.lane.b32.xlu2 %v3954_v57, %s3657_s16  ;;  %457 = vrot.lane.b32.xlu1 %v3970_v8, %s3657_s16  ;;  %v523_v47 = vmul.f32 0.125, %v3970_v8 }
 0x1d0   :  { %689 = vrot.lane.b32.xlu0 %v3962_v7, %s3656_s3 }
 0x1d7   :  { %469 = vrot.lane.b32.xlu2 %v3926_v2, %s3659_s18  ;;  %691 = vrot.lane.b32.xlu1 %v3970_v8, %s3656_s3 }
 0x201   :  { %v3982_v10 = vpop.permute.xlu2 %447 }
 0x202   :  { %v526_v5 = vmul.f32 0.125, %v3982_v10 }
 0x209   :  { %v632_v13 = vpop.permute.xlu2 %631 }
 0x211   :  { %v630_v9 = vpop.permute.xlu1 %629  ;;  %v3986_v12 = vpop.permute.xlu0 %445 }
 0x212   :  { %v3998_v17 = vpop.permute.xlu2 %495  ;;  %v525_v27 = vmul.f32 0.125, %v3986_v12 }
 0x219   :  { %v3984_v11 = vpop.permute.xlu1 %493 }
 0x21a   :  { %v4011_v22 = vpop.permute.xlu2 %449 }
 0x221   :  { %v634_v14 = vpop.permute.xlu1 %633  ;;  %v3988_v15 = vpop.f32.mrf.mxu0 }
 0x222   :  { %v3990_v16 = vpop.permute.xlu0 %497  ;;  %507 = vrot.lane.b32.xlu1 %v3988_v15, %s3658_s17  ;;  %693 = vrot.lane.b32.xlu2 %v3988_v15, %s3656_s3  ;;  %v4035_v30 = vpop.permute.xlu2 %499  ;;  %v524_v52 = vmul.f32 0.125, %v3988_v15 }
 0x223   :  { %459 = vrot.lane.b32.xlu0 %v3988_v15, %s3657_s16 }
 0x229   :  { %v4000_v18 = vpop.permute.xlu1 %473 }
 0x22a   :  { %v636_v19 = vpop.permute.xlu0 %635  ;;  %744 = vrot.lane.b32.xlu2 %v3986_v12, %s3656_s3  ;;  %976 = vrot.lane.b32.xlu1 %v3990_v16, %s3656_s3  ;;  %v4058_v33 = vpop.permute.xlu2 %453  ;;  %v4162_v12 = vpack.i.bf16 %v4092_v50, %v4100_v39  ;;  %v535_v3 = vmul.f32 0.125, %v4000_v18 }
 0x22b   :  { %471 = vrot.lane.b32.xlu0 %v375_v6, %s3659_s18  ;;  %3129 = vmatpush.xpose.msk.msra.mxu2 %vm637_vm11, %v636_v19  ;;  %v3290_v19 = vpack.i.bf16 %v4072_v44, %v4082_v46 }
 0x22f   :  { %3130 = vmatpush.xpose.msk.msra.mxu2 %vm637_vm11, %v634_v14 }
 0x231   :  { %v4009_v41 = vpop.permute.xlu1 %451 }
 0x232   :  { %v688_v21 = vpop.permute.xlu0 %687  ;;  %746 = vrot.lane.b32.xlu2 %v3982_v10, %s3656_s3  ;;  %750 = vrot.lane.b32.xlu1 %v4009_v41, %s3656_s3  ;;  %v4062_v34 = vpop.permute.xlu2 %469  ;;  %v528_v10 = vmul.f32 0.125, %v4009_v41 }
 0x233   :  { %748 = vrot.lane.b32.xlu0 %v4011_v22, %s3656_s3  ;;  %3131 = vmatpush.xpose.msk.msra.mxu2 %vm637_vm11, %v632_v13 }
 0x237   :  { %3132 = vmatpush.xpose.msk.msra.mxu2 %vm637_vm11, %v630_v9  ;;  %v4156_v9 = vpop.f32.mrf.mxu1 }
 0x239   :  { %v4021_v23 = vpop.permute.xlu1 %475 }
 0x23a   :  { %3133 = vmatmul.msk.f32.vlgmr.msra.gmra.mxu2 %vm637_vm11, %v517_v25  ;;  %v4025_v28 = vpop.permute.xlu0 %455  ;;  %974 = vrot.lane.b32.xlu1 %v3998_v17, %s3656_s3  ;;  %v543_v25 = vmul.f32 0.125, %v3990_v16  ;;  %v529_v16 = vmul.f32 0.125, %v4058_v33 }
 0x23b   :  { %505 = vrot.lane.b32.xlu0 %v3970_v8, %s3658_s17  ;;  %803 = vrot.lane.b32.xlu2 %v4025_v28, %s3656_s3 }
 0x23f   :  { %v4170_v14 = vpop.f32.mrf.mxu1 }
 0x240   :  { %v4178_v41 = vpack.i.bf16 %v4156_v9, %v4170_v14 }
 0x241   :  { %v4033_v29 = vpop.permute.xlu1 %457 }
 0x242   :  { %3134 = vmatmul.msk.f32.gmra.mxu2 %vm637_vm11, %v518_v26  ;;  %978 = vrot.lane.b32.xlu1 %v4035_v30, %s3656_s3  ;;  %v690_v37 = vpop.permute.xlu0 %689  ;;  %v544_v26 = vmul.f32 0.125, %v4035_v30 }
 0x243   :  { %503 = vrot.lane.b32.xlu0 %v3962_v7, %s3658_s17  ;;  %805 = vrot.lane.b32.xlu2 %v4033_v29, %s3656_s3 }
 0x249   :  { %v692_v36 = vpop.permute.xlu1 %691 }
 0x24a   :  { %3135 = vmatmul.msk.f32.gmra.mxu2 %vm637_vm11, %v519_v31  ;;  %972 = vrot.lane.b32.xlu1 %v3984_v11, %s3656_s3 }
 0x24b   :  { %501 = vrot.lane.b32.xlu0 %v3954_v57, %s3658_s17 }
 0x252   :  { %3136 = vmatmul.msk.f32.gmra.mxu2 %vm637_vm11, %v520_v32  ;;  %479 = vrot.lane.b32.xlu1 %v3962_v7, %s3659_s18 }
 0x253   :  { %483 = vrot.lane.b32.xlu0 %v3988_v15, %s3659_s18  ;;  %v541_v15 = vmul.f32 0.125, %v3984_v11  ;;  %v4187_v11 = vpack.i.bf16 %v4122_v1, %v4145_v51 }
 0x25b   :  { %481 = vrot.lane.b32.xlu0 %v3970_v8, %s3659_s18 }
 0x263   :  { %862 = vrot.lane.b32.xlu0 %v4000_v18, %s3656_s3 }
 0x26b   :  { %858 = vrot.lane.b32.xlu0 %v4062_v34, %s3656_s3 }
 0x27c   :  { %v694_v35 = vpop.permute.xlu2 %693 }
 0x27d   :  { %3137 = vmatpush.xpose.msk.msra.mxu3 %vm637_vm11, %v694_v35 }
 0x281   :  { %3138 = vmatpush.xpose.msk.msra.mxu3 %vm637_vm11, %v692_v36 }
 0x284   :  { %v745_v43 = vpop.permute.xlu2 %744 }
 0x285   :  { %3139 = vmatpush.xpose.msk.msra.mxu3 %vm637_vm11, %v690_v37 }
 0x289   :  { %3140 = vmatpush.xpose.msk.msra.mxu3 %vm637_vm11, %v688_v21 }
 0x28c   :  { %3141 = vmatmul.msk.f32.vlgmr.msra.gmra.mxu3 %vm637_vm11, %v521_v38  ;;  %v747_v59 = vpop.permute.xlu2 %746 }
 0x294   :  { %v4075_v42 = vpop.permute.xlu1 %507  ;;  %3142 = vmatmul.msk.f32.gmra.mxu3 %vm637_vm11, %v522_v40 }
 0x295   :  { %v4078_v45 = vpop.permute.xlu0 %459  ;;  %v804_v21 = vpop.permute.xlu2 %803 }
 0x296   :  { %807 = vrot.lane.b32.xlu2 %v4078_v45, %s3656_s3 }
 0x29c   :  { %v977_v48 = vpop.permute.xlu1 %976  ;;  %3143 = vmatmul.msk.f32.gmra.mxu3 %vm637_vm11, %v523_v47 }
 0x29d   :  { %v4086_v49 = vpop.permute.xlu0 %471 }
 0x29e   :  { %801 = vrot.lane.b32.xlu2 %v4058_v33, %s3656_s3  ;;  %860 = vrot.lane.b32.xlu1 %v4086_v49, %s3656_s3  ;;  %v530_v33 = vmul.f32 0.125, %v4025_v28 }
 0x2a4   :  { %v751_v54 = vpop.permute.xlu1 %750  ;;  %3144 = vmatmul.msk.f32.gmra.mxu3 %vm637_vm11, %v524_v52 }
 0x2a5   :  { %v749_v55 = vpop.permute.xlu0 %748  ;;  %3145 = vmatpush.xpose.msk.msrb.mxu2 %vm637_vm11, %v751_v54 }
 0x2a6   :  { %864 = vrot.lane.b32.xlu2 %v4021_v23, %s3656_s3 }
 0x2a9   :  { %3146 = vmatpush.xpose.msk.msrb.mxu2 %vm637_vm11, %v749_v55 }
 0x2ac   :  { %v975_v60 = vpop.permute.xlu1 %974 }
 0x2ad   :  { %v4104_v61 = vpop.permute.xlu0 %505  ;;  %3147 = vmatpush.xpose.msk.msrb.mxu2 %vm637_vm11, %v747_v59  ;;  %v532_v59 = vmul.f32 0.125, %v4078_v45  ;;  %v534_v45 = vmul.f32 0.125, %v4086_v49  ;;  %v536_v49 = vmul.f32 0.125, %v4021_v23 }
 0x2ae   :  { %477 = vrot.lane.b32.xlu2 %v3954_v57, %s3659_s18  ;;  %1033 = vrot.lane.b32.xlu1 %v4104_v61, %s3656_s3  ;;  %v527_v57 = vmul.f32 0.125, %v4011_v22  ;;  %v542_v22 = vmul.f32 0.125, %v3998_v17  ;;  %v806_v17 = vpop.permute.xlu2 %805  ;;  %v547_v23 = vmul.f32 0.125, %v4104_v61 }
 0x2b1   :  { %3148 = vmatpush.xpose.msk.msrb.mxu2 %vm637_vm11, %v745_v43 }
 0x2b4   :  { %v979_v0 = vpop.permute.xlu1 %978  ;;  %3149 = vmatmul.msk.f32.vlgmr.msrb.gmra.mxu2 %vm637_vm11, %v525_v27 }
 0x2b5   :  { %v4124_v2 = vpop.permute.xlu0 %503  ;;  %3177 = vmatpush.xpose.msk.msra.mxu2 %vm637_vm11, %v979_v0 }
 0x2b6   :  { %1035 = vrot.lane.b32.xlu2 %v4075_v42, %s3656_s3  ;;  %1031 = vrot.lane.b32.xlu0 %v4124_v2, %s3656_s3 }
 0x2b9   :  { %3178 = vmatpush.xpose.msk.msra.mxu2 %vm637_vm11, %v977_v48  ;;  %v531_v48 = vmul.f32 0.125, %v4033_v29  ;;  %v1088_v29 = vadd.s32 8, %v4102_v58 }
 0x2bb   :  { %vm4241_vm1 = vcmp.le.s32.totalorder %v4107_v62, %v1088_v29 }
 0x2bc   :  { %v973_v6 = vpop.permute.xlu1 %972  ;;  %3150 = vmatmul.msk.f32.gmra.mxu2 %vm637_vm11, %v526_v5 }
 0x2bd   :  { %v4140_v24 = vpop.permute.xlu0 %501  ;;  %3179 = vmatpush.xpose.msk.msra.mxu2 %vm637_vm11, %v975_v60  ;;  %v675_v35 = vpop.f32.mrf.mxu2  ;;  %v533_v60 = vmul.f32 0.125, %v4062_v34 }
 0x2be   :  { %1029 = vrot.lane.b32.xlu2 %v4140_v24, %s3656_s3  ;;  %v4213_v37 = vsel %vm4206_vm14, %v675_v35, -1e+30 }
 0x2bf   :  { %v1130_v40 = vsel %vm1129_vm15, %v4213_v37, -inf }
 0x2c1   :  { %3180 = vmatpush.xpose.msk.msra.mxu2 %vm637_vm11, %v973_v6 }
 0x2c4   :  { %v4149_v7 = vpop.permute.xlu1 %479  ;;  %3151 = vmatmul.msk.f32.gmra.mxu2 %vm637_vm11, %v527_v57 }
 0x2c5   :  { %v4152_v8 = vpop.permute.xlu0 %483 }
 0x2c6   :  { %917 = vrot.lane.b32.xlu2 %v4149_v7, %s3656_s3 }
 0x2cc   :  { %3152 = vmatmul.msk.f32.gmra.mxu2 %vm637_vm11, %v528_v10 }
 0x2cd   :  { %v4164_v13 = vpop.permute.xlu0 %481 }
 0x2ce   :  { %3286 = vrot.lane.b32.xlu2 %v4162_v12, %s3657_s16  ;;  %919 = vrot.lane.b32.xlu0 %v4164_v13, %s3656_s3 }
 0x2d4   :  { %3181 = vmatmul.msk.f32.vlgmr.msra.gmra.mxu2 %vm637_vm11, %v541_v15 }
 0x2d5   :  { %v863_v38 = vpop.permute.xlu0 %862 }
 0x2d6   :  { %3291 = vrot.lane.b32.xlu2 %v3290_v19, %s3657_s16  ;;  %3296 = vrot.lane.b32.xlu0 %v4178_v41, %s3657_s16 }
 0x2dc   :  { %3182 = vmatmul.msk.f32.gmra.mxu2 %vm637_vm11, %v542_v22 }
 0x2dd   :  { %v859_v56 = vpop.permute.xlu0 %858 }
 0x2de   :  { %3301 = vrot.lane.b32.xlu2 %v4162_v12, %s3658_s17  ;;  %3306 = vrot.lane.b32.xlu0 %v4187_v11, %s3657_s16 }
 0x2e4   :  { %3183 = vmatmul.msk.f32.gmra.mxu2 %vm637_vm11, %v543_v25  ;;  %v548_v25 = vmul.f32 0.125, %v4075_v42 }
 0x2e6   :  { %3321 = vrot.lane.b32.xlu0 %v3290_v19, %s3659_s18 }
 0x2ec   :  { %3184 = vmatmul.msk.f32.gmra.mxu2 %vm637_vm11, %v544_v26 }
 0x2f0   :  { %v808_v31 = vpop.permute.xlu2 %807 }
 0x2f1   :  { %3153 = vmatpush.xpose.msk.msrb.mxu3 %vm637_vm11, %v808_v31 }
 0x2f5   :  { %3154 = vmatpush.xpose.msk.msrb.mxu3 %vm637_vm11, %v806_v17 }
 0x2f8   :  { %v802_v32 = vpop.permute.xlu2 %801 }
 0x2f9   :  { %3155 = vmatpush.xpose.msk.msrb.mxu3 %vm637_vm11, %v804_v21  ;;  %v678_v21 = vpop.f32.mrf.mxu2 }
 0x2fd   :  { %3156 = vmatpush.xpose.msk.msrb.mxu3 %vm637_vm11, %v802_v32 }
 0x300   :  { %3157 = vmatmul.msk.f32.vlgmr.msrb.gmra.mxu3 %vm637_vm11, %v529_v16  ;;  %v865_v36 = vpop.permute.xlu2 %864 }
 0x301   :  { %3161 = vmatpush.xpose.msk.msrb.mxu0 %vm637_vm11, %v865_v36  ;;  %v681_v31 = vpop.f32.mrf.mxu2 }
 0x302   :  { %v4289_v42 = vsel %vm4115_vm12, %v681_v31, -1e+30 }
 0x305   :  { %3162 = vmatpush.xpose.msk.msrb.mxu0 %vm637_vm11, %v863_v38  ;;  %v1136_v38 = vsel %vm1129_vm15, %v4289_v42, -inf }
 0x307   :  { %1131 = vmax.xlane.f32.xlu2 %v1130_v40 }
 0x308   :  { %3158 = vmatmul.msk.f32.gmra.mxu3 %vm637_vm11, %v530_v33  ;;  %v4220_v47 = vpop.permute.xlu2 %477 }
 0x309   :  { %915 = vrot.lane.b32.xlu1 %v4220_v47, %s3656_s3  ;;  %v684_v33 = vpop.f32.mrf.mxu2 }
 0x30a   :  { %v4295_v40 = vsel %vm4133_vm13, %v684_v33, -1e+30 }
 0x30f   :  { %v732_v43 = vpop.f32.mrf.mxu3 }
 0x310   :  { %3159 = vmatmul.msk.f32.gmra.mxu3 %vm637_vm11, %v531_v48  ;;  %v1036_v52 = vpop.permute.xlu2 %1035  ;;  %v861_v54 = vpop.permute.xlu1 %860  ;;  %v4228_v28 = vsel %vm4206_vm14, %v732_v43, -1e+30  ;;  %v1139_v43 = vsel %vm1129_vm15, %v4295_v40, -inf }
 0x311   :  { %3185 = vmatpush.xpose.msk.msra.mxu3 %vm637_vm11, %v1036_v52  ;;  %3311 = vrot.lane.b32.xlu1 %v3290_v19, %s3658_s17  ;;  %v1142_v55 = vsel %vm1129_vm15, %v4228_v28, -inf }
 0x312   :  { %3163 = vmatpush.xpose.msk.msrb.mxu0 %vm637_vm11, %v861_v54  ;;  %1143 = vmax.xlane.f32.xlu2 %v1142_v55 }
 0x316   :  { %3164 = vmatpush.xpose.msk.msrb.mxu0 %vm637_vm11, %v859_v56 }
 0x317   :  { %v735_v53 = vpop.f32.mrf.mxu3 }
 0x318   :  { %3160 = vmatmul.msk.f32.gmra.mxu3 %vm637_vm11, %v532_v59  ;;  %v1030_v0 = vpop.permute.xlu2 %1029  ;;  %v4248_v58 = vsel %vm4241_vm1, %v735_v53, -1e+30 }
 0x319   :  { %3165 = vmatmul.msk.f32.vlgmr.msrb.gmra.mxu0 %vm637_vm11, %v533_v60  ;;  %3316 = vrot.lane.b32.xlu1 %v4162_v12, %s3659_s18  ;;  %v1145_v34 = vsel %vm1129_vm15, %v4248_v58, -inf  ;;  %v546_v12 = vmul.f32 0.125, %v4124_v2  ;;  %v4283_v2 = vsel %vm4241_vm1, %v678_v21, -1e+30 }
 0x31a   :  { %1442 = vmatpush.msra.mxu0 %v4100_v39  ;;  %1146 = vmax.xlane.f32.xlu0 %v1145_v34  ;;  %v1133_v61 = vsel %vm1129_vm15, %v4283_v2, -inf }
 0x31c   :  { %1443 = vmatpush.msra.mxu0 %v4092_v50 }
 0x31e   :  { %1444 = vmatpush.msra.mxu0 %v4082_v46  ;;  %v545_v46 = vmul.f32 0.125, %v4140_v24 }
 0x31f   :  { %v738_v48 = vpop.f32.mrf.mxu3 }
 0x320   :  { %1445 = vmatpush.msra.mxu0 %v4072_v44  ;;  %v1034_v39 = vpop.permute.xlu1 %1033  ;;  %v4259_v62 = vpop.permute.xlu2 %917  ;;  %v4301_v52 = vsel %vm4115_vm12, %v738_v48, -1e+30 }
 0x321   :  { %3166 = vmatmul.msk.f32.gmra.mxu0 %vm637_vm11, %v534_v45  ;;  %3186 = vmatpush.xpose.msk.msra.mxu3 %vm637_vm11, %v1034_v39  ;;  %v1148_v55 = vsel %vm1129_vm15, %v4301_v52, -inf }
 0x322   :  { %921 = vrot.lane.b32.xlu1 %v4152_v8, %s3656_s3 }
 0x327   :  { %v741_v29 = vpop.f32.mrf.mxu3 }
 0x328   :  { %v3287_v50 = vpop.permute.xlu2 %3286  ;;  %v1032_v5 = vpop.permute.xlu0 %1031  ;;  %v4307_v56 = vsel %vm4133_vm13, %v741_v29, -1e+30 }
 0x329   :  { %v3288_v6 = vunpack.i.l.bf16 %v3287_v50  ;;  %3167 = vmatmul.msk.f32.gmra.mxu0 %vm637_vm11, %v535_v3  ;;  %3187 = vmatpush.xpose.msk.msra.mxu3 %vm637_vm11, %v1032_v5  ;;  %v3289_v44 = vunpack.i.h.bf16 %v3287_v50  ;;  %v1151_v59 = vsel %vm1129_vm15, %v4307_v56, -inf }
 0x32b   :  { %1524 = vmatpush.msrb.mxu2 %v3288_v6 }
 0x32d   :  { %3188 = vmatpush.xpose.msk.msra.mxu3 %vm637_vm11, %v1030_v0  ;;  %1525 = vmatpush.msrb.mxu2 %v3289_v44 }
 0x330   :  { %v3292_v57 = vpop.permute.xlu2 %3291  ;;  %3189 = vmatmul.msk.f32.vlgmr.msra.gmra.mxu3 %vm637_vm11, %v545_v46 }
 0x331   :  { %v3293_v18 = vunpack.i.l.bf16 %v3292_v57  ;;  %3168 = vmatmul.msk.f32.gmra.mxu0 %vm637_vm11, %v536_v49  ;;  %v3294_v10 = vunpack.i.h.bf16 %v3292_v57 }
 0x333   :  { %1526 = vmatpush.msrb.mxu2 %v3293_v18 }
 0x335   :  { %1527 = vmatpush.msrb.mxu2 %v3294_v10 }
 0x337   :  { %v789_v54 = vpop.f32.mrf.mxu2 }
 0x338   :  { %v3302_v15 = vpop.permute.xlu2 %3301  ;;  %3190 = vmatmul.msk.f32.gmra.mxu3 %vm637_vm11, %v546_v12 }
 0x339   :  { %v3303_v19 = vunpack.i.l.bf16 %v3302_v15  ;;  %v3304_v22 = vunpack.i.h.bf16 %v3302_v15 }
 0x33b   :  { %1688 = vmatpush.msra.mxu2 %v3303_v19 }
 0x33d   :  { %1689 = vmatpush.msra.mxu2 %v3304_v22 }
 0x33f   :  { %v792_v60 = vpop.f32.mrf.mxu2 }
 0x340   :  { %3191 = vmatmul.msk.f32.gmra.mxu3 %vm637_vm11, %v547_v23  ;;  %v4277_v24 = vpop.permute.xlu0 %919  ;;  %v4313_v53 = vsel %vm4241_vm1, %v792_v60, -1e+30  ;;  %v4337_v23 = vsel %vm4206_vm14, %v789_v54, -1e+30 }
 0x341   :  { %v1157_v0 = vsel %vm1129_vm15, %v4313_v53, -inf }
 0x348   :  { %3192 = vmatmul.msk.f32.gmra.mxu3 %vm637_vm11, %v548_v25  ;;  %v3297_v17 = vpop.permute.xlu0 %3296 }
 0x349   :  { %v3298_v26 = vunpack.i.l.bf16 %v3297_v17  ;;  %v3299_v32 = vunpack.i.h.bf16 %v3297_v17  ;;  %v1154_v17 = vsel %vm1129_vm15, %v4337_v23, -inf }
 0x34b   :  { %1565 = vmatpush.msrb.mxu3 %v3298_v26 }
 0x34c   :  { %1134 = vmax.xlane.f32.xlu1 %v1133_v61 }
 0x34d   :  { %1566 = vmatpush.msrb.mxu3 %v3299_v32  ;;  %v795_v32 = vpop.f32.mrf.mxu2 }
 0x350   :  { %v3307_v16 = vpop.permute.xlu0 %3306 }
 0x351   :  { %v3308_v35 = vunpack.i.l.bf16 %v3307_v16  ;;  %v3309_v36 = vunpack.i.h.bf16 %v3307_v16 }
 0x353   :  { %1567 = vmatpush.msrb.mxu3 %v3308_v35 }
 0x354   :  { %1137 = vmax.xlane.f32.xlu1 %v1136_v38 }
 0x355   :  { %1568 = vmatpush.msrb.mxu3 %v3309_v36  ;;  %v798_v16 = vpop.f32.mrf.mxu2 }
 0x358   :  { %v3322_v57 = vpop.permute.xlu0 %3321 }
 0x359   :  { %v3323_v18 = vunpack.i.l.bf16 %v3322_v57  ;;  %v3324_v10 = vunpack.i.h.bf16 %v3322_v57 }
 0x35c   :  { %1140 = vmax.xlane.f32.xlu1 %v1139_v43 }
 0x364   :  { %1149 = vmax.xlane.f32.xlu1 %v1148_v55 }
 0x36c   :  { %1152 = vmax.xlane.f32.xlu1 %v1151_v59 }
 0x374   :  { %1158 = vmax.xlane.f32.xlu1 %v1157_v0 }
 0x37a   :  { %v1132_v34 = vpop.xlane.xlu2 %1131 }
 0x37b   :  { %v1226_v45 = vsub.f32 %v4213_v37, %v1132_v34  ;;  %v916_v39 = vpop.permute.xlu1 %915 }
 0x37d   :  { %v1258_v3 = vmul.f32 1.442695, %v1226_v45 }
 0x37f   :  { %3369 = vpow2.f32 %v1258_v3 }
 0x383   :  { %v3312_v50 = vpop.permute.xlu1 %3311  ;;  %v846_v38 = vpop.f32.mrf.mxu3 }
 0x384   :  { %v3313_v5 = vunpack.i.l.bf16 %v3312_v50  ;;  %v3314_v44 = vunpack.i.h.bf16 %v3312_v50  ;;  %v4383_v43 = vsel %vm4206_vm14, %v846_v38, -1e+30 }
 0x385   :  { %v4318_v6 = vpop.eup %3369  ;;  %v1144_v35 = vpop.xlane.xlu2 %1143  ;;  %v1166_v29 = vsel %vm1129_vm15, %v4383_v43, -inf }
 0x386   :  { %3193 = vmatmul.msk.f32.vlgmr.msra.gmra.mxu0 %vm1129_vm15, %v4318_v6  ;;  %1690 = vmatpush.msra.mxu2 %v3313_v5 }
 0x388   :  { %1691 = vmatpush.msra.mxu2 %v3314_v44 }
 0x38b   :  { %v3317_v46 = vpop.permute.xlu1 %3316 }
 0x38c   :  { %v3318_v49 = vunpack.i.l.bf16 %v3317_v46  ;;  %v3319_v37 = vunpack.i.h.bf16 %v3317_v46 }
 0x38d   :  { %3326 = vrot.lane.b32.xlu1 %v4178_v41, %s3658_s17  ;;  %v1147_v48 = vpop.xlane.xlu0 %1146 }
 0x38e   :  { %1606 = vmatpush.msrb.mxu0 %v3318_v49 }
 0x390   :  { %1607 = vmatpush.msrb.mxu0 %v3319_v37 }
 0x392   :  { %1608 = vmatpush.msrb.mxu0 %v3323_v18  ;;  %v4418_v18 = vpop.f32.mrf.mxu3 }
 0x393   :  { %v4515_v30 = vsel %vm4241_vm1, %v4418_v18, -1e+30 }
 0x394   :  { %v922_v12 = vpop.permute.xlu1 %921  ;;  %1609 = vmatpush.msrb.mxu0 %v3324_v10 }
 0x395   :  { %3169 = vmatpush.xpose.msk.msrb.mxu1 %vm637_vm11, %v922_v12 }
 0x396   :  { %v903_v15 = vpop.f32.mrf.mxu0 }
 0x397   :  { %v4327_v19 = vsel %vm4206_vm14, %v903_v15, -1e+30 }
 0x398   :  { %v1178_v22 = vsel %vm1129_vm15, %v4327_v19, -inf }
 0x399   :  { %1179 = vmax.xlane.f32.xlu0 %v1178_v22  ;;  %3170 = vmatpush.xpose.msk.msrb.mxu1 %vm637_vm11, %v4277_v24 }
 0x39d   :  { %3171 = vmatpush.xpose.msk.msrb.mxu1 %vm637_vm11, %v4259_v62  ;;  %v537_v62 = vmul.f32 0.125, %v4220_v47 }
 0x39e   :  { %v906_v21 = vpop.f32.mrf.mxu0 }
 0x39f   :  { %v4341_v25 = vsel %vm4241_vm1, %v906_v21, -1e+30 }
 0x3a0   :  { %v1181_v26 = vsel %vm1129_vm15, %v4341_v25, -inf }
 0x3a1   :  { %1155 = vmax.xlane.f32.xlu0 %v1154_v17  ;;  %1182 = vmax.xlane.f32.xlu2 %v1181_v26  ;;  %v4433_v17 = vpop.f32.mrf.mxu3 }
 0x3a2   :  { %3172 = vmatpush.xpose.msk.msrb.mxu1 %vm637_vm11, %v916_v39 }
 0x3a5   :  { %3173 = vmatmul.msk.f32.vlgmr.msrb.gmra.mxu1 %vm637_vm11, %v537_v62 }
 0x3a6   :  { %1483 = vmatpush.msra.mxu1 %v4170_v14  ;;  %v909_v24 = vpop.f32.mrf.mxu0  ;;  %v538_v14 = vmul.f32 0.125, %v4149_v7  ;;  %v1230_v7 = vsub.f32 %v4228_v28, %v1144_v35  ;;  %v1231_v28 = vsub.f32 %v4248_v58, %v1147_v48 }
 0x3a7   :  { %v4354_v31 = vsel %vm4115_vm12, %v909_v24, -1e+30 }
 0x3a8   :  { %1484 = vmatpush.msra.mxu1 %v4156_v9  ;;  %v1184_v61 = vsel %vm1129_vm15, %v4354_v31, -inf  ;;  %v4364_v9 = vsel %vm4115_vm12, %v795_v32, -1e+30  ;;  %v1266_v33 = vmul.f32 1.442695, %v1230_v7 }
 0x3a9   :  { %1185 = vmax.xlane.f32.xlu0 %v1184_v61  ;;  %v1160_v47 = vsel %vm1129_vm15, %v4364_v9, -inf  ;;  %v1268_v59 = vmul.f32 1.442695, %v1231_v28  ;;  %v855_v61 = vpop.f32.mrf.mxu3 }
 0x3aa   :  { %1485 = vmatpush.msra.mxu1 %v4145_v51  ;;  %v539_v51 = vmul.f32 0.125, %v4164_v13  ;;  %v540_v13 = vmul.f32 0.125, %v4152_v8  ;;  %3371 = vpow2.f32 %v1266_v33 }
 0x3ac   :  { %1486 = vmatpush.msra.mxu1 %v4122_v1  ;;  %v4372_v1 = vsel %vm4133_vm13, %v798_v16, -1e+30 }
 0x3ad   :  { %3174 = vmatmul.msk.f32.gmra.mxu1 %vm637_vm11, %v538_v14  ;;  %v1163_v36 = vsel %vm1129_vm15, %v4372_v1, -inf  ;;  %v4449_v14 = vsel %vm4133_vm13, %v855_v61, -1e+30 }
 0x3ae   :  { %v912_v37 = vpop.f32.mrf.mxu0  ;;  %v1175_v16 = vsel %vm1129_vm15, %v4449_v14, -inf }
 0x3b0   :  { %v4389_v8 = vpop.eup %3371 }
 0x3b1   :  { %1161 = vmax.xlane.f32.xlu0 %v1160_v47 }
 0x3b3   :  { %v1074_v35 = vpop.f32.mrf.mxu3 }
 0x3b4   :  { %v4461_v48 = vsel %vm4206_vm14, %v1074_v35, -1e+30 }
 0x3b5   :  { %3175 = vmatmul.msk.f32.gmra.mxu1 %vm637_vm11, %v539_v51 }
 0x3b9   :  { %3331 = vrot.lane.b32.xlu2 %v4187_v11, %s3658_s17  ;;  %1164 = vmax.xlane.f32.xlu0 %v1163_v36 }
 0x3bb   :  { %v1077_v28 = vpop.f32.mrf.mxu3 }
 0x3bd   :  { %3176 = vmatmul.msk.f32.gmra.mxu1 %vm637_vm11, %v540_v13 }
 0x3bf   :  { %v1135_v54 = vpop.xlane.xlu1 %1134 }
 0x3c0   :  { %v1227_v55 = vsub.f32 %v4283_v2, %v1135_v54  ;;  %v1214_v54 = vsel %vm1129_vm15, %v4461_v48, -inf }
 0x3c1   :  { %1167 = vmax.xlane.f32.xlu0 %v1166_v29 }
 0x3c2   :  { %v1260_v60 = vmul.f32 1.442695, %v1227_v55 }
 0x3c4   :  { %3373 = vpow2.f32 %v1260_v60 }
 0x3c5   :  { %3197 = vmatmul.msk.f32.vlgmr.msra.gmra.mxu1 %vm1129_vm15, %v4389_v8  ;;  %3375 = vpow2.f32 %v1268_v59  ;;  %v4468_v59 = vsel %vm4241_vm1, %v1077_v28, -1e+30 }
 0x3c7   :  { %v1138_v0 = vpop.xlane.xlu1 %1137 }
 0x3c8   :  { %v1228_v34 = vsub.f32 %v4289_v42, %v1138_v0  ;;  %v1017_v42 = vpop.f32.mrf.mxu2  ;;  %v1080_v0 = vpop.f32.mrf.mxu3 }
 0x3c9   :  { %v4431_v21 = vsel %vm4206_vm14, %v1017_v42, -1e+30 }
 0x3ca   :  { %v4394_v58 = vpop.eup %3373  ;;  %v1262_v45 = vmul.f32 1.442695, %v1228_v34  ;;  %v1217_v34 = vsel %vm1129_vm15, %v4468_v59, -inf }
 0x3cb   :  { %3194 = vmatmul.msk.f32.gmra.mxu0 %vm1129_vm15, %v4394_v58  ;;  %v4398_v2 = vpop.eup %3375  ;;  %v1325_v4 = vsel %vm1129_vm15, %v4394_v58, 0.0 }
 0x3cc   :  { %3377 = vpow2.f32 %v1262_v45 }
 0x3cd   :  { %3198 = vmatmul.msk.f32.gmra.mxu1 %vm1129_vm15, %v4398_v2 }
 0x3cf   :  { %v1141_v39 = vpop.xlane.xlu1 %1140 }
 0x3d0   :  { %v1229_v3 = vsub.f32 %v4295_v40, %v1141_v39  ;;  %v4416_v40 = vsel %vm4133_vm13, %v912_v37, -1e+30  ;;  %v4421_v12 = vpop.f32.mrf.mxu2 }
 0x3d1   :  { %v4530_v18 = vsel %vm4241_vm1, %v4421_v12, -1e+30  ;;  %v4545_v12 = vsel %vm4115_vm12, %v4433_v17, -1e+30  ;;  %v1334_v17 = vsel %vm1129_vm15, %v4389_v8, 0.0 }
 0x3d2   :  { %v4403_v50 = vpop.eup %3377  ;;  %v1264_v5 = vmul.f32 1.442695, %v1229_v3 }
 0x3d3   :  { %3195 = vmatmul.msk.f32.gmra.mxu0 %vm1129_vm15, %v4403_v50 }
 0x3d4   :  { %3379 = vpow2.f32 %v1264_v5 }
 0x3d5   :  { %3336 = vrot.lane.b32.xlu0 %v4178_v41, %s3659_s18 }
 0x3d7   :  { %v1150_v44 = vpop.xlane.xlu1 %1149 }
 0x3d8   :  { %v1232_v46 = vsub.f32 %v4301_v52, %v1150_v44  ;;  %v1187_v52 = vsel %vm1129_vm15, %v4416_v40, -inf  ;;  %v1023_v62 = vpop.f32.mrf.mxu2 }
 0x3d9   :  { %v4443_v24 = vsel %vm4115_vm12, %v1023_v62, -1e+30 }
 0x3da   :  { %v4410_v49 = vpop.eup %3379  ;;  %v1270_v57 = vmul.f32 1.442695, %v1232_v46  ;;  %v1208_v32 = vsel %vm1129_vm15, %v4443_v24, -inf }
 0x3db   :  { %3196 = vmatmul.msk.f32.gmra.mxu0 %vm1129_vm15, %v4410_v49  ;;  %v1331_v58 = vsel %vm1129_vm15, %v4410_v49, 0.0 }
 0x3dc   :  { %3381 = vpow2.f32 %v1270_v57 }
 0x3df   :  { %v1153_v10 = vpop.xlane.xlu1 %1152 }
 0x3e0   :  { %v1233_v41 = vsub.f32 %v4307_v56, %v1153_v10  ;;  %v1202_v56 = vsel %vm1129_vm15, %v4431_v21, -inf  ;;  %v1026_v51 = vpop.f32.mrf.mxu2 }
 0x3e1   :  { %v4455_v7 = vsel %vm4133_vm13, %v1026_v51, -1e+30 }
 0x3e2   :  { %v4425_v15 = vpop.eup %3381  ;;  %v1272_v22 = vmul.f32 1.442695, %v1233_v41  ;;  %1188 = vmax.xlane.f32.xlu2 %v1187_v52  ;;  %v1211_v33 = vsel %vm1129_vm15, %v4455_v7, -inf }
 0x3e3   :  { %3199 = vmatmul.msk.f32.gmra.mxu1 %vm1129_vm15, %v4425_v15 }
 0x3e4   :  { %3383 = vpow2.f32 %v1272_v22 }
 0x3e7   :  { %v1159_v47 = vpop.xlane.xlu1 %1158 }
 0x3e8   :  { %v1235_v37 = vsub.f32 %v4313_v53, %v1159_v47 }
 0x3ea   :  { %v4437_v26 = vpop.eup %3383  ;;  %1203 = vmax.xlane.f32.xlu2 %v1202_v56  ;;  %v1276_v22 = vmul.f32 1.442695, %v1235_v37 }
 0x3eb   :  { %3200 = vmatmul.msk.f32.gmra.mxu1 %vm1129_vm15, %v4437_v26 }
 0x3f2   :  { %1209 = vmax.xlane.f32.xlu2 %v1208_v32 }
 0x3fa   :  { %1176 = vmax.xlane.f32.xlu2 %v1175_v16 }
 0x3ff   :  { %v3327_v36 = vpop.permute.xlu1 %3326 }
 0x400   :  { %v3328_v38 = vunpack.i.l.bf16 %v3327_v36  ;;  %v3329_v13 = vunpack.i.h.bf16 %v3327_v36 }
 0x402   :  { %1212 = vmax.xlane.f32.xlu2 %v1211_v33  ;;  %1729 = vmatpush.msra.mxu3 %v3328_v38 }
 0x404   :  { %1730 = vmatpush.msra.mxu3 %v3329_v13 }
 0x40a   :  { %1215 = vmax.xlane.f32.xlu2 %v1214_v54 }
 0x40c   :  { %v1180_v55 = vpop.xlane.xlu0 %1179 }
 0x40d   :  { %v1242_v29 = vsub.f32 %v4327_v19, %v1180_v55  ;;  %v4476_v19 = vsel %vm4115_vm12, %v1080_v0, -1e+30 }
 0x40e   :  { %v1220_v57 = vsel %vm1129_vm15, %v4476_v19, -inf }
 0x40f   :  { %v1290_v60 = vmul.f32 1.442695, %v1242_v29 }
 0x411   :  { %3385 = vpow2.f32 %v1290_v60 }
 0x412   :  { %1218 = vmax.xlane.f32.xlu2 %v1217_v34 }
 0x414   :  { %v1183_v45 = vpop.xlane.xlu2 %1182  ;;  %v1156_v39 = vpop.xlane.xlu0 %1155 }
 0x415   :  { %v1243_v3 = vsub.f32 %v4341_v25, %v1183_v45  ;;  %v1234_v5 = vsub.f32 %v4337_v23, %v1156_v39  ;;  %v1083_v23 = vpop.f32.mrf.mxu3 }
 0x416   :  { %v4488_v56 = vsel %vm4133_vm13, %v1083_v23, -1e+30  ;;  %v1172_v23 = vsel %vm1129_vm15, %v4545_v12, -inf }
 0x417   :  { %v4478_v42 = vpop.eup %3385  ;;  %v1292_v44 = vmul.f32 1.442695, %v1243_v3  ;;  %v1274_v46 = vmul.f32 1.442695, %v1234_v5  ;;  %v1223_v53 = vsel %vm1129_vm15, %v4488_v56, -inf  ;;  %v1205_v3 = vsel %vm1129_vm15, %v4530_v18, -inf }
 0x418   :  { %3209 = vmatmul.msk.f32.vlgmr.msrb.gmra.mxu0 %vm1129_vm15, %v4478_v42 }
 0x419   :  { %3387 = vpow2.f32 %v1292_v44 }
 0x41a   :  { %3389 = vpow2.f32 %v1274_v46  ;;  %1221 = vmax.xlane.f32.xlu2 %v1220_v57 }
 0x41c   :  { %v3332_v25 = vpop.permute.xlu2 %3331  ;;  %v1186_v10 = vpop.xlane.xlu0 %1185 }
 0x41d   :  { %v3333_v41 = vunpack.i.l.bf16 %v3332_v25  ;;  %v1244_v52 = vsub.f32 %v4354_v31, %v1186_v10  ;;  %v3334_v32 = vunpack.i.h.bf16 %v3332_v25 }
 0x41f   :  { %v4490_v62 = vpop.eup %3387  ;;  %v1294_v61 = vmul.f32 1.442695, %v1244_v52  ;;  %1731 = vmatpush.msra.mxu3 %v3333_v41  ;;  %v1328_v52 = vsel %vm1129_vm15, %v4403_v50, 0.0  ;;  %v1370_v50 = vsel %vm1129_vm15, %v4478_v42, 0.0 }
 0x420   :  { %v4492_v16 = vpop.eup %3389  ;;  %3210 = vmatmul.msk.f32.gmra.mxu0 %vm1129_vm15, %v4490_v62 }
 0x421   :  { %3391 = vpow2.f32 %v1294_v61  ;;  %3201 = vmatmul.msk.f32.vlgmr.msrb.gmra.mxu2 %vm1129_vm15, %v4492_v16  ;;  %1732 = vmatpush.msra.mxu3 %v3334_v32 }
 0x422   :  { %3393 = vpow2.f32 %v1276_v22  ;;  %v960_v31 = vpop.f32.mrf.mxu1  ;;  %1224 = vmax.xlane.f32.xlu2 %v1223_v53 }
 0x423   :  { %v4502_v47 = vsel %vm4206_vm14, %v960_v31, -1e+30 }
 0x424   :  { %v1190_v51 = vsel %vm1129_vm15, %v4502_v47, -inf  ;;  %v1162_v35 = vpop.xlane.xlu0 %1161 }
 0x425   :  { %1191 = vmax.xlane.f32.xlu1 %v1190_v51  ;;  %v1236_v36 = vsub.f32 %v4364_v9, %v1162_v35  ;;  %v1169_v9 = vsel %vm1129_vm15, %v4515_v30, -inf }
 0x427   :  { %v4507_v38 = vpop.eup %3391  ;;  %v1278_v33 = vmul.f32 1.442695, %v1236_v36 }
 0x428   :  { %v3394_v13 = vpop.eup %3393  ;;  %3211 = vmatmul.msk.f32.gmra.mxu0 %vm1129_vm15, %v4507_v38 }
 0x429   :  { %3395 = vpow2.f32 %v1278_v33  ;;  %3202 = vmatmul.msk.f32.gmra.mxu2 %vm1129_vm15, %v3394_v13  ;;  %v1349_v22 = vsel %vm1129_vm15, %v3394_v13, 0.0 }
 0x42a   :  { %v963_v28 = vpop.f32.mrf.mxu1 }
 0x42b   :  { %v4519_v54 = vsel %vm4241_vm1, %v963_v28, -1e+30 }
 0x42c   :  { %v1193_v55 = vsel %vm1129_vm15, %v4519_v54, -inf  ;;  %v1165_v29 = vpop.xlane.xlu0 %1164 }
 0x42d   :  { %1170 = vmax.xlane.f32.xlu1 %v1169_v9  ;;  %1194 = vmax.xlane.f32.xlu0 %v1193_v55  ;;  %v1237_v60 = vsub.f32 %v4372_v1, %v1165_v29  ;;  %v1337_v55 = vsel %vm1129_vm15, %v4398_v2, 0.0 }
 0x42f   :  { %v3396_v0 = vpop.eup %3395  ;;  %v1280_v34 = vmul.f32 1.442695, %v1237_v60 }
 0x430   :  { %v1352_v32 = vsel %vm1129_vm15, %v3396_v0, 0.0 }
 0x431   :  { %3397 = vpow2.f32 %v1280_v34  ;;  %3203 = vmatmul.msk.f32.gmra.mxu2 %vm1129_vm15, %v3396_v0 }
 0x432   :  { %v966_v45 = vpop.f32.mrf.mxu1 }
 0x433   :  { %v4534_v39 = vsel %vm4115_vm12, %v966_v45, -1e+30 }
 0x434   :  { %v1196_v1 = vsel %vm1129_vm15, %v4534_v39, -inf  ;;  %v1168_v5 = vpop.xlane.xlu0 %1167 }
 0x435   :  { %1206 = vmax.xlane.f32.xlu1 %v1205_v3  ;;  %1197 = vmax.xlane.f32.xlu2 %v1196_v1  ;;  %v1238_v44 = vsub.f32 %v4383_v43, %v1168_v5  ;;  %v1322_v43 = vsel %vm1129_vm15, %v4318_v6, 0.0  ;;  %v1346_v3 = vsel %vm1129_vm15, %v4492_v16, 0.0  ;;  %v1373_v5 = vsel %vm1129_vm15, %v4490_v62, 0.0 }
 0x437   :  { %v3398_v46 = vpop.eup %3397  ;;  %v1282_v27 = vmul.f32 1.442695, %v1238_v44 }
 0x438   :  { %v1355_v31 = vsel %vm1129_vm15, %v3398_v46, 0.0 }
 0x439   :  { %3399 = vpow2.f32 %v1282_v27  ;;  %3204 = vmatmul.msk.f32.gmra.mxu2 %vm1129_vm15, %v3398_v46 }
 0x43a   :  { %v969_v57 = vpop.f32.mrf.mxu1 }
 0x43b   :  { %v4549_v37 = vsel %vm4133_vm13, %v969_v57, -1e+30 }
 0x43c   :  { %v1199_v25 = vsel %vm1129_vm15, %v4549_v37, -inf }
 0x43d   :  { %1173 = vmax.xlane.f32.xlu1 %v1172_v23  ;;  %1323 = vadd.xlane.f32.xlu2 %v1322_v43 }
 0x43e   :  { %1200 = vmax.xlane.f32.xlu0 %v1199_v25  ;;  %v2227_v25 = vld [vmem:[%s5566_s4 + $0x8] sm:$0xff] }
 0x43f   :  { %v3400_v63 = vpop.eup %3399  ;;  %2268 = vmatpush.msra.mxu0 %v2227_v25 }
 0x440   :  { %3205 = vmatmul.msk.f32.vlgmr.msrb.gmra.mxu3 %vm1129_vm15, %v3400_v63 }
 0x445   :  { %1326 = vadd.xlane.f32.xlu2 %v1325_v4  ;;  %v2226_v4 = vld [vmem:[%s5566_s4] sm:$0xff] }
 0x446   :  { %1335 = vadd.xlane.f32.xlu0 %v1334_v17  ;;  %2269 = vmatpush.msra.mxu0 %v2226_v4 }
 0x447   :  { %v3337_v10 = vpop.permute.xlu0 %3336 }
 0x448   :  { %v3338_v41 = vunpack.i.l.bf16 %v3337_v10  ;;  %v3339_v6 = vunpack.i.h.bf16 %v3337_v10 }
 0x44a   :  { %1647 = vmatpush.msrb.mxu1 %v3338_v41 }
 0x44c   :  { %1648 = vmatpush.msrb.mxu1 %v3339_v6 }
 0x44d   :  { %1329 = vadd.xlane.f32.xlu2 %v1328_v52 }
 0x44e   :  { %1350 = vadd.xlane.f32.xlu0 %v1349_v22 }
 0x455   :  { %1332 = vadd.xlane.f32.xlu2 %v1331_v58  ;;  %v1189_v8 = vpop.xlane.xlu2 %1188 }
 0x456   :  { %1353 = vadd.xlane.f32.xlu0 %v1352_v32  ;;  %v1245_v61 = vsub.f32 %v4416_v40, %v1189_v8  ;;  %3341 = vrot.lane.b32.xlu1 %v4187_v11, %s3659_s18  ;;  %v1358_v40 = vsel %vm1129_vm15, %v3400_v63, 0.0 }
 0x458   :  { %v1296_v53 = vmul.f32 1.442695, %v1245_v61 }
 0x45a   :  { %3401 = vpow2.f32 %v1296_v53 }
 0x45d   :  { %1371 = vadd.xlane.f32.xlu2 %v1370_v50  ;;  %v1204_v51 = vpop.xlane.xlu2 %1203 }
 0x45e   :  { %1356 = vadd.xlane.f32.xlu0 %v1355_v31  ;;  %v1250_v49 = vsub.f32 %v4431_v21, %v1204_v51 }
 0x460   :  { %v3402_v35 = vpop.eup %3401  ;;  %v1306_v36 = vmul.f32 1.442695, %v1250_v49 }
 0x461   :  { %3212 = vmatmul.msk.f32.gmra.mxu0 %vm1129_vm15, %v3402_v35  ;;  %v1379_v46 = vsel %vm1129_vm15, %v3402_v35, 0.0  ;;  %v1340_v35 = vsel %vm1129_vm15, %v4425_v15, 0.0 }
 0x462   :  { %3403 = vpow2.f32 %v1306_v36 }
 0x465   :  { %v1210_v11 = vpop.xlane.xlu2 %1209 }
 0x466   :  { %1359 = vadd.xlane.f32.xlu0 %v1358_v40  ;;  %v1252_v13 = vsub.f32 %v4443_v24, %v1210_v11 }
 0x468   :  { %v3404_v33 = vpop.eup %3403  ;;  %v1310_v28 = vmul.f32 1.442695, %v1252_v13 }
 0x469   :  { %3217 = vmatmul.msk.f32.vlgmr.msra.gmra.mxu2 %vm1129_vm15, %v3404_v33  ;;  %v1394_v42 = vsel %vm1129_vm15, %v3404_v33, 0.0 }
 0x46a   :  { %1395 = vadd.xlane.f32.xlu2 %v1394_v42  ;;  %3405 = vpow2.f32 %v1310_v28 }
 0x46d   :  { %v1177_v9 = vpop.xlane.xlu2 %1176 }
 0x46e   :  { %v1241_v21 = vsub.f32 %v4449_v14, %v1177_v9 }
 0x470   :  { %v1288_v29 = vmul.f32 1.442695, %v1241_v21  ;;  %v4583_v0 = vpop.eup %3405 }
 0x471   :  { %v1400_v24 = vsel %vm1129_vm15, %v4583_v0, 0.0 }
 0x472   :  { %1338 = vadd.xlane.f32.xlu2 %v1337_v55  ;;  %3407 = vpow2.f32 %v1288_v29 }
 0x475   :  { %v1213_v60 = vpop.xlane.xlu2 %1212 }
 0x478   :  { %v4587_v45 = vpop.eup %3407 }
 0x479   :  { %v1367_v2 = vsel %vm1129_vm15, %v4587_v45, 0.0 }
 0x47a   :  { %1401 = vadd.xlane.f32.xlu2 %v1400_v24 }
 0x47d   :  { %v1216_v34 = vpop.xlane.xlu2 %1215 }
 0x480   :  { %1347 = vadd.xlane.f32.xlu1 %v1346_v3 }
 0x482   :  { %1368 = vadd.xlane.f32.xlu2 %v1367_v2 }
 0x485   :  { %v1219_v14 = vpop.xlane.xlu2 %1218 }
 0x486   :  { %v1255_v1 = vsub.f32 %v4468_v59, %v1219_v14 }
 0x488   :  { %v1316_v44 = vmul.f32 1.442695, %v1255_v1  ;;  %1374 = vadd.xlane.f32.xlu1 %v1373_v5 }
 0x48a   :  { %3409 = vpow2.f32 %v1316_v44  ;;  %1380 = vadd.xlane.f32.xlu2 %v1379_v46 }
 0x48d   :  { %v4601_v57 = vpop.xlane.xlu2 %1221 }
 0x490   :  { %v4597_v27 = vpop.eup %3409 }
 0x491   :  { %v1409_v16 = vsel %vm1129_vm15, %v4597_v27, 0.0 }
 0x492   :  { %1410 = vadd.xlane.f32.xlu2 %v1409_v16 }
 0x495   :  { %v4605_v59 = vpop.xlane.xlu2 %1224 }
 0x496   :  { %v1257_v25 = vsub.f32 %v4488_v56, %v4605_v59  ;;  %v1376_v56 = vsel %vm1129_vm15, %v4507_v38, 0.0 }
 0x498   :  { %v4603_v23 = vpop.xlane.xlu1 %1191 }
 0x4a0   :  { %v1171_v43 = vpop.xlane.xlu1 %1170  ;;  %v1195_v41 = vpop.xlane.xlu0 %1194 }
 0x4a1   :  { %v1239_v62 = vsub.f32 %v4515_v30, %v1171_v43  ;;  %v1253_v30 = vsub.f32 %v4455_v7, %v1213_v60  ;;  %v1247_v9 = vsub.f32 %v4519_v54, %v1195_v41  ;;  %v1246_v54 = vsub.f32 %v4502_v47, %v4603_v23  ;;  %v2234_v41 = vld [vmem:[%s5566_s4 + $0x40] sm:$0xff] }
 0x4a3   :  { %v1284_v63 = vmul.f32 1.442695, %v1239_v62  ;;  %v1312_v61 = vmul.f32 1.442695, %v1253_v30  ;;  %v1300_v14 = vmul.f32 1.442695, %v1247_v9 }
 0x4a4   :  { %v1298_v47 = vmul.f32 1.442695, %v1246_v54 }
 0x4a5   :  { %3411 = vpow2.f32 %v1284_v63 }
 0x4a8   :  { %v1207_v17 = vpop.xlane.xlu1 %1206  ;;  %v1198_v10 = vpop.xlane.xlu2 %1197 }
 0x4a9   :  { %v1251_v6 = vsub.f32 %v4530_v18, %v1207_v17  ;;  %v1248_v52 = vsub.f32 %v4534_v39, %v1198_v10  ;;  %v1254_v39 = vsub.f32 %v4461_v48, %v1216_v34  ;;  %v1447_v34 = vpop.f32.mrf.mxu0  ;;  %v2235_v17 = vld [vmem:[%s5566_s4 + $0x48] sm:$0xff] }
 0x4aa   :  { %2432 = vmatpush.msrb.mxu0 %v2235_v17 }
 0x4ab   :  { %v3412_v22 = vpop.eup %3411  ;;  %v1308_v58 = vmul.f32 1.442695, %v1251_v6  ;;  %v1302_v32 = vmul.f32 1.442695, %v1248_v52  ;;  %v1314_v11 = vmul.f32 1.442695, %v1254_v39  ;;  %v1256_v39 = vsub.f32 %v4476_v19, %v4601_v57 }
 0x4ac   :  { %3206 = vmatmul.msk.f32.gmra.mxu3 %vm1129_vm15, %v3412_v22  ;;  %v1361_v8 = vsel %vm1129_vm15, %v3412_v22, 0.0  ;;  %v1320_v52 = vmul.f32 1.442695, %v1257_v25  ;;  %2433 = vmatpush.msrb.mxu0 %v2234_v41 }
 0x4ad   :  { %3413 = vpow2.f32 %v1308_v58  ;;  %1362 = vadd.xlane.f32.xlu1 %v1361_v8 }
 0x4ae   :  { %3415 = vpow2.f32 %v1302_v32 }
 0x4b0   :  { %v1174_v53 = vpop.xlane.xlu1 %1173  ;;  %v1324_v50 = vpop.xlane.xlu2 %1323 }
 0x4b1   :  { %v1240_v31 = vsub.f32 %v4545_v12, %v1174_v53  ;;  %3417 = vrcp.f32 %v1324_v50  ;;  %v4620_v18 = vpop.xlane.xlu0 %1200  ;;  %v1757_v21 = vand.u32 2147483648, %v1324_v50  ;;  %v1755_v60 = vand.u32 2147483647, %v1324_v50  ;;  %v1450_v59 = vpop.f32.mrf.mxu0 }
 0x4b2   :  { %3419 = vpow2.f32 %v1312_v61  ;;  %vm1751_vm3 = vweird.f32 %v1324_v50 }
 0x4b3   :  { %v3414_v7 = vpop.eup %3413  ;;  %v1286_v51 = vmul.f32 1.442695, %v1240_v31  ;;  %v1758_v1 = vor.u32 1.1754944e-38, %v1757_v21  ;;  %vm1756_vm5 = vcmp.eq.f32.partialorder %v1755_v60, 8.507059e+37 }
 0x4b4   :  { %v4623_v49 = vpop.eup %3415  ;;  %3218 = vmatmul.msk.f32.gmra.mxu2 %vm1129_vm15, %v3414_v7  ;;  %v1397_v36 = vsel %vm1129_vm15, %v3414_v7, 0.0 }
 0x4b5   :  { %3421 = vpow2.f32 %v1286_v51  ;;  %v1388_v12 = vsel %vm1129_vm15, %v4623_v49, 0.0  ;;  %1341 = vadd.xlane.f32.xlu1 %v1340_v35  ;;  %1398 = vadd.xlane.f32.xlu0 %v1397_v36 }
 0x4b6   :  { %1389 = vadd.xlane.f32.xlu2 %v1388_v12 }
 0x4b7   :  { %v3418_v40 = vpop.eup %3417 }
 0x4b8   :  { %v3420_v48 = vpop.eup %3419  ;;  %v1747_v33 = vmul.f32 %v3418_v40, %v1324_v50  ;;  %v4631_v13 = vpop.xlane.xlu2 %1326  ;;  %vm1752_vm2 = vweird.f32 %v3418_v40 }
 0x4b9   :  { %3423 = vrcp.f32 %v4631_v13  ;;  %v4634_v42 = vpop.xlane.xlu0 %1335  ;;  %v1403_v55 = vsel %vm1129_vm15, %v3420_v48, 0.0  ;;  %vm1753_vm4 = vmor %vm1751_vm3, %vm1752_vm2  ;;  %v1771_v10 = vand.u32 2147483648, %v4631_v13  ;;  %vm1765_vm7 = vweird.f32 %v4631_v13  ;;  %v1453_v21 = vpop.f32.mrf.mxu0 }
 0x4ba   :  { %v1748_v15 = vsub.f32 1.0, %v1747_v33  ;;  %3425 = vpow2.f32 %v1314_v11  ;;  %v1769_v30 = vand.u32 2147483647, %v4631_v13 }
 0x4bb   :  { %v3422_v28 = vpop.eup %3421  ;;  %v1772_v31 = vor.u32 1.1754944e-38, %v1771_v10 }
 0x4bc   :  { %v1749_v29 = vmul.f32 %v3418_v40, %v1748_v15  ;;  %3207 = vmatmul.msk.f32.gmra.mxu3 %vm1129_vm15, %v3422_v28  ;;  %3219 = vmatmul.msk.f32.gmra.mxu2 %vm1129_vm15, %v4583_v0  ;;  %v1364_v24 = vsel %vm1129_vm15, %v3422_v28, 0.0  ;;  %vm1770_vm9 = vcmp.eq.f32.partialorder %v1769_v30, 8.507059e+37  ;;  %v2229_v15 = vld [vmem:[%s5566_s4 + $0x18] sm:$0xff]  ;;  %v2232_v28 = vld [vmem:[%s5566_s4 + $0x30] sm:$0xff] }
 0x4bd   :  { %1404 = vadd.xlane.f32.xlu1 %v1403_v55  ;;  %1365 = vadd.xlane.f32.xlu0 %v1364_v24  ;;  %v1318_v55 = vmul.f32 1.442695, %v1256_v39  ;;  %v2228_v24 = vld [vmem:[%s5566_s4 + $0x10] sm:$0xff] }
 0x4be   :  { %v1750_v3 = vadd.f32 %v3418_v40, %v1749_v29 }
 0x4bf   :  { %v3424_v2 = vpop.eup %3423 }
 0x4c0   :  { %v1754_v5 = vsel %vm1753_vm4, %v3418_v40, %v1750_v3  ;;  %v1761_v44 = vmul.f32 %v3424_v2, %v4631_v13  ;;  %v4645_v46 = vpop.xlane.xlu2 %1329  ;;  %v3426_v0 = vpop.eup %3425  ;;  %vm1766_vm6 = vweird.f32 %v3424_v2  ;;  %v2233_v40 = vld [vmem:[%s5566_s4 + $0x38] sm:$0xff] }
 0x4c1   :  { %v1759_v16 = vsel %vm1756_vm5, %v1758_v1, %v1754_v5  ;;  %3427 = vrcp.f32 %v4645_v46  ;;  %v4648_v43 = vpop.xlane.xlu0 %1350  ;;  %v1406_v4 = vsel %vm1129_vm15, %v3426_v0, 0.0  ;;  %vm4675_vm8 = vmor %vm1765_vm7, %vm1766_vm6  ;;  %v1785_v19 = vand.u32 2147483648, %v4645_v46  ;;  %2391 = vmatpush.msrb.mxu3 %v2233_v40  ;;  %v1456_v10 = vpop.f32.mrf.mxu0 }
 0x4c2   :  { %v1762_v62 = vsub.f32 1.0, %v1761_v44  ;;  %3429 = vpow2.f32 %v1300_v14  ;;  %v2194_v23 = vmul.f32 %v1759_v16, %v1447_v34  ;;  %vm1779_vm12 = vweird.f32 %v4645_v46 }
 0x4c3   :  { %3431 = vpow2.f32 %v1298_v47  ;;  %v1783_v13 = vand.u32 2147483647, %v4645_v46  ;;  %v1786_v3 = vor.u32 1.1754944e-38, %v1785_v19  ;;  %2392 = vmatpush.msrb.mxu3 %v2232_v28  ;;  %v1249_v1 = vsub.f32 %v4549_v37, %v4620_v18 }
 0x4c4   :  { %v1763_v63 = vmul.f32 %v3424_v2, %v1762_v62  ;;  %3208 = vmatmul.msk.f32.gmra.mxu3 %vm1129_vm15, %v4587_v45  ;;  %3220 = vmatmul.msk.f32.gmra.mxu2 %vm1129_vm15, %v3420_v48  ;;  %v1343_v48 = vsel %vm1129_vm15, %v4437_v26, 0.0  ;;  %v1813_v40 = vand.u32 2147483648, %v4634_v42  ;;  %v1811_v19 = vand.u32 2147483647, %v4634_v42 }
 0x4c5   :  { %3225 = vmatmul.msk.f32.vlgmr.msra.gmra.mxu0 %vm637_vm11, %v2194_v23  ;;  %1407 = vadd.xlane.f32.xlu1 %v1406_v4  ;;  %vm1784_vm14 = vcmp.eq.f32.partialorder %v1783_v13, 8.507059e+37  ;;  %v1304_v47 = vmul.f32 1.442695, %v1249_v1 }
 0x4c6   :  { %1377 = vadd.xlane.f32.xlu0 %v1376_v56  ;;  %v1764_v45 = vadd.f32 %v3424_v2, %v1763_v63  ;;  %v1814_v26 = vor.u32 1.1754944e-38, %v1813_v40 }
 0x4c7   :  { %v4666_v6 = vpop.eup %3427 }
 0x4c8   :  { %v1775_v38 = vmul.f32 %v4666_v6, %v4645_v46  ;;  %v3342_v22 = vpop.permute.xlu1 %3341  ;;  %v4672_v58 = vpop.xlane.xlu2 %1332  ;;  %v1768_v50 = vsel %vm4675_vm8, %v3424_v2, %v1764_v45  ;;  %vm1780_vm10 = vweird.f32 %v4666_v6 }
 0x4c9   :  { %v4679_v8 = vpop.eup %3429  ;;  %v3343_v61 = vunpack.i.l.bf16 %v3342_v22  ;;  %v4681_v53 = vpop.xlane.xlu0 %1353  ;;  %3433 = vrcp.f32 %v4672_v58  ;;  %v3344_v51 = vunpack.i.h.bf16 %v3342_v22  ;;  %v1773_v36 = vsel %vm1770_vm9, %v1772_v31, %v1768_v50  ;;  %vm4713_vm13 = vmor %vm1779_vm12, %vm1780_vm10 }
 0x4ca   :  { %v1776_v7 = vsub.f32 1.0, %v1775_v38  ;;  %3435 = vpow2.f32 %v1320_v52  ;;  %v1385_v12 = vsel %vm1129_vm15, %v4679_v8, 0.0  ;;  %v3432_v11 = vpop.eup %3431  ;;  %v2195_v57 = vmul.f32 %v1773_v36, %v1450_v59  ;;  %v1611_v36 = vpop.f32.mrf.mxu0 }
 0x4cb   :  { %1649 = vmatpush.msrb.mxu1 %v3343_v61  ;;  %3437 = vrcp.f32 %v4634_v42  ;;  %v1799_v62 = vand.u32 2147483648, %v4672_v58  ;;  %v1382_v25 = vsel %vm1129_vm15, %v3432_v11, 0.0  ;;  %vm1793_vm2 = vweird.f32 %v4672_v58 }
 0x4cc   :  { %v1777_v35 = vmul.f32 %v4666_v6, %v1776_v7  ;;  %3221 = vmatmul.msk.f32.vlgmr.msra.gmra.mxu3 %vm1129_vm15, %v3426_v0  ;;  %vm1807_vm10 = vweird.f32 %v4634_v42 }
 0x4cd   :  { %1386 = vadd.xlane.f32.xlu1 %v1385_v12  ;;  %1650 = vmatpush.msrb.mxu1 %v3344_v51  ;;  %v1800_v4 = vor.u32 1.1754944e-38, %v1799_v62 }
 0x4ce   :  { %1344 = vadd.xlane.f32.xlu0 %v1343_v48  ;;  %3213 = vmatmul.msk.f32.vlgmr.msrb.gmra.mxu1 %vm1129_vm15, %v3432_v11  ;;  %v1778_v33 = vadd.f32 %v4666_v6, %v1777_v35 }
 0x4cf   :  { %3226 = vmatmul.msk.f32.gmra.mxu0 %vm637_vm11, %v2195_v57  ;;  %v3434_v9 = vpop.eup %3433  ;;  %2309 = vmatpush.msra.mxu1 %v2229_v15 }
 0x4d0   :  { %v4717_v29 = vpop.xlane.xlu2 %1371  ;;  %v1782_v60 = vsel %vm4713_vm13, %v4666_v6, %v1778_v33  ;;  %v4725_v34 = vpop.eup %3435  ;;  %v1789_v2 = vmul.f32 %v3434_v9, %v4672_v58  ;;  %vm1794_vm1 = vweird.f32 %v3434_v9 }
 0x4d1   :  { %3439 = vrcp.f32 %v4717_v29  ;;  %v4729_v54 = vpop.xlane.xlu0 %1356  ;;  %2310 = vmatpush.msra.mxu1 %v2228_v24  ;;  %v4731_v14 = vpop.eup %3437  ;;  %v1787_v44 = vsel %vm1784_vm14, %v1786_v3, %v1782_v60  ;;  %v1415_v0 = vsel %vm1129_vm15, %v4725_v34, 0.0  ;;  %vm1795_vm3 = vmor %vm1793_vm2, %vm1794_vm1  ;;  %v1981_v6 = vand.u32 2147483648, %v4717_v29  ;;  %v2230_v24 = vld [vmem:[%s5566_s4 + $0x20] sm:$0xff] }
 0x4d2   :  { %v1790_v5 = vsub.f32 1.0, %v1789_v2  ;;  %3441 = vpow2.f32 %v1318_v55  ;;  %v2196_v46 = vmul.f32 %v1787_v44, %v1453_v21  ;;  %v1803_v37 = vmul.f32 %v4731_v14, %v4634_v42  ;;  %v2231_v21 = vld [vmem:[%s5566_s4 + $0x28] sm:$0xff]  ;;  %v1488_v2 = vpop.f32.mrf.mxu1 }
 0x4d3   :  { %v1979_v38 = vand.u32 2147483647, %v4717_v29  ;;  %vm1975_vm6 = vweird.f32 %v4717_v29  ;;  %v1982_v50 = vor.u32 1.1754944e-38, %v1981_v6  ;;  %vm1808_vm9 = vweird.f32 %v4731_v14  ;;  %2350 = vmatpush.msrb.mxu2 %v2231_v21 }
 0x4d4   :  { %3222 = vmatmul.msk.f32.gmra.mxu3 %vm1129_vm15, %v4597_v27  ;;  %v1791_v16 = vmul.f32 %v3434_v9, %v1790_v5  ;;  %v1797_v27 = vand.u32 2147483647, %v4672_v58  ;;  %v1804_v45 = vsub.f32 1.0, %v1803_v37  ;;  %vm4772_vm12 = vmor %vm1807_vm10, %vm1808_vm9  ;;  %vm1812_vm1 = vcmp.eq.f32.partialorder %v1811_v19, 8.507059e+37 }
 0x4d5   :  { %1416 = vadd.xlane.f32.xlu1 %v1415_v0  ;;  %vm1980_vm8 = vcmp.eq.f32.partialorder %v1979_v38, 8.507059e+37  ;;  %2351 = vmatpush.msrb.mxu2 %v2230_v24 }
 0x4d6   :  { %1383 = vadd.xlane.f32.xlu0 %v1382_v25  ;;  %3214 = vmatmul.msk.f32.gmra.mxu1 %vm1129_vm15, %v4679_v8  ;;  %v1792_v23 = vadd.f32 %v3434_v9, %v1791_v16  ;;  %vm1798_vm4 = vcmp.eq.f32.partialorder %v1797_v27, 8.507059e+37  ;;  %v1805_v8 = vmul.f32 %v4731_v14, %v1804_v45 }
 0x4d7   :  { %v3440_v18 = vpop.eup %3439  ;;  %3227 = vmatmul.msk.f32.gmra.mxu0 %vm637_vm11, %v2196_v46 }
 0x4d8   :  { %v1971_v63 = vmul.f32 %v3440_v18, %v4717_v29  ;;  %v1796_v56 = vsel %vm1795_vm3, %v3434_v9, %v1792_v23  ;;  %v3442_v59 = vpop.eup %3441  ;;  %vm1976_vm5 = vweird.f32 %v3440_v18  ;;  %v1806_v12 = vadd.f32 %v4731_v14, %v1805_v8 }
 0x4d9   :  { %v4749_v17 = vpop.xlane.xlu0 %1359  ;;  %v1801_v52 = vsel %vm1798_vm4, %v1800_v4, %v1796_v56  ;;  %v1412_v58 = vsel %vm1129_vm15, %v3442_v59, 0.0  ;;  %vm1977_vm7 = vmor %vm1975_vm6, %vm1976_vm5 }
 0x4da   :  { %v1972_v41 = vsub.f32 1.0, %v1971_v63  ;;  %3443 = vrcp.f32 %v4749_v17  ;;  %v2197_v22 = vmul.f32 %v1801_v52, %v1456_v10  ;;  %v1925_v57 = vand.u32 2147483648, %v4749_v17  ;;  %v1491_v23 = vpop.f32.mrf.mxu1  ;;  %v1529_v52 = vpop.f32.mrf.mxu2 }
 0x4db   :  { %3445 = vpow2.f32 %v1304_v47  ;;  %v1923_v13 = vand.u32 2147483647, %v4749_v17  ;;  %v1810_v42 = vsel %vm4772_vm12, %v4731_v14, %v1806_v12  ;;  %vm1919_vm14 = vweird.f32 %v4749_v17 }
 0x4dc   :  { %v1973_v30 = vmul.f32 %v3440_v18, %v1972_v41  ;;  %3223 = vmatmul.msk.f32.gmra.mxu3 %vm1129_vm15, %v3442_v59  ;;  %v1926_v55 = vor.u32 1.1754944e-38, %v1925_v57  ;;  %v1815_v29 = vsel %vm1812_vm1, %v1814_v26, %v1810_v42  ;;  %v1883_v12 = vand.u32 2147483648, %v4648_v43 }
 0x4dd   :  { %v4756_v32 = vpop.xlane.xlu2 %1395  ;;  %vm1924_vm3 = vcmp.eq.f32.partialorder %v1923_v13, 8.507059e+37  ;;  %v2198_v5 = vmul.f32 %v1815_v29, %v1488_v2  ;;  %v1881_v57 = vand.u32 2147483647, %v4648_v43  ;;  %v2239_v29 = vld [vmem:[%s5566_s4 + $0x68] sm:$0xff] }
 0x4de   :  { %v1974_v61 = vadd.f32 %v3440_v18, %v1973_v30  ;;  %1413 = vadd.xlane.f32.xlu0 %v1412_v58  ;;  %3215 = vmatmul.msk.f32.gmra.mxu1 %vm1129_vm15, %v4623_v49 }
 0x4df   :  { %3228 = vmatmul.msk.f32.gmra.mxu0 %vm637_vm11, %v2197_v22  ;;  %2514 = vmatpush.msra.mxu2 %v2239_v29 }
 0x4e0   :  { %v3444_v31 = vpop.eup %3443  ;;  %v1978_v7 = vsel %vm1977_vm7, %v3440_v18, %v1974_v61 }
 0x4e1   :  { %v3446_v39 = vpop.eup %3445  ;;  %v1983_v51 = vsel %vm1980_vm8, %v1982_v50, %v1978_v7  ;;  %v1915_v35 = vmul.f32 %v3444_v31, %v4749_v17  ;;  %vm1920_vm13 = vweird.f32 %v3444_v31 }
 0x4e2   :  { %v2210_v11 = vmul.f32 %v1983_v51, %v1611_v36  ;;  %v1391_v15 = vsel %vm1129_vm15, %v3446_v39, 0.0  ;;  %vm1921_vm2 = vmor %vm1919_vm14, %vm1920_vm13  ;;  %vm1877_vm13 = vweird.f32 %v4648_v43  ;;  %v1532_v26 = vpop.f32.mrf.mxu2 }
 0x4e3   :  { %v1916_v49 = vsub.f32 1.0, %v1915_v35 }
 0x4e4   :  { %3224 = vmatmul.msk.f32.gmra.mxu3 %vm1129_vm15, %v4725_v34  ;;  %v1570_v34 = vpop.f32.mrf.mxu3 }
 0x4e5   :  { %v1917_v33 = vmul.f32 %v3444_v31, %v1916_v49  ;;  %v1339_v28 = vpop.xlane.xlu2 %1338 }
 0x4e6   :  { %1392 = vadd.xlane.f32.xlu0 %v1391_v15  ;;  %3447 = vrcp.f32 %v1339_v28  ;;  %3216 = vmatmul.msk.f32.gmra.mxu1 %vm1129_vm15, %v3446_v39  ;;  %v1827_v0 = vand.u32 2147483648, %v1339_v28  ;;  %v1825_v62 = vand.u32 2147483647, %v1339_v28  ;;  %vm1821_vm4 = vweird.f32 %v1339_v28 }
 0x4e7   :  { %v1918_v9 = vadd.f32 %v3444_v31, %v1917_v33  ;;  %3241 = vmatmul.msk.f32.vlgmr.msrb.gmra.mxu0 %vm637_vm11, %v2210_v11  ;;  %3449 = vrcp.f32 %v4648_v43 }
 0x4e8   :  { %v1828_v18 = vor.u32 1.1754944e-38, %v1827_v0  ;;  %vm1826_vm6 = vcmp.eq.f32.partialorder %v1825_v62, 8.507059e+37  ;;  %v1895_v0 = vand.u32 2147483647, %v4681_v53 }
 0x4e9   :  { %v1922_v60 = vsel %vm1921_vm2, %v3444_v31, %v1918_v9  ;;  %v1884_v9 = vor.u32 1.1754944e-38, %v1883_v12 }
 0x4ea   :  { %v1927_v3 = vsel %vm1924_vm3, %v1926_v55, %v1922_v60  ;;  %vm1882_vm3 = vcmp.eq.f32.partialorder %v1881_v57, 8.507059e+37  ;;  %v2238_v60 = vld [vmem:[%s5566_s4 + $0x60] sm:$0xff] }
 0x4eb   :  { %v2206_v14 = vmul.f32 %v1927_v3, %v1570_v34  ;;  %2515 = vmatpush.msra.mxu2 %v2238_v60 }
 0x4ec   :  { %v3448_v1 = vpop.eup %3447 }
 0x4ed   :  { %v1817_v44 = vmul.f32 %v3448_v1, %v1339_v28  ;;  %3237 = vmatmul.msk.f32.vlgmr.msrb.gmra.mxu3 %vm637_vm11, %v2206_v14  ;;  %vm1822_vm15 = vweird.f32 %v3448_v1  ;;  %v4793_v25 = vpop.eup %3449  ;;  %v1614_v14 = vpop.f32.mrf.mxu0 }
 0x4ee   :  { %3229 = vmatmul.msk.f32.vlgmr.msra.gmra.mxu1 %vm637_vm11, %v2198_v5  ;;  %vm1823_vm5 = vmor %vm1821_vm4, %vm1822_vm15  ;;  %v1873_v63 = vmul.f32 %v4793_v25, %v4648_v43  ;;  %vm1878_vm10 = vweird.f32 %v4793_v25 }
 0x4ef   :  { %v1818_v46 = vsub.f32 1.0, %v1817_v44  ;;  %vm4811_vm14 = vmor %vm1877_vm13, %vm1878_vm10  ;;  %vm1905_vm10 = vweird.f32 %v4729_v54 }
 0x4f0   :  { %v1874_v59 = vsub.f32 1.0, %v1873_v63  ;;  %v1911_v63 = vand.u32 2147483648, %v4729_v54 }
 0x4f1   :  { %v1819_v16 = vmul.f32 %v3448_v1, %v1818_v46 }
 0x4f2   :  { %v1875_v30 = vmul.f32 %v4793_v25, %v1874_v59 }
 0x4f3   :  { %v1348_v37 = vpop.xlane.xlu1 %1347  ;;  %v1820_v27 = vadd.f32 %v3448_v1, %v1819_v16 }
 0x4f4   :  { %3451 = vrcp.f32 %v1348_v37  ;;  %v1869_v22 = vand.u32 2147483648, %v1348_v37  ;;  %v1867_v8 = vand.u32 2147483647, %v1348_v37  ;;  %vm1863_vm8 = vweird.f32 %v1348_v37 }
 0x4f5   :  { %3453 = vrcp.f32 %v4681_v53  ;;  %v1824_v47 = vsel %vm1823_vm5, %v3448_v1, %v1820_v27  ;;  %v1876_v39 = vadd.f32 %v4793_v25, %v1875_v30  ;;  %v1897_v1 = vand.u32 2147483648, %v4681_v53  ;;  %v1535_v27 = vpop.f32.mrf.mxu2 }
 0x4f6   :  { %v1829_v4 = vsel %vm1826_vm6, %v1828_v18, %v1824_v47  ;;  %v1870_v7 = vor.u32 1.1754944e-38, %v1869_v22  ;;  %vm1868_vm12 = vcmp.eq.f32.partialorder %v1867_v8, 8.507059e+37  ;;  %vm1891_vm6 = vweird.f32 %v4681_v53 }
 0x4f7   :  { %v2199_v17 = vmul.f32 %v1829_v4, %v1491_v23  ;;  %v1880_v13 = vsel %vm4811_vm14, %v4793_v25, %v1876_v39  ;;  %v2091_v30 = vand.u32 2147483647, %v4756_v32 }
 0x4f8   :  { %v1885_v55 = vsel %vm1882_vm3, %v1884_v9, %v1880_v13 }
 0x4f9   :  { %3230 = vmatmul.msk.f32.gmra.mxu1 %vm637_vm11, %v2199_v17  ;;  %v2203_v44 = vmul.f32 %v1885_v55, %v1532_v26  ;;  %v1909_v17 = vand.u32 2147483647, %v4729_v54  ;;  %vm2092_vm3 = vcmp.eq.f32.partialorder %v2091_v30, 8.507059e+37 }
 0x4fa   :  { %v3452_v56 = vpop.eup %3451 }
 0x4fb   :  { %v4799_v10 = vpop.eup %3453  ;;  %v1859_v45 = vmul.f32 %v3452_v56, %v1348_v37  ;;  %v1375_v41 = vpop.xlane.xlu1 %1374  ;;  %vm1864_vm7 = vweird.f32 %v3452_v56  ;;  %v1898_v37 = vor.u32 1.1754944e-38, %v1897_v1  ;;  %vm1910_vm13 = vcmp.eq.f32.partialorder %v1909_v17, 8.507059e+37 }
 0x4fc   :  { %3455 = vrcp.f32 %v1375_v41  ;;  %v1887_v38 = vmul.f32 %v4799_v10, %v4681_v53  ;;  %vm1865_vm9 = vmor %vm1863_vm8, %vm1864_vm7  ;;  %v1995_v33 = vand.u32 2147483648, %v1375_v41  ;;  %v1993_v42 = vand.u32 2147483647, %v1375_v41  ;;  %v4842_v53 = vpop.xlane.xlu2 %1401 }
 0x4fd   :  { %v1860_v6 = vsub.f32 1.0, %v1859_v45  ;;  %3457 = vrcp.f32 %v4729_v54  ;;  %vm1989_vm2 = vweird.f32 %v1375_v41  ;;  %vm1892_vm4 = vweird.f32 %v4799_v10 }
 0x4fe   :  { %v1888_v31 = vsub.f32 1.0, %v1887_v38  ;;  %3459 = vrcp.f32 %v4756_v32  ;;  %v1996_v21 = vor.u32 1.1754944e-38, %v1995_v33  ;;  %vm1994_vm5 = vcmp.eq.f32.partialorder %v1993_v42, 8.507059e+37  ;;  %vm1893_vm7 = vmor %vm1891_vm6, %vm1892_vm4 }
 0x4ff   :  { %v1861_v58 = vmul.f32 %v3452_v56, %v1860_v6  ;;  %vm1896_vm8 = vcmp.eq.f32.partialorder %v1895_v0, 8.507059e+37  ;;  %v1538_v6 = vpop.f32.mrf.mxu2  ;;  %3461 = vrcp.f32 %v4842_v53  ;;  %vm2115_vm6 = vweird.f32 %v4842_v53 }
 0x500   :  { %v1889_v48 = vmul.f32 %v4799_v10, %v1888_v31 }
 0x501   :  { %v1862_v61 = vadd.f32 %v3452_v56, %v1861_v58 }
 0x502   :  { %v3456_v50 = vpop.eup %3455  ;;  %v1890_v3 = vadd.f32 %v4799_v10, %v1889_v48 }
 0x503   :  { %v1866_v51 = vsel %vm1865_vm9, %v3452_v56, %v1862_v61  ;;  %v1985_v35 = vmul.f32 %v3456_v50, %v1375_v41  ;;  %v4807_v36 = vpop.eup %3457  ;;  %vm1990_vm1 = vweird.f32 %v3456_v50 }
 0x504   :  { %v1871_v40 = vsel %vm1868_vm12, %v1870_v7, %v1866_v51  ;;  %v1901_v15 = vmul.f32 %v4807_v36, %v4729_v54  ;;  %vm1991_vm15 = vmor %vm1989_vm2, %vm1990_vm1  ;;  %v3460_v2 = vpop.eup %3459  ;;  %v1894_v25 = vsel %vm1893_vm7, %v4799_v10, %v1890_v3  ;;  %vm1906_vm9 = vweird.f32 %v4807_v36  ;;  %v4854_v38 = vpop.xlane.xlu2 %1368 }
 0x505   :  { %v1986_v11 = vsub.f32 1.0, %v1985_v35  ;;  %v2202_v49 = vmul.f32 %v1871_v40, %v1529_v52  ;;  %v2083_v62 = vmul.f32 %v3460_v2, %v4756_v32  ;;  %v1899_v18 = vsel %vm1896_vm8, %v1898_v37, %v1894_v25  ;;  %vm1907_vm12 = vmor %vm1905_vm10, %vm1906_vm9  ;;  %v4858_v7 = vpop.eup %3461 }
 0x506   :  { %v1902_v24 = vsub.f32 1.0, %v1901_v15  ;;  %v2204_v4 = vmul.f32 %v1899_v18, %v1535_v27  ;;  %v1912_v10 = vor.u32 1.1754944e-38, %v1911_v63  ;;  %vm2088_vm14 = vweird.f32 %v3460_v2 }
 0x507   :  { %v1987_v28 = vmul.f32 %v3456_v50, %v1986_v11  ;;  %3233 = vmatmul.msk.f32.vlgmr.msrb.gmra.mxu2 %vm637_vm11, %v2202_v49  ;;  %v2084_v47 = vsub.f32 1.0, %v2083_v62  ;;  %v2093_v52 = vand.u32 2147483648, %v4756_v32  ;;  %vm2087_vm1 = vweird.f32 %v4756_v32 }
 0x508   :  { %v1903_v16 = vmul.f32 %v4807_v36, %v1902_v24  ;;  %vm2089_vm2 = vmor %vm2087_vm1, %vm2088_vm14  ;;  %v2111_v12 = vmul.f32 %v4858_v7, %v4842_v53  ;;  %v2121_v49 = vand.u32 2147483648, %v4842_v53  ;;  %v2119_v15 = vand.u32 2147483647, %v4842_v53 }
 0x509   :  { %v1988_v43 = vadd.f32 %v3456_v50, %v1987_v28  ;;  %v2085_v56 = vmul.f32 %v3460_v2, %v2084_v47  ;;  %v2094_v58 = vor.u32 1.1754944e-38, %v2093_v52  ;;  %vm2116_vm8 = vweird.f32 %v4858_v7 }
 0x50a   :  { %v1904_v23 = vadd.f32 %v4807_v36, %v1903_v16  ;;  %v2112_v33 = vsub.f32 1.0, %v2111_v12  ;;  %v4882_v9 = vor.u32 1.1754944e-38, %v2121_v49  ;;  %v1965_v1 = vand.u32 2147483647, %v4854_v38  ;;  %v1494_v12 = vpop.f32.mrf.mxu1 }
 0x50b   :  { %v1992_v34 = vsel %vm1991_vm15, %v3456_v50, %v1988_v43  ;;  %v2086_v41 = vadd.f32 %v3460_v2, %v2085_v56  ;;  %v1693_v50 = vpop.f32.mrf.mxu2  ;;  %v1967_v43 = vand.u32 2147483648, %v4854_v38  ;;  %vm1961_vm14 = vweird.f32 %v4854_v38 }
 0x50c   :  { %v1997_v5 = vsel %vm1994_vm5, %v1996_v21, %v1992_v34  ;;  %v1908_v59 = vsel %vm1907_vm12, %v4807_v36, %v1904_v23  ;;  %v4861_v39 = vpop.xlane.xlu2 %1380 }
 0x50d   :  { %v2211_v46 = vmul.f32 %v1997_v5, %v1614_v14  ;;  %v1913_v45 = vsel %vm1910_vm13, %v1912_v10, %v1908_v59  ;;  %v2090_v22 = vsel %vm2089_vm2, %v3460_v2, %v2086_v41  ;;  %v2113_v14 = vmul.f32 %v4858_v7, %v2112_v33  ;;  %v2237_v59 = vld [vmem:[%s5566_s4 + $0x58] sm:$0xff] }
 0x50e   :  { %v2205_v54 = vmul.f32 %v1913_v45, %v1538_v6  ;;  %v2095_v61 = vsel %vm2092_vm3, %v2094_v58, %v2090_v22  ;;  %v4904_v37 = vor.u32 1.1754944e-38, %v1967_v43  ;;  %vm4916_vm13 = vcmp.eq.f32.partialorder %v2119_v15, 8.507059e+37  ;;  %2473 = vmatpush.msrb.mxu1 %v2237_v59 }
 0x50f   :  { %3234 = vmatmul.msk.f32.gmra.mxu2 %vm637_vm11, %v2203_v44  ;;  %3242 = vmatmul.msk.f32.gmra.mxu0 %vm637_vm11, %v2211_v46  ;;  %v2218_v31 = vmul.f32 %v2095_v61, %v1693_v50  ;;  %v2114_v63 = vadd.f32 %v4858_v7, %v2113_v14 }
 0x514   :  { %v4897_v5 = vpop.xlane.xlu2 %1410 }
 0x517   :  { %3235 = vmatmul.msk.f32.gmra.mxu2 %vm637_vm11, %v2204_v4 }
 0x51f   :  { %3236 = vmatmul.msk.f32.gmra.mxu2 %vm637_vm11, %v2205_v54 }
 0x520   :  { %v1363_v8 = vpop.xlane.xlu1 %1362 }
 0x521   :  { %3463 = vrcp.f32 %v1363_v8  ;;  %v1939_v11 = vand.u32 2147483648, %v1363_v8  ;;  %v1937_v48 = vand.u32 2147483647, %v1363_v8  ;;  %vm1933_vm4 = vweird.f32 %v1363_v8 }
 0x522   :  { %3465 = vrcp.f32 %v4854_v38 }
 0x523   :  { %v1940_v26 = vor.u32 1.1754944e-38, %v1939_v11  ;;  %vm1938_vm7 = vcmp.eq.f32.partialorder %v1937_v48, 8.507059e+37 }
 0x527   :  { %v3464_v32 = vpop.eup %3463  ;;  %3249 = vmatmul.msk.f32.vlgmr.msra.gmra.mxu2 %vm637_vm11, %v2218_v31 }
 0x528   :  { %v1929_v51 = vmul.f32 %v3464_v32, %v1363_v8  ;;  %v4864_v35 = vpop.xlane.xlu1 %1341  ;;  %v4866_v36 = vpop.xlane.xlu0 %1398  ;;  %vm1934_vm15 = vweird.f32 %v3464_v32 }
 0x529   :  { %3467 = vrcp.f32 %v4864_v35  ;;  %v4874_v19 = vpop.eup %3465  ;;  %vm1935_vm5 = vmor %vm1933_vm4, %vm1934_vm15  ;;  %v1841_v25 = vand.u32 2147483648, %v4864_v35  ;;  %v1839_v47 = vand.u32 2147483647, %v4864_v35  ;;  %vm1835_vm10 = vweird.f32 %v4864_v35 }
 0x52a   :  { %3469 = vrcp.f32 %v4861_v39  ;;  %v1930_v40 = vsub.f32 1.0, %v1929_v51  ;;  %v1957_v42 = vmul.f32 %v4874_v19, %v4854_v38  ;;  %v2107_v23 = vand.u32 2147483648, %v4866_v36  ;;  %vm4938_vm15 = vmor %vm2115_vm6, %vm2116_vm8 }
 0x52b   :  { %3471 = vrcp.f32 %v4866_v36  ;;  %v2105_v17 = vand.u32 2147483647, %v4866_v36  ;;  %v1842_v41 = vor.u32 1.1754944e-38, %v1841_v25  ;;  %vm2101_vm1 = vweird.f32 %v4866_v36 }
 0x52c   :  { %v1931_v57 = vmul.f32 %v3464_v32, %v1930_v40  ;;  %v1958_v16 = vsub.f32 1.0, %v1957_v42  ;;  %vm1840_vm3 = vcmp.eq.f32.partialorder %v1839_v47, 8.507059e+37  ;;  %v2108_v31 = vor.u32 1.1754944e-38, %v2107_v23 }
 0x52d   :  { %v2118_v53 = vsel %vm4938_vm15, %v4858_v7, %v2114_v63  ;;  %vm1962_vm6 = vweird.f32 %v4874_v19  ;;  %v2240_v7 = vld [vmem:[%s5566_s4 + $0x70] sm:$0xff]  ;;  %vm4969_vm8 = vcmp.eq.f32.partialorder %v1965_v1, 8.507059e+37 }
 0x52e   :  { %v1932_v13 = vadd.f32 %v3464_v32, %v1931_v57  ;;  %v1959_v52 = vmul.f32 %v4874_v19, %v1958_v16  ;;  %v2241_v57 = vld [vmem:[%s5566_s4 + $0x78] sm:$0xff] }
 0x52f   :  { %v4877_v28 = vpop.eup %3467  ;;  %v1573_v3 = vpop.f32.mrf.mxu3  ;;  %2555 = vmatpush.msra.mxu3 %v2241_v57 }
 0x530   :  { %v4885_v21 = vpop.eup %3469  ;;  %v1831_v55 = vmul.f32 %v4877_v28, %v4864_v35  ;;  %v1936_v29 = vsel %vm1935_vm5, %v3464_v32, %v1932_v13  ;;  %v4889_v60 = vpop.xlane.xlu1 %1404  ;;  %vm1836_vm9 = vweird.f32 %v4877_v28  ;;  %vm2106_vm5 = vcmp.eq.f32.partialorder %v2105_v17, 8.507059e+37 }
 0x531   :  { %v4891_v24 = vpop.xlane.xlu0 %1365  ;;  %v3472_v34 = vpop.eup %3471  ;;  %v1941_v2 = vsel %vm1938_vm7, %v1940_v26, %v1936_v29  ;;  %3473 = vrcp.f32 %v4889_v60  ;;  %v2013_v62 = vmul.f32 %v4885_v21, %v4861_v39  ;;  %vm1837_vm2 = vmor %vm1835_vm10, %vm1836_vm9  ;;  %v1960_v15 = vadd.f32 %v4874_v19, %v1959_v52  ;;  %2556 = vmatpush.msra.mxu3 %v2240_v7 }
 0x532   :  { %v1832_v44 = vsub.f32 1.0, %v1831_v55  ;;  %v2097_v46 = vmul.f32 %v3472_v34, %v4866_v36  ;;  %v2207_v0 = vmul.f32 %v1941_v2, %v1573_v3  ;;  %3475 = vrcp.f32 %v4891_v24  ;;  %v1617_v7 = vpop.f32.mrf.mxu0 }
 0x533   :  { %3477 = vrcp.f32 %v4897_v5  ;;  %vm2102_vm12 = vweird.f32 %v3472_v34  ;;  %v2014_v45 = vsub.f32 1.0, %v2013_v62  ;;  %v1953_v13 = vand.u32 2147483648, %v4891_v24 }
 0x534   :  { %v1833_v27 = vmul.f32 %v4877_v28, %v1832_v44  ;;  %v2098_v18 = vsub.f32 1.0, %v2097_v46  ;;  %3238 = vmatmul.msk.f32.gmra.mxu3 %vm637_vm11, %v2207_v0  ;;  %vm2103_vm4 = vmor %vm2101_vm1, %vm2102_vm12  ;;  %v1951_v26 = vand.u32 2147483647, %v4891_v24  ;;  %vm2017_vm9 = vweird.f32 %v4861_v39 }
 0x535   :  { %v2021_v55 = vand.u32 2147483647, %v4861_v39  ;;  %v2023_v29 = vand.u32 2147483648, %v4861_v39  ;;  %vm1947_vm10 = vweird.f32 %v4891_v24  ;;  %v2123_v44 = vsel %vm4916_vm13, %v4882_v9, %v2118_v53  ;;  %vm4993_vm12 = vmor %vm1961_vm14, %vm1962_vm6 }
 0x536   :  { %v2099_v4 = vmul.f32 %v3472_v34, %v2098_v18  ;;  %v1834_v56 = vadd.f32 %v4877_v28, %v1833_v27  ;;  %vm2018_vm1 = vweird.f32 %v4885_v21  ;;  %v1954_v9 = vor.u32 1.1754944e-38, %v1953_v13 }
 0x537   :  { %v4921_v10 = vpop.eup %3473  ;;  %v1696_v6 = vpop.f32.mrf.mxu2  ;;  %v1964_v38 = vsel %vm4993_vm12, %v4874_v19, %v1960_v15  ;;  %vm1952_vm14 = vcmp.eq.f32.partialorder %v1951_v26, 8.507059e+37  ;;  %v2135_v52 = vand.u32 2147483648, %v4889_v60  ;;  %vm5035_vm15 = vmor %vm2017_vm9, %vm2018_vm1  ;;  %v5046_v61 = vor.u32 1.1754944e-38, %v2023_v29 }
 0x538   :  { %v4927_v30 = vpop.eup %3475  ;;  %v2125_v54 = vmul.f32 %v4921_v10, %v4889_v60  ;;  %v2100_v22 = vadd.f32 %v3472_v34, %v2099_v4  ;;  %v4931_v58 = vpop.xlane.xlu1 %1407  ;;  %v1838_v8 = vsel %vm1837_vm2, %v4877_v28, %v1834_v56  ;;  %v2015_v28 = vmul.f32 %v4885_v21, %v2014_v45  ;;  %v2236_v45 = vld [vmem:[%s5566_s4 + $0x50] sm:$0xff] }
 0x539   :  { %v1943_v50 = vmul.f32 %v4927_v30, %v4891_v24  ;;  %3479 = vrcp.f32 %v4931_v58  ;;  %v4946_v32 = vpop.xlane.xlu0 %1377  ;;  %v1843_v51 = vsel %vm1840_vm3, %v1842_v41, %v1838_v8  ;;  %v4952_v36 = vpop.eup %3477  ;;  %vm1948_vm7 = vweird.f32 %v4927_v30  ;;  %2474 = vmatpush.msrb.mxu1 %v2236_v45 }
 0x53a   :  { %v2104_v35 = vsel %vm2103_vm4, %v3472_v34, %v2100_v22  ;;  %3481 = vrcp.f32 %v4946_v32  ;;  %v2126_v40 = vsub.f32 1.0, %v2125_v54  ;;  %v2200_v33 = vmul.f32 %v1843_v51, %v1494_v12  ;;  %vm1949_vm13 = vmor %vm1947_vm10, %vm1948_vm7  ;;  %v5039_v54 = vpop.xlane.xlu2 %1389  ;;  %v1497_v29 = vpop.f32.mrf.mxu1 }
 0x53b   :  { %v1944_v11 = vsub.f32 1.0, %v1943_v50  ;;  %v2109_v49 = vsel %vm2106_vm5, %v2108_v31, %v2104_v35  ;;  %v4978_v34 = vmul.f32 %v4952_v36, %v4897_v5  ;;  %v5009_v62 = vadd.f32 %v4885_v21, %v2015_v28 }
 0x53c   :  { %v2219_v48 = vmul.f32 %v2109_v49, %v1696_v6  ;;  %3231 = vmatmul.msk.f32.gmra.mxu1 %vm637_vm11, %v2200_v33  ;;  %v2127_v0 = vmul.f32 %v4921_v10, %v2126_v40  ;;  %vm2130_vm2 = vweird.f32 %v4921_v10  ;;  %vm2129_vm3 = vweird.f32 %v4889_v60 }
 0x53d   :  { %v1945_v42 = vmul.f32 %v4927_v30, %v1944_v11  ;;  %v2154_v23 = vsub.f32 1.0, %v4978_v34  ;;  %v2133_v6 = vand.u32 2147483647, %v4889_v60  ;;  %v2009_v8 = vand.u32 2147483648, %v4946_v32  ;;  %vm5057_vm5 = vmor %vm2129_vm3, %vm2130_vm2 }
 0x53e   :  { %3250 = vmatmul.msk.f32.gmra.mxu2 %vm637_vm11, %v2219_v48  ;;  %v2128_v56 = vadd.f32 %v4921_v10, %v2127_v0  ;;  %v2007_v39 = vand.u32 2147483647, %v4946_v32  ;;  %v1969_v50 = vsel %vm4969_vm8, %v4904_v37, %v1964_v38  ;;  %v2020_v51 = vsel %vm5035_vm15, %v4885_v21, %v5009_v62 }
 0x53f   :  { %v4982_v3 = vpop.eup %3479  ;;  %v1576_v2 = vpop.f32.mrf.mxu3  ;;  %v1946_v14 = vadd.f32 %v4927_v30, %v1945_v42  ;;  %vm5065_vm6 = vcmp.eq.f32.partialorder %v2021_v55, 8.507059e+37  ;;  %vm2003_vm7 = vweird.f32 %v4946_v32  ;;  %vm2134_vm9 = vcmp.eq.f32.partialorder %v2133_v6, 8.507059e+37 }
 0x540   :  { %v1699_v1 = vpop.f32.mrf.mxu2  ;;  %v4998_v16 = vpop.eup %3481  ;;  %v2139_v24 = vmul.f32 %v4982_v3, %v4931_v58  ;;  %v2132_v60 = vsel %vm5057_vm5, %v4921_v10, %v2128_v56  ;;  %v2136_v11 = vor.u32 1.1754944e-38, %v2135_v52  ;;  %v2010_v49 = vor.u32 1.1754944e-38, %v2009_v8 }
 0x541   :  { %v1999_v25 = vmul.f32 %v4998_v16, %v4946_v32  ;;  %v1950_v27 = vsel %vm1949_vm13, %v4927_v30, %v1946_v14  ;;  %v5014_v18 = vpop.xlane.xlu1 %1386  ;;  %v5016_v47 = vpop.xlane.xlu0 %1344  ;;  %v2220_v41 = vmul.f32 %v2123_v44, %v1699_v1  ;;  %vm2004_vm4 = vweird.f32 %v4998_v16 }
 0x542   :  { %v1955_v63 = vsel %vm1952_vm14, %v1954_v9, %v1950_v27  ;;  %3483 = vrcp.f32 %v5016_v47  ;;  %v2140_v19 = vsub.f32 1.0, %v2139_v24  ;;  %vm5078_vm8 = vmor %vm2003_vm7, %vm2004_vm4  ;;  %v2155_v32 = vmul.f32 %v4952_v36, %v2154_v23 }
 0x543   :  { %v2000_v4 = vsub.f32 1.0, %v1999_v25  ;;  %v2208_v17 = vmul.f32 %v1955_v63, %v1576_v2  ;;  %3485 = vrcp.f32 %v5014_v18  ;;  %vm2143_vm10 = vweird.f32 %v4931_v58 }
 0x544   :  { %v2141_v12 = vmul.f32 %v4982_v3, %v2140_v19  ;;  %3487 = vrcp.f32 %v5039_v54  ;;  %vm2008_vm12 = vcmp.eq.f32.partialorder %v2007_v39, 8.507059e+37  ;;  %v2137_v13 = vsel %vm2134_vm9, %v2136_v11, %v2132_v60 }
 0x545   :  { %v2001_v22 = vmul.f32 %v4998_v16, %v2000_v4  ;;  %3239 = vmatmul.msk.f32.gmra.mxu3 %vm637_vm11, %v2208_v17  ;;  %vm2144_vm1 = vweird.f32 %v4982_v3  ;;  %v1855_v34 = vand.u32 2147483648, %v5016_v47  ;;  %v2149_v1 = vand.u32 2147483648, %v4931_v58 }
 0x546   :  { %3251 = vmatmul.msk.f32.gmra.mxu2 %vm637_vm11, %v2220_v41  ;;  %v2142_v55 = vadd.f32 %v4982_v3, %v2141_v12  ;;  %v2147_v46 = vand.u32 2147483647, %v4931_v58  ;;  %v1853_v0 = vand.u32 2147483647, %v5016_v47  ;;  %vm5113_vm14 = vmor %vm2143_vm10, %vm2144_vm1  ;;  %vm2157_vm2 = vweird.f32 %v4897_v5  ;;  %v1620_v41 = vpop.f32.mrf.mxu0 }
 0x547   :  { %v2002_v37 = vadd.f32 %v4998_v16, %v2001_v22  ;;  %v1579_v53 = vpop.f32.mrf.mxu3  ;;  %v2163_v38 = vand.u32 2147483648, %v4897_v5  ;;  %vm1849_vm3 = vweird.f32 %v5016_v47  ;;  %vm2158_vm15 = vweird.f32 %v4952_v36 }
 0x548   :  { %v3484_v40 = vpop.eup %3483  ;;  %v1702_v48 = vpop.f32.mrf.mxu2  ;;  %v2209_v42 = vmul.f32 %v1969_v50, %v1579_v53  ;;  %v2146_v25 = vsel %vm5113_vm14, %v4982_v3, %v2142_v55  ;;  %v1856_v58 = vor.u32 1.1754944e-38, %v1855_v34  ;;  %v2150_v63 = vor.u32 1.1754944e-38, %v2149_v1 }
 0x549   :  { %v1845_v57 = vmul.f32 %v3484_v40, %v5016_v47  ;;  %v5084_v10 = vpop.xlane.xlu0 %1383  ;;  %v2006_v33 = vsel %vm5078_vm8, %v4998_v16, %v2002_v37  ;;  %v5092_v15 = vpop.eup %3485  ;;  %v2221_v2 = vmul.f32 %v2137_v13, %v1702_v48  ;;  %vm1850_vm13 = vweird.f32 %v3484_v40 }
 0x54a   :  { %3489 = vrcp.f32 %v5084_v10  ;;  %v5094_v26 = vpop.xlane.xlu1 %1416  ;;  %v2011_v43 = vsel %vm2008_vm12, %v2010_v49, %v2006_v33  ;;  %v5102_v16 = vpop.eup %3487  ;;  %v2041_v24 = vmul.f32 %v5092_v15, %v5014_v18  ;;  %vm1851_vm4 = vmor %vm1849_vm3, %vm1850_vm13  ;;  %v2025_v19 = vsel %vm5065_vm6, %v5046_v61, %v2020_v51 }
 0x54b   :  { %v1846_v28 = vsub.f32 1.0, %v1845_v57  ;;  %v2212_v14 = vmul.f32 %v2011_v43, %v1617_v7  ;;  %3491 = vrcp.f32 %v5094_v26  ;;  %v2156_v4 = vadd.f32 %v4952_v36, %v2155_v32  ;;  %vm5137_vm6 = vmor %vm2157_vm2, %vm2158_vm15  ;;  %v1652_v39 = vpop.f32.mrf.mxu1 }
 0x54c   :  { %vm2148_vm5 = vcmp.eq.f32.partialorder %v2147_v46, 8.507059e+37  ;;  %vm1854_vm7 = vcmp.eq.f32.partialorder %v1853_v0, 8.507059e+37  ;;  %v2042_v56 = vsub.f32 1.0, %v2041_v24  ;;  %v2161_v8 = vand.u32 2147483647, %v4897_v5 }
 0x54d   :  { %v1847_v44 = vmul.f32 %v3484_v40, %v1846_v28  ;;  %3240 = vmatmul.msk.f32.gmra.mxu3 %vm637_vm11, %v2209_v42  ;;  %3243 = vmatmul.msk.f32.gmra.mxu0 %vm637_vm11, %v2212_v14  ;;  %v2151_v59 = vsel %vm2148_vm5, %v2150_v63, %v2146_v25  ;;  %v2037_v50 = vand.u32 2147483648, %v5084_v10  ;;  %v2213_v31 = vmul.f32 %v2025_v19, %v1620_v41 }
 0x54e   :  { %3252 = vmatmul.msk.f32.gmra.mxu2 %vm637_vm11, %v2221_v2  ;;  %v2160_v51 = vsel %vm5137_vm6, %v4952_v36, %v2156_v4  ;;  %v2055_v35 = vmul.f32 %v5102_v16, %v5039_v54  ;;  %v2035_v53 = vand.u32 2147483647, %v5084_v10  ;;  %v2043_v5 = vmul.f32 %v5092_v15, %v2042_v56 }
 0x54f   :  { %v1734_v62 = vpop.f32.mrf.mxu3  ;;  %v1848_v27 = vadd.f32 %v3484_v40, %v1847_v44  ;;  %v2164_v60 = vor.u32 1.1754944e-38, %v2163_v38  ;;  %vm2031_vm9 = vweird.f32 %v5084_v10  ;;  %vm2162_vm10 = vcmp.eq.f32.partialorder %v2161_v8, 8.507059e+37 }
 0x550   :  { %v3490_v23 = vpop.eup %3489  ;;  %v2222_v52 = vmul.f32 %v2151_v59, %v1734_v62  ;;  %v2038_v11 = vor.u32 1.1754944e-38, %v2037_v50  ;;  %v2056_v49 = vsub.f32 1.0, %v2055_v35  ;;  %vm2036_vm1 = vcmp.eq.f32.partialorder %v2035_v53, 8.507059e+37 }
 0x551   :  { %v2027_v47 = vmul.f32 %v3490_v23, %v5084_v10  ;;  %v5130_v17 = vpop.xlane.xlu0 %1413  ;;  %v1852_v3 = vsel %vm1851_vm4, %v3484_v40, %v1848_v27  ;;  %v5142_v61 = vpop.eup %3491  ;;  %vm2032_vm8 = vweird.f32 %v3490_v23  ;;  %v2165_v32 = vsel %vm2162_vm10, %v2164_v60, %v2160_v51 }
 0x552   :  { %3493 = vrcp.f32 %v5130_v17  ;;  %v1857_v45 = vsel %vm1854_vm7, %v1856_v58, %v1852_v3  ;;  %v2181_v12 = vmul.f32 %v5142_v61, %v5094_v26  ;;  %vm2033_vm12 = vmor %vm2031_vm9, %vm2032_vm8  ;;  %v2044_v7 = vadd.f32 %v5092_v15, %v2043_v5 }
 0x553   :  { %v2028_v6 = vsub.f32 1.0, %v2027_v47  ;;  %v2201_v30 = vmul.f32 %v1857_v45, %v1497_v29  ;;  %vm2046_vm13 = vweird.f32 %v5092_v15  ;;  %vm2045_vm14 = vweird.f32 %v5014_v18  ;;  %v1655_v1 = vpop.f32.mrf.mxu1 }
 0x554   :  { %v2182_v10 = vsub.f32 1.0, %v2181_v12  ;;  %v2051_v55 = vand.u32 2147483648, %v5014_v18  ;;  %v2177_v29 = vand.u32 2147483648, %v5130_v17  ;;  %v2049_v34 = vand.u32 2147483647, %v5014_v18  ;;  %vm5173_vm3 = vmor %vm2045_vm14, %vm2046_vm13 }
 0x555   :  { %v2029_v37 = vmul.f32 %v3490_v23, %v2028_v6  ;;  %3232 = vmatmul.msk.f32.gmra.mxu1 %vm637_vm11, %v2201_v30  ;;  %3253 = vmatmul.msk.f32.vlgmr.msra.gmra.mxu3 %vm637_vm11, %v2222_v52  ;;  %v2175_v14 = vand.u32 2147483647, %v5130_v17  ;;  %v2057_v46 = vmul.f32 %v5102_v16, %v2056_v49  ;;  %v2048_v18 = vsel %vm5173_vm3, %v5092_v15, %v2044_v7 }
 0x556   :  { %3244 = vmatmul.msk.f32.gmra.mxu0 %vm637_vm11, %v2213_v31  ;;  %vm2171_vm15 = vweird.f32 %v5130_v17  ;;  %v2183_v9 = vmul.f32 %v5142_v61, %v2182_v10  ;;  %v2052_v62 = vor.u32 1.1754944e-38, %v2051_v55  ;;  %vm2060_vm4 = vweird.f32 %v5102_v16  ;;  %v5217_v10 = vld [vmem:[%s5567_s5] ss:$0 sm:$0xff] }
 0x557   :  { %v2030_v36 = vadd.f32 %v3490_v23, %v2029_v37  ;;  %v1737_v40 = vpop.f32.mrf.mxu3  ;;  %v2178_v25 = vor.u32 1.1754944e-38, %v2177_v29  ;;  %vm2050_vm7 = vcmp.eq.f32.partialorder %v2049_v34, 8.507059e+37  ;;  %vm2176_vm6 = vcmp.eq.f32.partialorder %v2175_v14, 8.507059e+37  ;;  %v3513_v55 = vld [vmem:[#allocation2] sm:$0xff] }
 0x558   :  { %v3494_v21 = vpop.eup %3493  ;;  %v2223_v43 = vmul.f32 %v2165_v32, %v1737_v40  ;;  %v2053_v58 = vsel %vm2050_vm7, %v2052_v62, %v2048_v18  ;;  %v2058_v15 = vadd.f32 %v5102_v16, %v2057_v46  ;;  %vm2186_vm8 = vweird.f32 %v5142_v61  ;;  %v3514_v62 = vld [vmem:[#allocation2 + $0x8] sm:$0xff] }
 0x559   :  { %v2034_v57 = vsel %vm2033_vm12, %v3490_v23, %v2030_v36  ;;  %v2167_v48 = vmul.f32 %v3494_v21, %v5130_v17  ;;  %v5159_v33 = vpop.xlane.xlu0 %1392  ;;  %vm2172_vm2 = vweird.f32 %v3494_v21  ;;  %v2215_v19 = vmul.f32 %v2053_v58, %v1655_v1  ;;  %v2271_v36 = vpop.f32.mrf.mxu0 }
 0x55a   :  { %v2039_v13 = vsel %vm2036_vm1, %v2038_v11, %v2034_v57  ;;  %3495 = vrcp.f32 %v5159_v33  ;;  %vm2173_vm5 = vmor %vm2171_vm15, %vm2172_vm2  ;;  %v2184_v17 = vadd.f32 %v5142_v61, %v2183_v9  ;;  %vm2059_vm9 = vweird.f32 %v5039_v54 }
 0x55b   :  { %v2214_v28 = vmul.f32 %v2039_v13, %v1652_v39  ;;  %v2168_v42 = vsub.f32 1.0, %v2167_v48  ;;  %v2065_v3 = vand.u32 2147483648, %v5039_v54  ;;  %v2191_v56 = vand.u32 2147483648, %v5094_v26  ;;  %vm5193_vm10 = vmor %vm2059_vm9, %vm2060_vm4  ;;  %v1658_v22 = vpop.f32.mrf.mxu1 }
 0x55c   :  { %v2063_v45 = vand.u32 2147483647, %v5039_v54  ;;  %vm2185_vm12 = vweird.f32 %v5094_v26  ;;  %v2189_v6 = vand.u32 2147483647, %v5094_v26  ;;  %v2062_v52 = vsel %vm5193_vm10, %v5102_v16, %v2058_v15 }
 0x55d   :  { %3245 = vmatmul.msk.f32.vlgmr.msrb.gmra.mxu1 %vm637_vm11, %v2214_v28  ;;  %3254 = vmatmul.msk.f32.gmra.mxu3 %vm637_vm11, %v2223_v43  ;;  %v2169_v2 = vmul.f32 %v3494_v21, %v2168_v42  ;;  %vm2187_vm1 = vmor %vm2185_vm12, %vm2186_vm8  ;;  %v2066_v54 = vor.u32 1.1754944e-38, %v2065_v3  ;;  %v2192_v39 = vor.u32 1.1754944e-38, %v2191_v56  ;;  %v2079_v26 = vand.u32 2147483648, %v5159_v33 }
 0x55e   :  { %v2188_v30 = vsel %vm2187_vm1, %v5142_v61, %v2184_v17  ;;  %vm2064_vm13 = vcmp.eq.f32.partialorder %v2063_v45, 8.507059e+37  ;;  %vm2190_vm2 = vcmp.eq.f32.partialorder %v2189_v6, 8.507059e+37  ;;  %vm2073_vm3 = vweird.f32 %v5159_v33  ;;  %v3515_v45 = vld [vmem:[#allocation2 + $0x10] sm:$0xff] }
 0x55f   :  { %v1740_v0 = vpop.f32.mrf.mxu3  ;;  %v2170_v24 = vadd.f32 %v3494_v21, %v2169_v2  ;;  %v2067_v31 = vsel %vm2064_vm13, %v2066_v54, %v2062_v52  ;;  %v2193_v51 = vsel %vm2190_vm2, %v2192_v39, %v2188_v30  ;;  %v2077_v37 = vand.u32 2147483647, %v5159_v33 }
 0x560   :  { %v3496_v38 = vpop.eup %3495  ;;  %v2216_v35 = vmul.f32 %v2067_v31, %v1658_v22  ;;  %v2080_v53 = vor.u32 1.1754944e-38, %v2079_v26 }
 0x561   :  { %v2069_v27 = vmul.f32 %v3496_v38, %v5159_v33  ;;  %v2174_v23 = vsel %vm2173_vm5, %v3494_v21, %v2170_v24  ;;  %vm2074_vm14 = vweird.f32 %v3496_v38  ;;  %vm2078_vm4 = vcmp.eq.f32.partialorder %v2077_v37, 8.507059e+37  ;;  %v2274_v40 = vpop.f32.mrf.mxu0 }
 0x562   :  { %v2179_v63 = vsel %vm2176_vm6, %v2178_v25, %v2174_v23  ;;  %vm2075_vm15 = vmor %vm2073_vm3, %vm2074_vm14 }
 0x563   :  { %v2070_v4 = vsub.f32 1.0, %v2069_v27  ;;  %v2224_v47 = vmul.f32 %v2179_v63, %v1740_v0  ;;  %v1661_v60 = vpop.f32.mrf.mxu1 }
 0x565   :  { %v2071_v41 = vmul.f32 %v3496_v38, %v2070_v4  ;;  %3246 = vmatmul.msk.f32.gmra.mxu1 %vm637_vm11, %v2215_v19  ;;  %3255 = vmatmul.msk.f32.gmra.mxu3 %vm637_vm11, %v2224_v47 }
 0x567   :  { %v1743_v8 = vpop.f32.mrf.mxu3  ;;  %v2072_v50 = vadd.f32 %v3496_v38, %v2071_v41 }
 0x568   :  { %v2225_v16 = vmul.f32 %v2193_v51, %v1743_v8  ;;  %v3516_v51 = vld [vmem:[#allocation2 + $0x18] sm:$0xff] }
 0x569   :  { %v2076_v61 = vsel %vm2075_vm15, %v3496_v38, %v2072_v50  ;;  %v2277_v32 = vpop.f32.mrf.mxu0 }
 0x56a   :  { %v2081_v5 = vsel %vm2078_vm4, %v2080_v53, %v2076_v61 }
 0x56b   :  { %v2217_v12 = vmul.f32 %v2081_v5, %v1661_v60  ;;  %v2312_v14 = vpop.f32.mrf.mxu1  ;;  %v3517_v60 = vld [vmem:[#allocation2 + $0x20] sm:$0xff] }
 0x56d   :  { %3247 = vmatmul.msk.f32.gmra.mxu1 %vm637_vm11, %v2216_v35  ;;  %3256 = vmatmul.msk.f32.gmra.mxu3 %vm637_vm11, %v2225_v16 }
 0x570   :  { %v2394_v2 = vpop.f32.mrf.mxu3 }
 0x571   :  { %v2280_v57 = vpop.f32.mrf.mxu0  ;;  %v2574_v31 = vadd.f32 %v2394_v2, %v2312_v14 }
 0x575   :  { %3248 = vmatmul.msk.f32.gmra.mxu1 %vm637_vm11, %v2217_v12 }
 0x576   :  { %v2315_v24 = vpop.f32.mrf.mxu1 }
 0x579   :  { %v2435_v13 = vpop.f32.mrf.mxu0 }
 0x58a   :  { %v2353_v21 = vpop.f32.mrf.mxu2 }
 0x58b   :  { %v2570_v33 = vadd.f32 %v2353_v21, %v2271_v36 }
 0x58c   :  { %v2438_v44 = vpop.f32.mrf.mxu0 }
 0x58d   :  { %v2578_v7 = vadd.f32 %v2570_v33, %v2435_v13 }
 0x592   :  { %v2356_v11 = vpop.f32.mrf.mxu2 }
 0x593   :  { %v2571_v1 = vadd.f32 %v2356_v11, %v2274_v40 }
 0x595   :  { %v2579_v18 = vadd.f32 %v2571_v1, %v2438_v44 }
 0x59a   :  { %v2359_v49 = vpop.f32.mrf.mxu2 }
 0x59b   :  { %v2572_v58 = vadd.f32 %v2359_v49, %v2277_v32 }
 0x5a2   :  { %v2362_v48 = vpop.f32.mrf.mxu2 }
 0x5a3   :  { %v2573_v56 = vadd.f32 %v2362_v48, %v2280_v57  ;;  %v3518_v48 = vld [vmem:[#allocation2 + $0x28] sm:$0xff] }
 0x5aa   :  { %v2517_v28 = vpop.f32.mrf.mxu2 }
 0x5ab   :  { %v2586_v42 = vadd.f32 %v2578_v7, %v2517_v28 }
 0x5ad   :  { %v2598_v43 = vadd.f32 %v5217_v10, %v2586_v42 }
 0x5af   :  { %v5220_v29 = vadd.f32 %v3513_v55, %v2598_v43 }
 0x5b1   :  { %v2616_v34 = vsel %vm109_vm0, %v5220_v29, 0.0 }
 0x5b2   :  { %2617 = vadd.xlane.f32.xlu2 %v2616_v34  ;;  %v3519_v34 = vld [vmem:[#allocation2 + $0x30] sm:$0xff] }
 0x5b7   :  { %v2397_v46 = vpop.f32.mrf.mxu3 }
 0x5b8   :  { %v2575_v5 = vadd.f32 %v2397_v46, %v2315_v24 }
 0x5b9   :  { %v2318_v15 = vpop.f32.mrf.mxu1 }
 0x5c1   :  { %v2520_v0 = vpop.f32.mrf.mxu2 }
 0x5c2   :  { %v2587_v9 = vadd.f32 %v2579_v18, %v2520_v0 }
 0x5c4   :  { %v2599_v38 = vadd.f32 %v5217_v10, %v2587_v9 }
 0x5c6   :  { %v5225_v25 = vadd.f32 %v3514_v62, %v2599_v38 }
 0x5c8   :  { %v2619_v27 = vsel %vm109_vm0, %v5225_v25, 0.0  ;;  %v2400_v23 = vpop.f32.mrf.mxu3 }
 0x5c9   :  { %2620 = vadd.xlane.f32.xlu1 %v2619_v27  ;;  %v2523_v63 = vpop.f32.mrf.mxu2  ;;  %v2576_v57 = vadd.f32 %v2400_v23, %v2318_v15  ;;  %v3520_v23 = vld [vmem:[#allocation2 + $0x38] sm:$0xff] }
 0x5ca   :  { %v2441_v19 = vpop.f32.mrf.mxu0 }
 0x5cb   :  { %v2580_v4 = vadd.f32 %v2572_v58, %v2441_v19 }
 0x5cd   :  { %v2588_v47 = vadd.f32 %v2580_v4, %v2523_v63 }
 0x5cf   :  { %v2600_v17 = vadd.f32 %v5217_v10, %v2588_v47 }
 0x5d0   :  { %v2403_v3 = vpop.f32.mrf.mxu3 }
 0x5d1   :  { %v5230_v41 = vadd.f32 %v3515_v45, %v2600_v17  ;;  %v2526_v54 = vpop.f32.mrf.mxu2 }
 0x5d2   :  { %v2321_v59 = vpop.f32.mrf.mxu1 }
 0x5d3   :  { %v2577_v6 = vadd.f32 %v2403_v3, %v2321_v59  ;;  %v2444_v52 = vpop.f32.mrf.mxu0  ;;  %v2622_v22 = vsel %vm109_vm0, %v5230_v41, 0.0 }
 0x5d4   :  { %v2581_v30 = vadd.f32 %v2573_v56, %v2444_v52  ;;  %2623 = vadd.xlane.f32.xlu0 %v2622_v22 }
 0x5d6   :  { %v2589_v8 = vadd.f32 %v2581_v30, %v2526_v54 }
 0x5d8   :  { %v2601_v39 = vadd.f32 %v5217_v10, %v2589_v8  ;;  %v2558_v50 = vpop.f32.mrf.mxu3 }
 0x5da   :  { %v2476_v26 = vpop.f32.mrf.mxu1  ;;  %v5235_v35 = vadd.f32 %v3516_v51, %v2601_v39 }
 0x5db   :  { %v2582_v37 = vadd.f32 %v2574_v31, %v2476_v26 }
 0x5dc   :  { %v2625_v16 = vsel %vm109_vm0, %v5235_v35, 0.0 }
 0x5dd   :  { %v2590_v61 = vadd.f32 %v2582_v37, %v2558_v50  ;;  %2626 = vadd.xlane.f32.xlu2 %v2625_v16 }
 0x5df   :  { %v2602_v53 = vadd.f32 %v5217_v10, %v2590_v61 }
 0x5e0   :  { %v2561_v36 = vpop.f32.mrf.mxu3 }
 0x5e1   :  { %v5240_v12 = vadd.f32 %v3517_v60, %v2602_v53 }
 0x5e2   :  { %v2479_v40 = vpop.f32.mrf.mxu1 }
 0x5e3   :  { %v2583_v21 = vadd.f32 %v2575_v5, %v2479_v40  ;;  %v2628_v11 = vsel %vm109_vm0, %v5240_v12, 0.0 }
 0x5e4   :  { %2629 = vadd.xlane.f32.xlu1 %v2628_v11  ;;  %v2828_v11 = vld [vmem:[%s5570_s8 + $0x70] sm:$0xff] }
 0x5e5   :  { %v2591_v32 = vadd.f32 %v2583_v21, %v2561_v36  ;;  %2868 = vmatpush.msra.mxu0 %v2828_v11 }
 0x5e7   :  { %v2603_v49 = vadd.f32 %v5217_v10, %v2591_v32  ;;  %v2829_v32 = vld [vmem:[%s5570_s8 + $0x78] sm:$0xff] }
 0x5e8   :  { %v2564_v42 = vpop.f32.mrf.mxu3  ;;  %2909 = vmatpush.msra.mxu1 %v2829_v32 }
 0x5e9   :  { %v5245_v33 = vadd.f32 %v3518_v48, %v2603_v49  ;;  %v2826_v49 = vld [vmem:[%s5570_s8 + $0x60] sm:$0xff]  ;;  %v2824_v48 = vld [vmem:[%s5570_s8 + $0x50] sm:$0xff] }
 0x5ea   :  { %v2482_v13 = vpop.f32.mrf.mxu1  ;;  %2869 = vmatpush.msra.mxu0 %v2826_v49 }
 0x5eb   :  { %v2584_v7 = vadd.f32 %v2576_v57, %v2482_v13  ;;  %v2631_v28 = vsel %vm109_vm0, %v5245_v33, 0.0  ;;  %v2827_v57 = vld [vmem:[%s5570_s8 + $0x68] sm:$0xff]  ;;  %v2825_v13 = vld [vmem:[%s5570_s8 + $0x58] sm:$0xff] }
 0x5ec   :  { %2632 = vadd.xlane.f32.xlu0 %v2631_v28  ;;  %2910 = vmatpush.msra.mxu1 %v2827_v57  ;;  %v2823_v28 = vld [vmem:[%s5570_s8 + $0x48] sm:$0xff] }
 0x5ed   :  { %v2592_v43 = vadd.f32 %v2584_v7, %v2564_v42  ;;  %v2822_v7 = vld [vmem:[%s5570_s8 + $0x40] sm:$0xff]  ;;  %2870 = vmatpush.msra.mxu0 %v2824_v48 }
 0x5ee   :  { %2911 = vmatpush.msra.mxu1 %v2825_v13 }
 0x5ef   :  { %v2604_v55 = vadd.f32 %v5217_v10, %v2592_v43  ;;  %2871 = vmatpush.msra.mxu0 %v2822_v7  ;;  %v2820_v43 = vld [vmem:[%s5570_s8 + $0x30] sm:$0xff] }
 0x5f0   :  { %v2567_v0 = vpop.f32.mrf.mxu3  ;;  %2912 = vmatpush.msra.mxu1 %v2823_v28 }
 0x5f1   :  { %v5250_v2 = vadd.f32 %v3519_v34, %v2604_v55  ;;  %v2821_v55 = vld [vmem:[%s5570_s8 + $0x38] sm:$0xff]  ;;  %2872 = vmatpush.msra.mxu0 %v2820_v43 }
 0x5f2   :  { %v2485_v1 = vpop.f32.mrf.mxu1  ;;  %2913 = vmatpush.msra.mxu1 %v2821_v55 }
 0x5f3   :  { %v2634_v14 = vsel %vm109_vm0, %v5250_v2, 0.0  ;;  %v2585_v44 = vadd.f32 %v2577_v6, %v2485_v1  ;;  %v2819_v1 = vld [vmem:[%s5570_s8 + $0x28] sm:$0xff] }
 0x5f4   :  { %2635 = vadd.xlane.f32.xlu1 %v2634_v14  ;;  %v2818_v14 = vld [vmem:[%s5570_s8 + $0x20] sm:$0xff]  ;;  %2914 = vmatpush.msra.mxu1 %v2819_v1 }
 0x5f5   :  { %v2593_v24 = vadd.f32 %v2585_v44, %v2567_v0  ;;  %2873 = vmatpush.msra.mxu0 %v2818_v14  ;;  %v2814_v0 = vld [vmem:[%s5570_s8] sm:$0xff] }
 0x5f7   :  { %v2605_v62 = vadd.f32 %v5217_v10, %v2593_v24  ;;  %v2815_v24 = vld [vmem:[%s5570_s8 + $0x8] sm:$0xff] }
 0x5f9   :  { %v5262_v58 = vadd.f32 %v3520_v23, %v2605_v62 }
 0x5fb   :  { %v2637_v15 = vsel %vm109_vm0, %v5262_v58, 0.0 }
 0x625   :  { %v2618_v46 = vpop.xlane.xlu2 %2617 }
 0x626   :  { %v2640_v18 = vmul.f32 %v2618_v46, %v3748_v20  ;;  %v2816_v46 = vld [vmem:[%s5570_s8 + $0x10] sm:$0xff] }
 0x627   :  { %2874 = vmatpush.msra.mxu0 %v2816_v46 }
 0x628   :  { %v5256_v9 = vsub.f32 %v5220_v29, %v2640_v18  ;;  %v2817_v18 = vld [vmem:[%s5570_s8 + $0x18] sm:$0xff] }
 0x629   :  { %2915 = vmatpush.msra.mxu1 %v2817_v18  ;;  %2875 = vmatpush.msra.mxu0 %v2814_v0 }
 0x62a   :  { %v2656_v38 = vmul.f32 %v5256_v9, %v5256_v9 }
 0x62b   :  { %2916 = vmatpush.msra.mxu1 %v2815_v24 }
 0x62c   :  { %v2664_v27 = vsel %vm109_vm0, %v2656_v38, 0.0 }
 0x62d   :  { %2665 = vadd.xlane.f32.xlu2 %v2664_v27 }
 0x635   :  { %2638 = vadd.xlane.f32.xlu2 %v2637_v15 }
 0x63c   :  { %v2621_v63 = vpop.xlane.xlu1 %2620 }
 0x63d   :  { %v2641_v19 = vmul.f32 %v2621_v63, %v3748_v20 }
 0x63f   :  { %v5268_v4 = vsub.f32 %v5225_v25, %v2641_v19 }
 0x641   :  { %v2657_v47 = vmul.f32 %v5268_v4, %v5268_v4 }
 0x643   :  { %v2667_v10 = vsel %vm109_vm0, %v2657_v47, 0.0 }
 0x644   :  { %2668 = vadd.xlane.f32.xlu0 %v2667_v10 }
 0x647   :  { %v2624_v17 = vpop.xlane.xlu0 %2623 }
 0x648   :  { %v2642_v3 = vmul.f32 %v2624_v17, %v3748_v20 }
 0x64a   :  { %v5275_v56 = vsub.f32 %v5230_v41, %v2642_v3 }
 0x64c   :  { %v2658_v59 = vmul.f32 %v5275_v56, %v5275_v56 }
 0x64e   :  { %v2670_v45 = vsel %vm109_vm0, %v2658_v59, 0.0  ;;  %v5367_v59 = vld [vmem:[%s5568_s6] ss:$0 sm:$0xff] }
 0x64f   :  { %2671 = vadd.xlane.f32.xlu1 %v2670_v45 }
 0x650   :  { %v2627_v6 = vpop.xlane.xlu2 %2626 }
 0x651   :  { %v2643_v52 = vmul.f32 %v2627_v6, %v3748_v20  ;;  %v5369_v6 = vld [vmem:[#allocation8] ss:$0 sm:$0xff] }
 0x653   :  { %v5282_v30 = vsub.f32 %v5235_v35, %v2643_v52 }
 0x655   :  { %v2659_v22 = vmul.f32 %v5282_v30, %v5282_v30 }
 0x657   :  { %v2630_v54 = vpop.xlane.xlu1 %2629  ;;  %v2673_v8 = vsel %vm109_vm0, %v2659_v22, 0.0 }
 0x658   :  { %v2644_v39 = vmul.f32 %v2630_v54, %v3748_v20  ;;  %2674 = vadd.xlane.f32.xlu0 %v2673_v8 }
 0x65a   :  { %v5289_v50 = vsub.f32 %v5240_v12, %v2644_v39 }
 0x65c   :  { %v2660_v31 = vmul.f32 %v5289_v50, %v5289_v50 }
 0x65e   :  { %v2676_v26 = vsel %vm109_vm0, %v2660_v31, 0.0 }
 0x65f   :  { %v2633_v51 = vpop.xlane.xlu0 %2632  ;;  %2677 = vadd.xlane.f32.xlu2 %v2676_v26 }
 0x660   :  { %v2645_v37 = vmul.f32 %v2633_v51, %v3748_v20 }
 0x662   :  { %v5296_v16 = vsub.f32 %v5245_v33, %v2645_v37 }
 0x664   :  { %v2661_v61 = vmul.f32 %v5296_v16, %v5296_v16 }
 0x666   :  { %v2679_v53 = vsel %vm109_vm0, %v2661_v61, 0.0 }
 0x667   :  { %2680 = vadd.xlane.f32.xlu1 %v2679_v53  ;;  %v2636_v5 = vpop.xlane.xlu1 %2635 }
 0x668   :  { %v2646_v60 = vmul.f32 %v2636_v5, %v3748_v20 }
 0x66a   :  { %v5303_v36 = vsub.f32 %v5250_v2, %v2646_v60 }
 0x66c   :  { %v2662_v40 = vmul.f32 %v5303_v36, %v5303_v36 }
 0x66e   :  { %v2682_v21 = vsel %vm109_vm0, %v2662_v40, 0.0 }
 0x66f   :  { %2683 = vadd.xlane.f32.xlu0 %v2682_v21 }
 0x6a0   :  { %v2666_v42 = vpop.xlane.xlu2 %2665 }
 0x6a1   :  { %v2688_v34 = vmul.f32 %v2666_v42, %v3748_v20 }
 0x6a3   :  { %v2696_v44 = vadd.f32 1e-05, %v2688_v34 }
 0x6a5   :  { %3497 = vrsqrt.f32 %v2696_v44  ;;  %vm2710_vm5 = vweird.f32 %v2696_v44 }
 0x6a8   :  { %v2639_v38 = vpop.xlane.xlu2 %2638 }
 0x6a9   :  { %v2647_v62 = vmul.f32 %v2639_v38, %v3748_v20 }
 0x6ab   :  { %v3498_v27 = vpop.eup %3497  ;;  %v5359_v23 = vsub.f32 %v5262_v58, %v2647_v62 }
 0x6ac   :  { %v2705_v15 = vmul.f32 %v3498_v27, %v2696_v44  ;;  %vm2711_vm11 = vweird.f32 %v3498_v27 }
 0x6ad   :  { %v2663_v63 = vmul.f32 %v5359_v23, %v5359_v23  ;;  %vm2712_vm7 = vmor %vm2710_vm5, %vm2711_vm11 }
 0x6ae   :  { %v2706_v19 = vmul.f32 %v3498_v27, %v2705_v15 }
 0x6af   :  { %v2685_v47 = vsel %vm109_vm0, %v2663_v63, 0.0 }
 0x6b0   :  { %v2707_v10 = vmul.f32 0.5, %v2706_v19  ;;  %2686 = vadd.xlane.f32.xlu2 %v2685_v47 }
 0x6b2   :  { %v2708_v17 = vsub.f32 1.5, %v2707_v10 }
 0x6b4   :  { %v2709_v3 = vmul.f32 %v3498_v27, %v2708_v17 }
 0x6b6   :  { %v2713_v45 = vsel %vm2712_vm7, %v3498_v27, %v2709_v3 }
 0x6b7   :  { %v2784_v52 = vmul.f32 %v2713_v45, %v5256_v9  ;;  %v2669_v22 = vpop.xlane.xlu0 %2668 }
 0x6b8   :  { %v2689_v54 = vmul.f32 %v2669_v22, %v3748_v20  ;;  %v2972_v22 = vld [vmem:[%s5572_s10 + $0x70] sm:$0xff] }
 0x6b9   :  { %v2795_v8 = vmul.f32 %v5367_v59, %v2784_v52  ;;  %v2989_v52 = vld [vmem:[%s5572_s10 + $0xf8] sm:$0xff] }
 0x6ba   :  { %v2697_v39 = vadd.f32 1e-05, %v2689_v54  ;;  %3035 = vmatpush.msrb.mxu3 %v2989_v52  ;;  %v2980_v52 = vld [vmem:[%s5572_s10 + $0xb0] sm:$0xff] }
 0x6bb   :  { %v2806_v31 = vadd.f32 %v5369_v6, %v2795_v8  ;;  %v2988_v8 = vld [vmem:[%s5572_s10 + $0xf0] sm:$0xff] }
 0x6bc   :  { %3499 = vrsqrt.f32 %v2697_v39  ;;  %vm2720_vm8 = vweird.f32 %v2697_v39  ;;  %3036 = vmatpush.msrb.mxu3 %v2988_v8  ;;  %v2962_v8 = vld [vmem:[%s5572_s10 + $0x20] sm:$0xff] }
 0x6bd   :  { %3257 = vmatmul.msk.f32.vlgmr.msra.gmra.mxu0 %vm109_vm0, %v2806_v31  ;;  %3265 = vmatmul.msk.f32.vlgmr.msra.gmra.mxu1 %vm109_vm0, %v2806_v31 }
 0x6c2   :  { %v3500_v26 = vpop.eup %3499  ;;  %v2672_v37 = vpop.xlane.xlu1 %2671 }
 0x6c3   :  { %v2715_v51 = vmul.f32 %v3500_v26, %v2697_v39  ;;  %v2690_v61 = vmul.f32 %v2672_v37, %v3748_v20  ;;  %vm2721_vm6 = vweird.f32 %v3500_v26 }
 0x6c4   :  { %vm2722_vm9 = vmor %vm2720_vm8, %vm2721_vm6 }
 0x6c5   :  { %v2716_v53 = vmul.f32 %v3500_v26, %v2715_v51  ;;  %v2698_v9 = vadd.f32 1e-05, %v2690_v61 }
 0x6c7   :  { %v2717_v5 = vmul.f32 0.5, %v2716_v53  ;;  %3501 = vrsqrt.f32 %v2698_v9  ;;  %vm2730_vm12 = vweird.f32 %v2698_v9 }
 0x6c9   :  { %v2718_v60 = vsub.f32 1.5, %v2717_v5 }
 0x6cb   :  { %v2719_v40 = vmul.f32 %v3500_v26, %v2718_v60  ;;  %v2675_v21 = vpop.xlane.xlu0 %2674 }
 0x6cc   :  { %v2691_v11 = vmul.f32 %v2675_v21, %v3748_v20 }
 0x6cd   :  { %v2723_v32 = vsel %vm2722_vm9, %v3500_v26, %v2719_v40  ;;  %v3502_v49 = vpop.eup %3501 }
 0x6ce   :  { %v2785_v57 = vmul.f32 %v2723_v32, %v5268_v4  ;;  %v2699_v48 = vadd.f32 1e-05, %v2691_v11  ;;  %v2725_v13 = vmul.f32 %v3502_v49, %v2698_v9  ;;  %vm2731_vm10 = vweird.f32 %v3502_v49 }
 0x6cf   :  { %vm2732_vm1 = vmor %vm2730_vm12, %vm2731_vm10 }
 0x6d0   :  { %3503 = vrsqrt.f32 %v2699_v48  ;;  %v2796_v7 = vmul.f32 %v5367_v59, %v2785_v57  ;;  %v2726_v28 = vmul.f32 %v3502_v49, %v2725_v13  ;;  %vm2740_vm14 = vweird.f32 %v2699_v48 }
 0x6d2   :  { %v2678_v42 = vpop.xlane.xlu2 %2677  ;;  %v2807_v43 = vadd.f32 %v5369_v6, %v2796_v7  ;;  %v2727_v55 = vmul.f32 0.5, %v2726_v28 }
 0x6d3   :  { %v2692_v34 = vmul.f32 %v2678_v42, %v3748_v20 }
 0x6d4   :  { %3258 = vmatmul.msk.f32.gmra.mxu0 %vm109_vm0, %v2807_v43  ;;  %3266 = vmatmul.msk.f32.gmra.mxu1 %vm109_vm0, %v2807_v43  ;;  %v2728_v14 = vsub.f32 1.5, %v2727_v55 }
 0x6d5   :  { %v2700_v1 = vadd.f32 1e-05, %v2692_v34 }
 0x6d6   :  { %v3504_v4 = vpop.eup %3503  ;;  %v2729_v44 = vmul.f32 %v3502_v49, %v2728_v14 }
 0x6d7   :  { %v2735_v46 = vmul.f32 %v3504_v4, %v2699_v48  ;;  %3505 = vrsqrt.f32 %v2700_v1  ;;  %vm2741_vm13 = vweird.f32 %v3504_v4  ;;  %vm2750_vm15 = vweird.f32 %v2700_v1 }
 0x6d8   :  { %v2733_v18 = vsel %vm2732_vm1, %v3502_v49, %v2729_v44  ;;  %vm2742_vm2 = vmor %vm2740_vm14, %vm2741_vm13 }
 0x6d9   :  { %v2736_v0 = vmul.f32 %v3504_v4, %v2735_v46  ;;  %v2786_v24 = vmul.f32 %v2733_v18, %v5275_v56  ;;  %v2973_v56 = vld [vmem:[%s5572_s10 + $0x78] sm:$0xff] }
 0x6da   :  { %v2681_v38 = vpop.xlane.xlu1 %2680  ;;  %2994 = vmatpush.msrb.mxu2 %v2973_v56  ;;  %v2964_v56 = vld [vmem:[%s5572_s10 + $0x30] sm:$0xff] }
 0x6db   :  { %v2737_v62 = vmul.f32 0.5, %v2736_v0  ;;  %v2693_v27 = vmul.f32 %v2681_v38, %v3748_v20  ;;  %v2797_v15 = vmul.f32 %v5367_v59, %v2786_v24  ;;  %v2971_v0 = vld [vmem:[%s5572_s10 + $0x68] sm:$0xff]  ;;  %v2986_v38 = vld [vmem:[%s5572_s10 + $0xe0] sm:$0xff] }
 0x6dc   :  { %2995 = vmatpush.msrb.mxu2 %v2972_v22  ;;  %v2987_v24 = vld [vmem:[%s5572_s10 + $0xe8] sm:$0xff] }
 0x6dd   :  { %v3506_v63 = vpop.eup %3505  ;;  %v2738_v19 = vsub.f32 1.5, %v2737_v62  ;;  %v2701_v47 = vadd.f32 1e-05, %v2693_v27  ;;  %v2808_v17 = vadd.f32 %v5369_v6, %v2797_v15  ;;  %3037 = vmatpush.msrb.mxu3 %v2987_v24  ;;  %v2969_v62 = vld [vmem:[%s5572_s10 + $0x58] sm:$0xff]  ;;  %v2968_v15 = vld [vmem:[%s5572_s10 + $0x50] sm:$0xff]  ;;  %v2963_v22 = vld [vmem:[%s5572_s10 + $0x28] sm:$0xff] }
 0x6de   :  { %v2745_v10 = vmul.f32 %v3506_v63, %v2700_v1  ;;  %vm2751_vm3 = vweird.f32 %v3506_v63  ;;  %2996 = vmatpush.msrb.mxu2 %v2971_v0  ;;  %v2985_v27 = vld [vmem:[%s5572_s10 + $0xd8] sm:$0xff] }
 0x6df   :  { %v2739_v3 = vmul.f32 %v3504_v4, %v2738_v19  ;;  %3507 = vrsqrt.f32 %v2701_v47  ;;  %3259 = vmatmul.msk.f32.gmra.mxu0 %vm109_vm0, %v2808_v17  ;;  %3267 = vmatmul.msk.f32.gmra.mxu1 %vm109_vm0, %v2808_v17  ;;  %vm2752_vm4 = vmor %vm2750_vm15, %vm2751_vm3  ;;  %vm2760_vm5 = vweird.f32 %v2701_v47  ;;  %v2967_v19 = vld [vmem:[%s5572_s10 + $0x48] sm:$0xff]  ;;  %v2982_v17 = vld [vmem:[%s5572_s10 + $0xc0] sm:$0xff] }
 0x6e0   :  { %v2746_v45 = vmul.f32 %v3506_v63, %v2745_v10  ;;  %3038 = vmatpush.msrb.mxu3 %v2986_v38  ;;  %v2966_v10 = vld [vmem:[%s5572_s10 + $0x40] sm:$0xff] }
 0x6e1   :  { %v2743_v54 = vsel %vm2742_vm2, %v3504_v4, %v2739_v3  ;;  %v2965_v3 = vld [vmem:[%s5572_s10 + $0x38] sm:$0xff] }
 0x6e2   :  { %v2787_v39 = vmul.f32 %v2743_v54, %v5282_v30  ;;  %v2747_v31 = vmul.f32 0.5, %v2746_v45  ;;  %v2684_v26 = vpop.xlane.xlu0 %2683  ;;  %3039 = vmatpush.msrb.mxu3 %v2985_v27  ;;  %v2981_v45 = vld [vmem:[%s5572_s10 + $0xb8] sm:$0xff]  ;;  %v2979_v54 = vld [vmem:[%s5572_s10 + $0xa8] sm:$0xff] }
 0x6e3   :  { %v2694_v51 = vmul.f32 %v2684_v26, %v3748_v20  ;;  %v2977_v26 = vld [vmem:[%s5572_s10 + $0x98] sm:$0xff] }
 0x6e4   :  { %v2748_v37 = vsub.f32 1.5, %v2747_v31  ;;  %v2798_v61 = vmul.f32 %v5367_v59, %v2787_v39  ;;  %v2978_v39 = vld [vmem:[%s5572_s10 + $0xa0] sm:$0xff]  ;;  %v2961_v31 = vld [vmem:[%s5572_s10 + $0x18] sm:$0xff] }
 0x6e5   :  { %v3508_v53 = vpop.eup %3507  ;;  %v2702_v9 = vadd.f32 1e-05, %v2694_v51  ;;  %v2960_v51 = vld [vmem:[%s5572_s10 + $0x10] sm:$0xff] }
 0x6e6   :  { %v2749_v5 = vmul.f32 %v3506_v63, %v2748_v37  ;;  %v2755_v60 = vmul.f32 %v3508_v53, %v2701_v47  ;;  %v2809_v40 = vadd.f32 %v5369_v6, %v2798_v61  ;;  %vm2761_vm11 = vweird.f32 %v3508_v53  ;;  %v2983_v47 = vld [vmem:[%s5572_s10 + $0xc8] sm:$0xff]  ;;  %v2976_v37 = vld [vmem:[%s5572_s10 + $0x90] sm:$0xff] }
 0x6e7   :  { %3509 = vrsqrt.f32 %v2702_v9  ;;  %vm2762_vm7 = vmor %vm2760_vm5, %vm2761_vm11  ;;  %vm2770_vm8 = vweird.f32 %v2702_v9 }
 0x6e8   :  { %v2753_v30 = vsel %vm2752_vm4, %v3506_v63, %v2749_v5  ;;  %v2756_v21 = vmul.f32 %v3508_v53, %v2755_v60  ;;  %3260 = vmatmul.msk.f32.gmra.mxu0 %vm109_vm0, %v2809_v40  ;;  %3268 = vmatmul.msk.f32.gmra.mxu1 %vm109_vm0, %v2809_v40  ;;  %v2984_v63 = vld [vmem:[%s5572_s10 + $0xd0] sm:$0xff]  ;;  %v2975_v5 = vld [vmem:[%s5572_s10 + $0x88] sm:$0xff]  ;;  %v2958_v40 = vld [vmem:[%s5572_s10] sm:$0xff] }
 0x6e9   :  { %v2788_v11 = vmul.f32 %v2753_v30, %v5289_v50  ;;  %3040 = vmatpush.msrb.mxu3 %v2984_v63  ;;  %v2974_v30 = vld [vmem:[%s5572_s10 + $0x80] sm:$0xff] }
 0x6ea   :  { %v2757_v32 = vmul.f32 0.5, %v2756_v21 }
 0x6eb   :  { %v2799_v49 = vmul.f32 %v5367_v59, %v2788_v11  ;;  %3041 = vmatpush.msrb.mxu3 %v2983_v47 }
 0x6ec   :  { %v2758_v57 = vsub.f32 1.5, %v2757_v32 }
 0x6ed   :  { %v3510_v48 = vpop.eup %3509  ;;  %v2810_v13 = vadd.f32 %v5369_v6, %v2799_v49  ;;  %3042 = vmatpush.msrb.mxu3 %v2982_v17  ;;  %v2830_v49 = vld [vmem:[%s5571_s9] sm:$0x3] }
 0x6ee   :  { %v2759_v7 = vmul.f32 %v3508_v53, %v2758_v57  ;;  %v2765_v28 = vmul.f32 %v3510_v48, %v2702_v9  ;;  %vm2771_vm6 = vweird.f32 %v3510_v48  ;;  %v2959_v9 = vld [vmem:[%s5572_s10 + $0x8] sm:$0xff] }
 0x6ef   :  { %vm2772_vm9 = vmor %vm2770_vm8, %vm2771_vm6  ;;  %3043 = vmatpush.msrb.mxu3 %v2981_v45 }
 0x6f0   :  { %v2763_v42 = vsel %vm2762_vm7, %v3508_v53, %v2759_v7  ;;  %v2766_v43 = vmul.f32 %v3510_v48, %v2765_v28  ;;  %3261 = vmatmul.msk.f32.gmra.mxu0 %vm109_vm0, %v2810_v13  ;;  %3269 = vmatmul.msk.f32.gmra.mxu1 %vm109_vm0, %v2810_v13  ;;  %v5512_v13 = vperm.slane %v2830_v49, 0  ;;  %v5514_v7 = vperm.slane %v2830_v49, 1 }
 0x6f1   :  { %v2789_v50 = vmul.f32 %v2763_v42, %v5296_v16  ;;  %3044 = vmatpush.msrb.mxu3 %v2980_v52 }
 0x6f2   :  { %v2767_v55 = vmul.f32 0.5, %v2766_v43 }
 0x6f3   :  { %v2800_v34 = vmul.f32 %v5367_v59, %v2789_v50  ;;  %3045 = vmatpush.msrb.mxu3 %v2979_v54 }
 0x6f4   :  { %v2768_v14 = vsub.f32 1.5, %v2767_v55 }
 0x6f5   :  { %v2811_v1 = vadd.f32 %v5369_v6, %v2800_v34  ;;  %3046 = vmatpush.msrb.mxu3 %v2978_v39 }
 0x6f6   :  { %v2769_v4 = vmul.f32 %v3510_v48, %v2768_v14 }
 0x6f7   :  { %3047 = vmatpush.msrb.mxu3 %v2977_v26 }
 0x6f8   :  { %v2773_v44 = vsel %vm2772_vm9, %v3510_v48, %v2769_v4  ;;  %3262 = vmatmul.msk.f32.gmra.mxu0 %vm109_vm0, %v2811_v1  ;;  %3270 = vmatmul.msk.f32.gmra.mxu1 %vm109_vm0, %v2811_v1 }
 0x6f9   :  { %v2790_v46 = vmul.f32 %v2773_v44, %v5303_v36  ;;  %v2970_v36 = vld [vmem:[%s5572_s10 + $0x60] sm:$0xff]  ;;  %3048 = vmatpush.msrb.mxu3 %v2976_v37 }
 0x6fa   :  { %2997 = vmatpush.msrb.mxu2 %v2970_v36 }
 0x6fb   :  { %v2801_v18 = vmul.f32 %v5367_v59, %v2790_v46  ;;  %3049 = vmatpush.msrb.mxu3 %v2975_v5 }
 0x6fc   :  { %2998 = vmatpush.msrb.mxu2 %v2969_v62 }
 0x6fd   :  { %v2812_v16 = vadd.f32 %v5369_v6, %v2801_v18  ;;  %3050 = vmatpush.msrb.mxu3 %v2974_v30 }
 0x6fe   :  { %2999 = vmatpush.msrb.mxu2 %v2968_v15 }
 0x700   :  { %3263 = vmatmul.msk.f32.gmra.mxu0 %vm109_vm0, %v2812_v16  ;;  %3271 = vmatmul.msk.f32.gmra.mxu1 %vm109_vm0, %v2812_v16 }
 0x701   :  { %3000 = vmatpush.msrb.mxu2 %v2967_v19 }
 0x703   :  { %3001 = vmatpush.msrb.mxu2 %v2966_v10 }
 0x705   :  { %3002 = vmatpush.msrb.mxu2 %v2965_v3 }
 0x707   :  { %3003 = vmatpush.msrb.mxu2 %v2964_v56 }
 0x709   :  { %3004 = vmatpush.msrb.mxu2 %v2963_v22 }
 0x70b   :  { %3005 = vmatpush.msrb.mxu2 %v2962_v8 }
 0x70d   :  { %3006 = vmatpush.msrb.mxu2 %v2961_v31 }
 0x70f   :  { %3007 = vmatpush.msrb.mxu2 %v2960_v51 }
 0x711   :  { %3008 = vmatpush.msrb.mxu2 %v2959_v9 }
 0x713   :  { %3009 = vmatpush.msrb.mxu2 %v2958_v40 }
 0x723   :  { %v2687_v61 = vpop.xlane.xlu2 %2686 }
 0x724   :  { %v2695_v53 = vmul.f32 %v2687_v61, %v3748_v20 }
 0x726   :  { %v2703_v60 = vadd.f32 1e-05, %v2695_v53 }
 0x728   :  { %3511 = vrsqrt.f32 %v2703_v60  ;;  %vm2780_vm12 = vweird.f32 %v2703_v60 }
 0x72e   :  { %v3512_v20 = vpop.eup %3511 }
 0x72f   :  { %v2775_v21 = vmul.f32 %v3512_v20, %v2703_v60  ;;  %vm2781_vm10 = vweird.f32 %v3512_v20 }
 0x730   :  { %vm2782_vm1 = vmor %vm2780_vm12, %vm2781_vm10 }
 0x731   :  { %v2776_v11 = vmul.f32 %v3512_v20, %v2775_v21 }
 0x733   :  { %v2777_v32 = vmul.f32 0.5, %v2776_v11 }
 0x735   :  { %v2778_v57 = vsub.f32 1.5, %v2777_v32  ;;  %v3350_v32 = vld [vmem:[%s5573_s11] ss:$0 sm:$0xff]  ;;  %s3660_s11 = smov [#allocation10]  }
 0x736   :  { %s3096_s29 = sshll.u32 %s3660_s11, 4  ;;  %s3097_s29 = int_to_ptr.vmem [resolvable:$true] %s3096_s29 }
 0x737   :  { %v2779_v48 = vmul.f32 %v3512_v20, %v2778_v57 }
 0x739   :  { %v2783_v28 = vsel %vm2782_vm1, %v3512_v20, %v2779_v48 }
 0x73a   :  { %v2791_v42 = vmul.f32 %v2783_v28, %v5359_v23  ;;  %v2877_v43 = vpop.f32.mrf.mxu0  ;;  %v2918_v50 = vpop.f32.mrf.mxu1 }
 0x73b   :  { %v2878_v55 = vadd.f32 %v2877_v43, %v5512_v13  ;;  %v2919_v34 = vadd.f32 %v2918_v50, %v5514_v7 }
 0x73c   :  { %v2802_v14 = vmul.f32 %v5367_v59, %v2791_v42 }
 0x73d   :  { %v2942_v1 = vmax.f32 %v2878_v55, 0.0  ;;  %v2943_v4 = vmax.f32 %v2919_v34, 0.0 }
 0x73e   :  { %v2813_v44 = vadd.f32 %v5369_v6, %v2802_v14 }
 0x73f   :  { %3010 = vmatmul.f32.vlgmr.msrb.gmra.mxu2 %v2942_v1  ;;  %3051 = vmatmul.f32.vlgmr.msrb.gmra.mxu3 %v2943_v4 }
 0x740   :  { %3264 = vmatmul.msk.f32.gmra.mxu0 %vm109_vm0, %v2813_v44  ;;  %3272 = vmatmul.msk.f32.gmra.mxu1 %vm109_vm0, %v2813_v44 }
 0x751   :  { %v2880_v46 = vpop.f32.mrf.mxu0  ;;  %v2921_v23 = vpop.f32.mrf.mxu1 }
 0x752   :  { %v2881_v18 = vadd.f32 %v2880_v46, %v5512_v13  ;;  %v2922_v16 = vadd.f32 %v2921_v23, %v5514_v7 }
 0x754   :  { %v2944_v0 = vmax.f32 %v2881_v18, 0.0  ;;  %v2945_v24 = vmax.f32 %v2922_v16, 0.0 }
 0x756   :  { %3013 = vmatmul.f32.gmra.mxu2 %v2944_v0  ;;  %3054 = vmatmul.f32.gmra.mxu3 %v2945_v24 }
 0x75c   :  { %v2883_v59 = vpop.f32.mrf.mxu0  ;;  %v2924_v36 = vpop.f32.mrf.mxu1 }
 0x75d   :  { %v2884_v6 = vadd.f32 %v2883_v59, %v5512_v13  ;;  %v2925_v38 = vadd.f32 %v2924_v36, %v5514_v7 }
 0x75f   :  { %v2946_v62 = vmax.f32 %v2884_v6, 0.0  ;;  %v2947_v27 = vmax.f32 %v2925_v38, 0.0 }
 0x761   :  { %3016 = vmatmul.f32.gmra.mxu2 %v2946_v62  ;;  %3057 = vmatmul.f32.gmra.mxu3 %v2947_v27 }
 0x765   :  { %v2886_v15 = vpop.f32.mrf.mxu0  ;;  %v2927_v63 = vpop.f32.mrf.mxu1 }
 0x766   :  { %v2887_v19 = vadd.f32 %v2886_v15, %v5512_v13  ;;  %v2928_v47 = vadd.f32 %v2927_v63, %v5514_v7 }
 0x768   :  { %v2948_v10 = vmax.f32 %v2887_v19, 0.0  ;;  %v2949_v17 = vmax.f32 %v2928_v47, 0.0 }
 0x76a   :  { %3019 = vmatmul.f32.gmra.mxu2 %v2948_v10  ;;  %3060 = vmatmul.f32.gmra.mxu3 %v2949_v17 }
 0x76d   :  { %v2889_v3 = vpop.f32.mrf.mxu0  ;;  %v2930_v45 = vpop.f32.mrf.mxu1 }
 0x76e   :  { %v2890_v56 = vadd.f32 %v2889_v3, %v5512_v13  ;;  %v2931_v52 = vadd.f32 %v2930_v45, %v5514_v7 }
 0x770   :  { %v2950_v22 = vmax.f32 %v2890_v56, 0.0  ;;  %v2951_v54 = vmax.f32 %v2931_v52, 0.0 }
 0x772   :  { %3022 = vmatmul.f32.gmra.mxu2 %v2950_v22  ;;  %3063 = vmatmul.f32.gmra.mxu3 %v2951_v54 }
 0x775   :  { %v2892_v8 = vpop.f32.mrf.mxu0  ;;  %v2933_v39 = vpop.f32.mrf.mxu1 }
 0x776   :  { %v2893_v31 = vadd.f32 %v2892_v8, %v5512_v13  ;;  %v2934_v26 = vadd.f32 %v2933_v39, %v5514_v7 }
 0x778   :  { %v2952_v51 = vmax.f32 %v2893_v31, 0.0  ;;  %v2953_v37 = vmax.f32 %v2934_v26, 0.0 }
 0x77a   :  { %3025 = vmatmul.f32.gmra.mxu2 %v2952_v51  ;;  %3066 = vmatmul.f32.gmra.mxu3 %v2953_v37 }
 0x77d   :  { %v2895_v61 = vpop.f32.mrf.mxu0  ;;  %v2936_v53 = vpop.f32.mrf.mxu1 }
 0x77e   :  { %v2896_v9 = vadd.f32 %v2895_v61, %v5512_v13  ;;  %v2937_v5 = vadd.f32 %v2936_v53, %v5514_v7 }
 0x780   :  { %v2954_v60 = vmax.f32 %v2896_v9, 0.0  ;;  %v2955_v40 = vmax.f32 %v2937_v5, 0.0 }
 0x782   :  { %3028 = vmatmul.f32.gmra.mxu2 %v2954_v60  ;;  %3069 = vmatmul.f32.gmra.mxu3 %v2955_v40 }
 0x7bd   :  { %v2898_v30 = vpop.f32.mrf.mxu0  ;;  %v2939_v20 = vpop.f32.mrf.mxu1 }
 0x7be   :  { %v2899_v21 = vadd.f32 %v2898_v30, %v5512_v13  ;;  %v2940_v11 = vadd.f32 %v2939_v20, %v5514_v7 }
 0x7c0   :  { %v2956_v49 = vmax.f32 %v2899_v21, 0.0  ;;  %v2957_v57 = vmax.f32 %v2940_v11, 0.0 }
 0x7c2   :  { %v3011_v48 = vpop.f32.mrf.mxu2  ;;  %3031 = vmatmul.f32.gmra.mxu2 %v2956_v49  ;;  %3072 = vmatmul.f32.gmra.mxu3 %v2957_v57  ;;  %v3052_v42 = vpop.f32.mrf.mxu3 }
 0x7c3   :  { %v3012_v28 = vadd.f32 %v3350_v32, %v3011_v48 }
 0x7c5   :  { %v3053_v43 = vadd.f32 %v3052_v42, %v3012_v28 }
 0x7c7   :  { %v3076_v50 = vadd.f32 %v3053_v43, %v5220_v29 }
 0x7c9   :  { %3084 = vst.msk [vmem:[#allocation10] sm:$0xff] %vm109_vm0, %v3076_v50 }
 0x7d9   :  { %v3014_v55 = vpop.f32.mrf.mxu2  ;;  %v3055_v34 = vpop.f32.mrf.mxu3 }
 0x7da   :  { %v3015_v13 = vadd.f32 %v3350_v32, %v3014_v55 }
 0x7dc   :  { %v3056_v7 = vadd.f32 %v3055_v34, %v3015_v13 }
 0x7de   :  { %v3077_v14 = vadd.f32 %v3056_v7, %v5225_v25 }
 0x7e0   :  { %3085 = vst.msk [vmem:[#allocation10 + $0x8] sm:$0xff] %vm109_vm0, %v3077_v14 }
 0x7e4   :  { %v3017_v1 = vpop.f32.mrf.mxu2  ;;  %v3058_v4 = vpop.f32.mrf.mxu3 }
 0x7e5   :  { %v3018_v44 = vadd.f32 %v3350_v32, %v3017_v1 }
 0x7e7   :  { %v3059_v46 = vadd.f32 %v3058_v4, %v3018_v44 }
 0x7e9   :  { %v3078_v23 = vadd.f32 %v3059_v46, %v5230_v41 }
 0x7eb   :  { %3086 = vst.msk [vmem:[#allocation10 + $0x10] sm:$0xff] %vm109_vm0, %v3078_v23 }
 0x7ed   :  { %v3020_v18 = vpop.f32.mrf.mxu2  ;;  %v3061_v29 = vpop.f32.mrf.mxu3 }
 0x7ee   :  { %v3021_v16 = vadd.f32 %v3350_v32, %v3020_v18 }
 0x7f0   :  { %v3062_v0 = vadd.f32 %v3061_v29, %v3021_v16 }
 0x7f2   :  { %v3079_v24 = vadd.f32 %v3062_v0, %v5235_v35 }
 0x7f4   :  { %3087 = vst.msk [vmem:[#allocation10 + $0x18] sm:$0xff] %vm109_vm0, %v3079_v24 }
 0x7f5   :  { %v3023_v59 = vpop.f32.mrf.mxu2  ;;  %v3064_v25 = vpop.f32.mrf.mxu3 }
 0x7f6   :  { %v3024_v36 = vadd.f32 %v3350_v32, %v3023_v59 }
 0x7f8   :  { %v3065_v6 = vadd.f32 %v3064_v25, %v3024_v36 }
 0x7fa   :  { %v3080_v38 = vadd.f32 %v3065_v6, %v5240_v12 }
 0x7fc   :  { %3088 = vst.msk [vmem:[#allocation10 + $0x20] sm:$0xff] %vm109_vm0, %v3080_v38 }
 0x7fd   :  { %v3026_v62 = vpop.f32.mrf.mxu2  ;;  %v3067_v41 = vpop.f32.mrf.mxu3 }
 0x7fe   :  { %v3027_v27 = vadd.f32 %v3350_v32, %v3026_v62 }
 0x800   :  { %v3068_v15 = vadd.f32 %v3067_v41, %v3027_v27 }
 0x802   :  { %v3081_v63 = vadd.f32 %v3068_v15, %v5245_v33 }
 0x804   :  { %3089 = vst.msk [vmem:[#allocation10 + $0x28] sm:$0xff] %vm109_vm0, %v3081_v63 }
 0x805   :  { %v3029_v19 = vpop.f32.mrf.mxu2  ;;  %v3070_v47 = vpop.f32.mrf.mxu3 }
 0x806   :  { %v3030_v35 = vadd.f32 %v3350_v32, %v3029_v19 }
 0x808   :  { %v3071_v10 = vadd.f32 %v3070_v47, %v3030_v35 }
 0x80a   :  { %v3082_v17 = vadd.f32 %v3071_v10, %v5250_v2 }
 0x80c   :  { %3090 = vst.msk [vmem:[#allocation10 + $0x30] sm:$0xff] %vm109_vm0, %v3082_v17 }
 0x845   :  { %v3032_v3 = vpop.f32.mrf.mxu2  ;;  %v3073_v45 = vpop.f32.mrf.mxu3 }
 0x846   :  { %v3033_v12 = vadd.f32 %v3350_v32, %v3032_v3 }
 0x848   :  { %v3074_v33 = vadd.f32 %v3073_v45, %v3033_v12 }
 0x84a   :  { %v3083_v56 = vadd.f32 %v3074_v33, %v5262_v58 }
 0x84c   :  { %3091 = vst.msk [vmem:[#allocation10 + $0x38] sm:$0xff] %vm109_vm0, %v3083_v56 }
 0x84d   :  { %3104 = dma.vmem_to_hbm [thread:$0]  %s3097_s29, 1024, %s3099_s15, [#allocation4], %s3651_s13, %s3651_s13, %s3652_s14  }
 0x84e   :  { %3647 = dma.done.wait [#allocation4], 1024  }
 0x84f   :  { %3648 = vsyncadd [#allocation4], 4294966272 }
 0x850   :  { %3109 = vsyncpa [#allocation3], 1 }
 0x851   :  { %3110 = vsyncpa [#allocation6], 1 }
 0x852   :  { %3111 = vsyncpa [#allocation9], 1 }
 0x853   :  { %3112 = vsyncpa [#allocation4], 1 }

</bundles_post_ra>
